<compile_context>
chip_gen: v6e
topology: v6e:2x2x1
jax: 0.10.0
libtpu: 0.0.40
codegen_flags: <defaults>
</compile_context>

<pallas_src>
import jax
import jax.numpy as jnp
from jax.experimental import pallas as pl
from jax.experimental.pallas import tpu as pltpu


# ----------------------------------------------------------------------------
# Helpers
# ----------------------------------------------------------------------------
def _pick_nb(b, cap):
    """Images per grid step: whole batch if small, else a divisor that is a
    multiple of 8 (keeps every block_shape dim (8,128)-friendly)."""
    if b <= cap:
        return b
    for nb in range(cap, 0, -1):
        if b % nb == 0 and nb % 8 == 0:
            return nb
    return b


def _pool_quadrant_patches(x, nb, pixel_major):
    """im2col patches (3x3, pad 1) for a conv whose output is 2x2/stride-2
    max-pooled, with rows pre-ordered by pooling quadrant.

    x: (B, H, W, C) NHWC activation.
    Returns (B//nb * 4*nb*(H//2)*(W//2), 9*C).  Within each batch block of `nb`
    images the rows are ordered (py, px, nb, h2, w2) if pixel_major is False,
    else (py, px, h2, w2, nb), where (py, px) is the position inside the 2x2
    pooling window.  The kernel then pools with four contiguous row slices.
    """
    B, H, W, C = x.shape
    H2, W2 = H // 2, W // 2
    xp = jnp.pad(x, ((0, 0), (1, 1), (1, 1), (0, 0)))
    # patch channel order = (dy, dx, c) -> matches w.reshape(9*C, Cout)
    pat = jnp.concatenate(
        [xp[:, dy:dy + H, dx:dx + W, :] for dy in range(3) for dx in range(3)],
        axis=-1)                                          # (B, H, W, 9C)
    pat = pat.reshape(B // nb, nb, H2, 2, W2, 2, 9 * C)   # (blk, nb, h2, py, w2, px, ch)
    perm = (0, 3, 5, 2, 4, 1, 6) if pixel_major else (0, 3, 5, 1, 2, 4, 6)
    pat = jnp.transpose(pat, perm)
    return pat.reshape((B // nb) * 4 * nb * H2 * W2, 9 * C)


# ----------------------------------------------------------------------------
# Kernel 1: conv1 (im2col matmul) + bias + ReLU + 2x2 max-pool, batch folded
# into M, pooling done on MXU-output registers via quadrant row slices.
# ----------------------------------------------------------------------------
def _conv_pool_kernel(p_ref, w_ref, b_ref, o_ref):
    # p_ref: (4*Q, 9*Cin) bf16 patches, rows = [q00; q01; q10; q11]
    # w_ref: (9*Cin, Cout) bf16;  b_ref: (1, Cout) f32;  o_ref: (Q, Cout) bf16
    q = o_ref.shape[0]
    acc = jnp.dot(p_ref[...], w_ref[...], preferred_element_type=jnp.float32)
    pooled = jnp.maximum(jnp.maximum(acc[0:q], acc[q:2 * q]),
                         jnp.maximum(acc[2 * q:3 * q], acc[3 * q:4 * q]))
    # bias + ReLU after the max is valid (bias is constant, ReLU monotonic).
    o_ref[...] = jnp.maximum(pooled + b_ref[...], 0.0).astype(o_ref.dtype)


def conv_relu_pool(patches, w, b, *, nb, hw_out, cout):
    q = nb * hw_out
    kk = patches.shape[1]
    bblk = patches.shape[0] // (4 * q)
    return pl.pallas_call(
        _conv_pool_kernel,
        out_shape=jax.ShapeDtypeStruct((bblk * q, cout), jnp.bfloat16),
        grid_spec=pltpu.PrefetchScalarGridSpec(
            num_scalar_prefetch=0,
            grid=(bblk,),
            in_specs=[
                pl.BlockSpec((4 * q, kk), lambda i: (i, 0)),
                pl.BlockSpec((kk, cout), lambda i: (0, 0)),   # weights resident
                pl.BlockSpec((1, cout), lambda i: (0, 0)),
            ],
            out_specs=pl.BlockSpec((q, cout), lambda i: (i, 0)),
        ),
        compiler_params=pltpu.CompilerParams(dimension_semantics=("parallel",)),
    )(patches, w, b)


# ----------------------------------------------------------------------------
# Kernel 2 (fused): conv2 + bias + ReLU + 2x2 max-pool + fc1 + ReLU + fc2 +
# ReLU + [value | advantage] heads.  All weights resident in VMEM (bf16);
# activations never leave VMEM after the conv2 patches are read.
# ----------------------------------------------------------------------------
def _conv_pool_mlp_kernel(p_ref, wc_ref, bc_ref, w1_ref, b1_ref,
                          w2_ref, b2_ref, wh_ref, bh_ref,
                          out_ref, pooled_ref):
    nb = out_ref.shape[0]            # images in this batch block
    q = pooled_ref.shape[0]          # nb * n_pix pooled rows, ordered (h4, w4, nb)
    cc = pooled_ref.shape[1]         # conv channels (32)
    n_pix = q // nb

    # conv2 as one im2col matmul over all four pooling quadrants, then pool.
    acc = jnp.dot(p_ref[...], wc_ref[...], preferred_element_type=jnp.float32)
    pooled = jnp.maximum(jnp.maximum(acc[0:q], acc[q:2 * q]),
                         jnp.maximum(acc[2 * q:3 * q], acc[3 * q:4 * q]))
    pooled_ref[...] = jnp.maximum(pooled + bc_ref[...], 0.0)   # f32 in VMEM

    # fc1: sum over pooled pixels.  w1 rows are grouped per pixel in NHWC
    # (h4, w4, c) order, which together with the (h4, w4, nb) row order of
    # pooled_ref replaces the runtime flatten/transpose of the torch model.
    h = jnp.zeros((nb, b1_ref.shape[1]), jnp.float32)
    for p in range(n_pix):
        xs = pooled_ref[pl.ds(p * nb, nb), :].astype(jnp.bfloat16)   # (nb, 32)
        ws = w1_ref[pl.ds(p * cc, cc), :]                            # (32, 1024)
        h = h + jnp.dot(xs, ws, preferred_element_type=jnp.float32)
    h = jnp.maximum(h + b1_ref[...], 0.0).astype(jnp.bfloat16)

    h = jnp.dot(h, w2_ref[...], preferred_element_type=jnp.float32) + b2_ref[...]
    h = jnp.maximum(h, 0.0).astype(jnp.bfloat16)

    # fused heads: column 0 = value, columns 1.. = advantage logits
    out_ref[...] = (jnp.dot(h, wh_ref[...], preferred_element_type=jnp.float32)
                    + bh_ref[...])


def conv_relu_pool_mlp(patches, wc, bc, w1, b1, w2, b2, wh, bh, *, nb, n_pix):
    q = nb * n_pix
    kk = patches.shape[1]
    bblk = patches.shape[0] // (4 * q)
    cout = wc.shape[1]
    n_head = wh.shape[1]
    return pl.pallas_call(
        _conv_pool_mlp_kernel,
        out_shape=jax.ShapeDtypeStruct((bblk * nb, n_head), jnp.float32),
        grid_spec=pltpu.PrefetchScalarGridSpec(
            num_scalar_prefetch=0,
            grid=(bblk,),
            in_specs=[
                pl.BlockSpec((4 * q, kk), lambda i: (i, 0)),
                pl.BlockSpec((kk, cout), lambda i: (0, 0)),
                pl.BlockSpec((1, cout), lambda i: (0, 0)),
                pl.BlockSpec(w1.shape, lambda i: (0, 0)),
                pl.BlockSpec((1, b1.shape[1]), lambda i: (0, 0)),
                pl.BlockSpec(w2.shape, lambda i: (0, 0)),
                pl.BlockSpec((1, b2.shape[1]), lambda i: (0, 0)),
                pl.BlockSpec(wh.shape, lambda i: (0, 0)),
                pl.BlockSpec((1, n_head), lambda i: (0, 0)),
            ],
            out_specs=pl.BlockSpec((nb, n_head), lambda i: (i, 0)),
            scratch_shapes=[pltpu.VMEM((q, cout), jnp.float32)],
        ),
        compiler_params=pltpu.CompilerParams(dimension_semantics=("parallel",)),
    )(patches, wc, bc, w1, b1, w2, b2, wh, bh)


# ----------------------------------------------------------------------------
# Full forward pass (mirrors CustomTorchModel.forward).
# ----------------------------------------------------------------------------
def custom_model_forward(obs, prep):
    B, d1, d2, cin = obs.shape
    H, W = d2, d1                      # obs.transpose(1,3) -> NCHW (B, C, d2, d1)
    assert H % 4 == 0 and W % 4 == 0

    x = jnp.transpose(obs, (0, 2, 1, 3)).astype(jnp.float32) * (1.0 / 255.0)
    x = x.astype(jnp.bfloat16)

    # conv1 + ReLU + pool  (batch folded into one matmul per grid step)
    nb1 = _pick_nb(B, 16)
    p1 = _pool_quadrant_patches(x, nb1, pixel_major=False)
    pooled1 = conv_relu_pool(p1, prep["w_conv1"], prep["b_conv1"],
                             nb=nb1, hw_out=(H // 2) * (W // 2), cout=32)
    pooled1 = pooled1.reshape(B, H // 2, W // 2, 32)        # rows were (b, h2, w2)

    # conv2 + ReLU + pool + fc1 + fc2 + heads, all in one fused kernel
    nb2 = _pick_nb(B, 64)
    p2 = _pool_quadrant_patches(pooled1, nb2, pixel_major=True)
    head = conv_relu_pool_mlp(
        p2, prep["w_conv2"], prep["b_conv2"],
        prep["w_fc1"], prep["b_fc1"], prep["w_fc2"], prep["b_fc2"],
        prep["w_head"], prep["b_head"],
        nb=nb2, n_pix=(H // 4) * (W // 4))

    value = head[:, 0]          # value_function_fc(x).view(-1)
    logits = head[:, 1:]        # advantage_function_fc(x)
    return logits, value


# ----------------------------------------------------------------------------
# Parameters.  init_params generates weights directly in the Pallas-friendly
# layouts; prepare_params does the one-time repack (im2col-flattened conv
# weights, bf16 matmul operands, f32 biases, fused head).  For real torch
# checkpoints convert once at load time:
#   conv:  w.permute(2, 3, 1, 0)                       (Cout,Cin,kh,kw)->(kh,kw,Cin,Cout)
#   fc:    w.T                                         (out,in)->(in,out)
#   fc1:   additionally permute rows (c,h4,w4)->(h4,w4,c) so it accepts the
#          NHWC-flattened conv output with no runtime transpose.
# ----------------------------------------------------------------------------
def init_params(key, num_outputs, H, W, cin=16):
    ks = jax.random.split(key, 6)

    def rnd(k, shape, fan_in):
        return jax.random.normal(k, shape, jnp.float32) / jnp.sqrt(jnp.float32(fan_in))

    neurons = 32 * (H // 4) * (W // 4)
    return dict(
        conv1_w=rnd(ks[0], (3, 3, cin, 32), 9 * cin),
        conv1_b=jnp.full((32,), 0.01, jnp.float32),
        conv2_w=rnd(ks[1], (3, 3, 32, 32), 9 * 32),
        conv2_b=jnp.full((32,), 0.01, jnp.float32),
        fc1_w=rnd(ks[2], (neurons, 1024), neurons),   # rows ordered (h4, w4, c)
        fc1_b=jnp.zeros((1024,), jnp.float32),
        fc2_w=rnd(ks[3], (1024, 256), 1024),
        fc2_b=jnp.zeros((256,), jnp.float32),
        vf_w=rnd(ks[4], (256, 1), 256),
        vf_b=jnp.zeros((1,), jnp.float32),
        adv_w=rnd(ks[5], (256, num_outputs), 256),
        adv_b=jnp.zeros((num_outputs,), jnp.float32),
    )


def prepare_params(p):
    cin = p["conv1_w"].shape[2]
    return dict(
        w_conv1=p["conv1_w"].reshape(9 * cin, 32).astype(jnp.bfloat16),
        b_conv1=p["conv1_b"].reshape(1, -1).astype(jnp.float32),
        w_conv2=p["conv2_w"].reshape(9 * 32, 32).astype(jnp.bfloat16),
        b_conv2=p["conv2_b"].reshape(1, -1).astype(jnp.float32),
        w_fc1=p["fc1_w"].astype(jnp.bfloat16),
        b_fc1=p["fc1_b"].reshape(1, -1).astype(jnp.float32),
        w_fc2=p["fc2_w"].astype(jnp.bfloat16),
        b_fc2=p["fc2_b"].reshape(1, -1).astype(jnp.float32),
        w_head=jnp.concatenate([p["vf_w"], p["adv_w"]], axis=1).astype(jnp.bfloat16),
        b_head=jnp.concatenate([p["vf_b"], p["adv_b"]], axis=0).reshape(1, -1)
               .astype(jnp.float32),
    )


if __name__ == "__main__":
    key = jax.random.PRNGKey(0)
    k_obs, k_par = jax.random.split(key)

    # obs analogous to the RLlib obs: (B, d1, d2, C); transpose(1,3) -> NCHW (B,16,16,16)
    B, d1, d2, C = 2, 16, 16, 16
    num_outputs = 6
    obs = jax.random.uniform(k_obs, (B, d1, d2, C), jnp.float32, 0.0, 255.0)

    params = init_params(k_par, num_outputs, H=d2, W=d1, cin=C)
    prep = prepare_params(params)      # one-time weight repack (bf16, fused head)

    fwd = jax.jit(custom_model_forward)
    logits, value = fwd(obs, prep)
    jax.block_until_ready((logits, value))

    assert logits.shape == (B, num_outputs), logits.shape
    assert value.shape == (B,), value.shape
    print("KERNEL_OK")
</pallas_src>

<mosaic_0001>
module attributes {stable_mosaic.version = 11 : i64} {
  func.func @_conv_pool_kernel(%arg0: i32, %arg1: memref<512x144xbf16, #tpu.memory_space<vmem>>, %arg2: memref<144x32xbf16, #tpu.memory_space<vmem>>, %arg3: memref<1x32xf32, #tpu.memory_space<vmem>>, %arg4: memref<128x32xbf16, #tpu.memory_space<vmem>>) attributes {dimension_semantics = [#tpu.dimension_semantics<parallel>], iteration_bounds = array<i64: 1>, scalar_prefetch = 0 : i64, scratch_operands = 0 : i64, tpu.core_type = #tpu.core_type<tc>, window_params = [{transform_indices = @transform_0, window_bounds = array<i64: 512, 144>}, {pipeline_mode = #tpu.pipeline_mode<synchronous>, transform_indices = @transform_1, window_bounds = array<i64: 144, 32>}, {pipeline_mode = #tpu.pipeline_mode<synchronous>, transform_indices = @transform_2, window_bounds = array<i64: 1, 32>}, {transform_indices = @transform_3, window_bounds = array<i64: 128, 32>}]} {
    %c0 = arith.constant 0 : index
    %c0_0 = arith.constant 0 : index
    %0 = vector.load %arg1[%c0, %c0_0] : memref<512x144xbf16, #tpu.memory_space<vmem>>, vector<512x144xbf16>
    %c0_1 = arith.constant 0 : index
    %c0_2 = arith.constant 0 : index
    %1 = vector.load %arg2[%c0_1, %c0_2] : memref<144x32xbf16, #tpu.memory_space<vmem>>, vector<144x32xbf16>
    %cst = arith.constant dense<0.000000e+00> : vector<512x32xf32>
    %2 = tpu.matmul %0, %1, %cst {dimension_numbers = #tpu.dot_dimension_numbers<[1], [0], [0], [1], [0, 0, 1, 1], [], []>} : vector<512x144xbf16>, vector<144x32xbf16>, vector<512x32xf32> -> vector<512x32xf32>
    %3 = vector.extract_strided_slice %2 {offsets = [0, 0], sizes = [128, 32], strides = [1, 1]} : vector<512x32xf32> to vector<128x32xf32>
    %4 = vector.extract_strided_slice %2 {offsets = [128, 0], sizes = [128, 32], strides = [1, 1]} : vector<512x32xf32> to vector<128x32xf32>
    %5 = arith.maximumf %3, %4 : vector<128x32xf32>
    %6 = vector.extract_strided_slice %2 {offsets = [256, 0], sizes = [128, 32], strides = [1, 1]} : vector<512x32xf32> to vector<128x32xf32>
    %7 = vector.extract_strided_slice %2 {offsets = [384, 0], sizes = [128, 32], strides = [1, 1]} : vector<512x32xf32> to vector<128x32xf32>
    %8 = arith.maximumf %6, %7 : vector<128x32xf32>
    %9 = arith.maximumf %5, %8 : vector<128x32xf32>
    %c0_3 = arith.constant 0 : index
    %c0_4 = arith.constant 0 : index
    %10 = vector.load %arg3[%c0_3, %c0_4] : memref<1x32xf32, #tpu.memory_space<vmem>>, vector<1x32xf32>
    %11 = vector.broadcast %10 : vector<1x32xf32> to vector<128x32xf32>
    %12 = arith.addf %9, %11 : vector<128x32xf32>
    %cst_5 = arith.constant 0.000000e+00 : f32
    %13 = vector.broadcast %cst_5 : f32 to vector<128x32xf32>
    %14 = arith.maximumf %12, %13 : vector<128x32xf32>
    %15 = arith.truncf %14 : vector<128x32xf32> to vector<128x32xbf16>
    %c0_6 = arith.constant 0 : index
    %c0_7 = arith.constant 0 : index
    %16 = vector.load %arg4[%c0_6, %c0_7] : memref<128x32xbf16, #tpu.memory_space<vmem>>, vector<128x32xbf16>
    tpu.vector_store %arg4[%c0_6, %c0_7], %15 {strides = array<i32>} : memref<128x32xbf16, #tpu.memory_space<vmem>>, vector<128x32xbf16>,
    return
  }
  func.func @transform_0(%arg0: i32) -> (i32, i32) {
    %c0_i32 = arith.constant 0 : i32
    %c0_i32_0 = arith.constant 0 : i32
    return %arg0, %c0_i32 : i32, i32
  }
  func.func @transform_1(%arg0: i32) -> (i32, i32) {
    %c0_i32 = arith.constant 0 : i32
    %c0_i32_0 = arith.constant 0 : i32
    %c0_i32_1 = arith.constant 0 : i32
    return %c0_i32, %c0_i32_0 : i32, i32
  }
  func.func @transform_2(%arg0: i32) -> (i32, i32) {
    %c0_i32 = arith.constant 0 : i32
    %c0_i32_0 = arith.constant 0 : i32
    %c0_i32_1 = arith.constant 0 : i32
    return %c0_i32, %c0_i32_0 : i32, i32
  }
  func.func @transform_3(%arg0: i32) -> (i32, i32) {
    %c0_i32 = arith.constant 0 : i32
    %c0_i32_0 = arith.constant 0 : i32
    return %arg0, %c0_i32 : i32, i32
  }
}

module attributes {stable_mosaic.version = 11 : i64} {
  func.func @_conv_pool_mlp_kernel(%arg0: i32, %arg1: memref<128x288xbf16, #tpu.memory_space<vmem>>, %arg2: memref<288x32xbf16, #tpu.memory_space<vmem>>, %arg3: memref<1x32xf32, #tpu.memory_space<vmem>>, %arg4: memref<512x1024xbf16, #tpu.memory_space<vmem>>, %arg5: memref<1x1024xf32, #tpu.memory_space<vmem>>, %arg6: memref<1024x256xbf16, #tpu.memory_space<vmem>>, %arg7: memref<1x256xf32, #tpu.memory_space<vmem>>, %arg8: memref<256x7xbf16, #tpu.memory_space<vmem>>, %arg9: memref<1x7xf32, #tpu.memory_space<vmem>>, %arg10: memref<2x7xf32, #tpu.memory_space<vmem>>, %arg11: memref<32x32xf32, #tpu.memory_space<vmem>>) attributes {dimension_semantics = [#tpu.dimension_semantics<parallel>], iteration_bounds = array<i64: 1>, scalar_prefetch = 0 : i64, scratch_operands = 1 : i64, tpu.core_type = #tpu.core_type<tc>, window_params = [{transform_indices = @transform_0, window_bounds = array<i64: 128, 288>}, {pipeline_mode = #tpu.pipeline_mode<synchronous>, transform_indices = @transform_1, window_bounds = array<i64: 288, 32>}, {pipeline_mode = #tpu.pipeline_mode<synchronous>, transform_indices = @transform_2, window_bounds = array<i64: 1, 32>}, {pipeline_mode = #tpu.pipeline_mode<synchronous>, transform_indices = @transform_3, window_bounds = array<i64: 512, 1024>}, {pipeline_mode = #tpu.pipeline_mode<synchronous>, transform_indices = @transform_4, window_bounds = array<i64: 1, 1024>}, {pipeline_mode = #tpu.pipeline_mode<synchronous>, transform_indices = @transform_5, window_bounds = array<i64: 1024, 256>}, {pipeline_mode = #tpu.pipeline_mode<synchronous>, transform_indices = @transform_6, window_bounds = array<i64: 1, 256>}, {pipeline_mode = #tpu.pipeline_mode<synchronous>, transform_indices = @transform_7, window_bounds = array<i64: 256, 7>}, {pipeline_mode = #tpu.pipeline_mode<synchronous>, transform_indices = @transform_8, window_bounds = array<i64: 1, 7>}, {transform_indices = @transform_9, window_bounds = array<i64: 2, 7>}]} {
    %c0 = arith.constant 0 : index
    %c0_0 = arith.constant 0 : index
    %0 = vector.load %arg1[%c0, %c0_0] : memref<128x288xbf16, #tpu.memory_space<vmem>>, vector<128x288xbf16>
    %c0_1 = arith.constant 0 : index
    %c0_2 = arith.constant 0 : index
    %1 = vector.load %arg2[%c0_1, %c0_2] : memref<288x32xbf16, #tpu.memory_space<vmem>>, vector<288x32xbf16>
    %cst = arith.constant dense<0.000000e+00> : vector<128x32xf32>
    %2 = tpu.matmul %0, %1, %cst {dimension_numbers = #tpu.dot_dimension_numbers<[1], [0], [0], [1], [0, 0, 1, 1], [], []>} : vector<128x288xbf16>, vector<288x32xbf16>, vector<128x32xf32> -> vector<128x32xf32>
    %3 = vector.extract_strided_slice %2 {offsets = [0, 0], sizes = [32, 32], strides = [1, 1]} : vector<128x32xf32> to vector<32x32xf32>
    %4 = vector.extract_strided_slice %2 {offsets = [32, 0], sizes = [32, 32], strides = [1, 1]} : vector<128x32xf32> to vector<32x32xf32>
    %5 = arith.maximumf %3, %4 : vector<32x32xf32>
    %6 = vector.extract_strided_slice %2 {offsets = [64, 0], sizes = [32, 32], strides = [1, 1]} : vector<128x32xf32> to vector<32x32xf32>
    %7 = vector.extract_strided_slice %2 {offsets = [96, 0], sizes = [32, 32], strides = [1, 1]} : vector<128x32xf32> to vector<32x32xf32>
    %8 = arith.maximumf %6, %7 : vector<32x32xf32>
    %9 = arith.maximumf %5, %8 : vector<32x32xf32>
    %c0_3 = arith.constant 0 : index
    %c0_4 = arith.constant 0 : index
    %10 = vector.load %arg3[%c0_3, %c0_4] : memref<1x32xf32, #tpu.memory_space<vmem>>, vector<1x32xf32>
    %11 = vector.broadcast %10 : vector<1x32xf32> to vector<32x32xf32>
    %12 = arith.addf %9, %11 : vector<32x32xf32>
    %cst_5 = arith.constant 0.000000e+00 : f32
    %13 = vector.broadcast %cst_5 : f32 to vector<32x32xf32>
    %14 = arith.maximumf %12, %13 : vector<32x32xf32>
    %c0_6 = arith.constant 0 : index
    %c0_7 = arith.constant 0 : index
    %15 = vector.load %arg11[%c0_6, %c0_7] : memref<32x32xf32, #tpu.memory_space<vmem>>, vector<32x32xf32>
    tpu.vector_store %arg11[%c0_6, %c0_7], %14 {strides = array<i32>} : memref<32x32xf32, #tpu.memory_space<vmem>>, vector<32x32xf32>,
    %cst_8 = arith.constant 0.000000e+00 : f32
    %16 = vector.broadcast %cst_8 : f32 to vector<2x1024xf32>
    %c0_9 = arith.constant 0 : index
    %c0_10 = arith.constant 0 : index
    %17 = vector.load %arg11[%c0_9, %c0_10] : memref<32x32xf32, #tpu.memory_space<vmem>>, vector<2x32xf32>
    %18 = arith.truncf %17 : vector<2x32xf32> to vector<2x32xbf16>
    %c0_11 = arith.constant 0 : index
    %c0_12 = arith.constant 0 : index
    %19 = vector.load %arg4[%c0_11, %c0_12] : memref<512x1024xbf16, #tpu.memory_space<vmem>>, vector<32x1024xbf16>
    %cst_13 = arith.constant dense<0.000000e+00> : vector<2x1024xf32>
    %20 = tpu.matmul %18, %19, %cst_13 {dimension_numbers = #tpu.dot_dimension_numbers<[1], [0], [0], [1], [0, 0, 1, 1], [], []>} : vector<2x32xbf16>, vector<32x1024xbf16>, vector<2x1024xf32> -> vector<2x1024xf32>
    %21 = arith.addf %16, %20 : vector<2x1024xf32>
    %c2 = arith.constant 2 : index
    %c0_14 = arith.constant 0 : index
    %22 = vector.load %arg11[%c2, %c0_14] : memref<32x32xf32, #tpu.memory_space<vmem>>, vector<2x32xf32>
    %23 = arith.truncf %22 : vector<2x32xf32> to vector<2x32xbf16>
    %c32 = arith.constant 32 : index
    %c0_15 = arith.constant 0 : index
    %24 = vector.load %arg4[%c32, %c0_15] : memref<512x1024xbf16, #tpu.memory_space<vmem>>, vector<32x1024xbf16>
    %cst_16 = arith.constant dense<0.000000e+00> : vector<2x1024xf32>
    %25 = tpu.matmul %23, %24, %cst_16 {dimension_numbers = #tpu.dot_dimension_numbers<[1], [0], [0], [1], [0, 0, 1, 1], [], []>} : vector<2x32xbf16>, vector<32x1024xbf16>, vector<2x1024xf32> -> vector<2x1024xf32>
    %26 = arith.addf %21, %25 : vector<2x1024xf32>
    %c4 = arith.constant 4 : index
    %c0_17 = arith.constant 0 : index
    %27 = vector.load %arg11[%c4, %c0_17] : memref<32x32xf32, #tpu.memory_space<vmem>>, vector<2x32xf32>
    %28 = arith.truncf %27 : vector<2x32xf32> to vector<2x32xbf16>
    %c64 = arith.constant 64 : index
    %c0_18 = arith.constant 0 : index
    %29 = vector.load %arg4[%c64, %c0_18] : memref<512x1024xbf16, #tpu.memory_space<vmem>>, vector<32x1024xbf16>
    %cst_19 = arith.constant dense<0.000000e+00> : vector<2x1024xf32>
    %30 = tpu.matmul %28, %29, %cst_19 {dimension_numbers = #tpu.dot_dimension_numbers<[1], [0], [0], [1], [0, 0, 1, 1], [], []>} : vector<2x32xbf16>, vector<32x1024xbf16>, vector<2x1024xf32> -> vector<2x1024xf32>
    %31 = arith.addf %26, %30 : vector<2x1024xf32>
    %c6 = arith.constant 6 : index
    %c0_20 = arith.constant 0 : index
    %32 = vector.load %arg11[%c6, %c0_20] : memref<32x32xf32, #tpu.memory_space<vmem>>, vector<2x32xf32>
    %33 = arith.truncf %32 : vector<2x32xf32> to vector<2x32xbf16>
    %c96 = arith.constant 96 : index
    %c0_21 = arith.constant 0 : index
    %34 = vector.load %arg4[%c96, %c0_21] : memref<512x1024xbf16, #tpu.memory_space<vmem>>, vector<32x1024xbf16>
    %cst_22 = arith.constant dense<0.000000e+00> : vector<2x1024xf32>
    %35 = tpu.matmul %33, %34, %cst_22 {dimension_numbers = #tpu.dot_dimension_numbers<[1], [0], [0], [1], [0, 0, 1, 1], [], []>} : vector<2x32xbf16>, vector<32x1024xbf16>, vector<2x1024xf32> -> vector<2x1024xf32>
    %36 = arith.addf %31, %35 : vector<2x1024xf32>
    %c8 = arith.constant 8 : index
    %c0_23 = arith.constant 0 : index
    %37 = vector.load %arg11[%c8, %c0_23] : memref<32x32xf32, #tpu.memory_space<vmem>>, vector<2x32xf32>
    %38 = arith.truncf %37 : vector<2x32xf32> to vector<2x32xbf16>
    %c128 = arith.constant 128 : index
    %c0_24 = arith.constant 0 : index
    %39 = vector.load %arg4[%c128, %c0_24] : memref<512x1024xbf16, #tpu.memory_space<vmem>>, vector<32x1024xbf16>
    %cst_25 = arith.constant dense<0.000000e+00> : vector<2x1024xf32>
    %40 = tpu.matmul %38, %39, %cst_25 {dimension_numbers = #tpu.dot_dimension_numbers<[1], [0], [0], [1], [0, 0, 1, 1], [], []>} : vector<2x32xbf16>, vector<32x1024xbf16>, vector<2x1024xf32> -> vector<2x1024xf32>
    %41 = arith.addf %36, %40 : vector<2x1024xf32>
    %c10 = arith.constant 10 : index
    %c0_26 = arith.constant 0 : index
    %42 = vector.load %arg11[%c10, %c0_26] : memref<32x32xf32, #tpu.memory_space<vmem>>, vector<2x32xf32>
    %43 = arith.truncf %42 : vector<2x32xf32> to vector<2x32xbf16>
    %c160 = arith.constant 160 : index
    %c0_27 = arith.constant 0 : index
    %44 = vector.load %arg4[%c160, %c0_27] : memref<512x1024xbf16, #tpu.memory_space<vmem>>, vector<32x1024xbf16>
    %cst_28 = arith.constant dense<0.000000e+00> : vector<2x1024xf32>
    %45 = tpu.matmul %43, %44, %cst_28 {dimension_numbers = #tpu.dot_dimension_numbers<[1], [0], [0], [1], [0, 0, 1, 1], [], []>} : vector<2x32xbf16>, vector<32x1024xbf16>, vector<2x1024xf32> -> vector<2x1024xf32>
    %46 = arith.addf %41, %45 : vector<2x1024xf32>
    %c12 = arith.constant 12 : index
    %c0_29 = arith.constant 0 : index
    %47 = vector.load %arg11[%c12, %c0_29] : memref<32x32xf32, #tpu.memory_space<vmem>>, vector<2x32xf32>
    %48 = arith.truncf %47 : vector<2x32xf32> to vector<2x32xbf16>
    %c192 = arith.constant 192 : index
    %c0_30 = arith.constant 0 : index
    %49 = vector.load %arg4[%c192, %c0_30] : memref<512x1024xbf16, #tpu.memory_space<vmem>>, vector<32x1024xbf16>
    %cst_31 = arith.constant dense<0.000000e+00> : vector<2x1024xf32>
    %50 = tpu.matmul %48, %49, %cst_31 {dimension_numbers = #tpu.dot_dimension_numbers<[1], [0], [0], [1], [0, 0, 1, 1], [], []>} : vector<2x32xbf16>, vector<32x1024xbf16>, vector<2x1024xf32> -> vector<2x1024xf32>
    %51 = arith.addf %46, %50 : vector<2x1024xf32>
    %c14 = arith.constant 14 : index
    %c0_32 = arith.constant 0 : index
    %52 = vector.load %arg11[%c14, %c0_32] : memref<32x32xf32, #tpu.memory_space<vmem>>, vector<2x32xf32>
    %53 = arith.truncf %52 : vector<2x32xf32> to vector<2x32xbf16>
    %c224 = arith.constant 224 : index
    %c0_33 = arith.constant 0 : index
    %54 = vector.load %arg4[%c224, %c0_33] : memref<512x1024xbf16, #tpu.memory_space<vmem>>, vector<32x1024xbf16>
    %cst_34 = arith.constant dense<0.000000e+00> : vector<2x1024xf32>
    %55 = tpu.matmul %53, %54, %cst_34 {dimension_numbers = #tpu.dot_dimension_numbers<[1], [0], [0], [1], [0, 0, 1, 1], [], []>} : vector<2x32xbf16>, vector<32x1024xbf16>, vector<2x1024xf32> -> vector<2x1024xf32>
    %56 = arith.addf %51, %55 : vector<2x1024xf32>
    %c16 = arith.constant 16 : index
    %c0_35 = arith.constant 0 : index
    %57 = vector.load %arg11[%c16, %c0_35] : memref<32x32xf32, #tpu.memory_space<vmem>>, vector<2x32xf32>
    %58 = arith.truncf %57 : vector<2x32xf32> to vector<2x32xbf16>
    %c256 = arith.constant 256 : index
    %c0_36 = arith.constant 0 : index
    %59 = vector.load %arg4[%c256, %c0_36] : memref<512x1024xbf16, #tpu.memory_space<vmem>>, vector<32x1024xbf16>
    %cst_37 = arith.constant dense<0.000000e+00> : vector<2x1024xf32>
    %60 = tpu.matmul %58, %59, %cst_37 {dimension_numbers = #tpu.dot_dimension_numbers<[1], [0], [0], [1], [0, 0, 1, 1], [], []>} : vector<2x32xbf16>, vector<32x1024xbf16>, vector<2x1024xf32> -> vector<2x1024xf32>
    %61 = arith.addf %56, %60 : vector<2x1024xf32>
    %c18 = arith.constant 18 : index
    %c0_38 = arith.constant 0 : index
    %62 = vector.load %arg11[%c18, %c0_38] : memref<32x32xf32, #tpu.memory_space<vmem>>, vector<2x32xf32>
    %63 = arith.truncf %62 : vector<2x32xf32> to vector<2x32xbf16>
    %c288 = arith.constant 288 : index
    %c0_39 = arith.constant 0 : index
    %64 = vector.load %arg4[%c288, %c0_39] : memref<512x1024xbf16, #tpu.memory_space<vmem>>, vector<32x1024xbf16>
    %cst_40 = arith.constant dense<0.000000e+00> : vector<2x1024xf32>
    %65 = tpu.matmul %63, %64, %cst_40 {dimension_numbers = #tpu.dot_dimension_numbers<[1], [0], [0], [1], [0, 0, 1, 1], [], []>} : vector<2x32xbf16>, vector<32x1024xbf16>, vector<2x1024xf32> -> vector<2x1024xf32>
    %66 = arith.addf %61, %65 : vector<2x1024xf32>
    %c20 = arith.constant 20 : index
    %c0_41 = arith.constant 0 : index
    %67 = vector.load %arg11[%c20, %c0_41] : memref<32x32xf32, #tpu.memory_space<vmem>>, vector<2x32xf32>
    %68 = arith.truncf %67 : vector<2x32xf32> to vector<2x32xbf16>
    %c320 = arith.constant 320 : index
    %c0_42 = arith.constant 0 : index
    %69 = vector.load %arg4[%c320, %c0_42] : memref<512x1024xbf16, #tpu.memory_space<vmem>>, vector<32x1024xbf16>
    %cst_43 = arith.constant dense<0.000000e+00> : vector<2x1024xf32>
    %70 = tpu.matmul %68, %69, %cst_43 {dimension_numbers = #tpu.dot_dimension_numbers<[1], [0], [0], [1], [0, 0, 1, 1], [], []>} : vector<2x32xbf16>, vector<32x1024xbf16>, vector<2x1024xf32> -> vector<2x1024xf32>
    %71 = arith.addf %66, %70 : vector<2x1024xf32>
    %c22 = arith.constant 22 : index
    %c0_44 = arith.constant 0 : index
    %72 = vector.load %arg11[%c22, %c0_44] : memref<32x32xf32, #tpu.memory_space<vmem>>, vector<2x32xf32>
    %73 = arith.truncf %72 : vector<2x32xf32> to vector<2x32xbf16>
    %c352 = arith.constant 352 : index
    %c0_45 = arith.constant 0 : index
    %74 = vector.load %arg4[%c352, %c0_45] : memref<512x1024xbf16, #tpu.memory_space<vmem>>, vector<32x1024xbf16>
    %cst_46 = arith.constant dense<0.000000e+00> : vector<2x1024xf32>
    %75 = tpu.matmul %73, %74, %cst_46 {dimension_numbers = #tpu.dot_dimension_numbers<[1], [0], [0], [1], [0, 0, 1, 1], [], []>} : vector<2x32xbf16>, vector<32x1024xbf16>, vector<2x1024xf32> -> vector<2x1024xf32>
    %76 = arith.addf %71, %75 : vector<2x1024xf32>
    %c24 = arith.constant 24 : index
    %c0_47 = arith.constant 0 : index
    %77 = vector.load %arg11[%c24, %c0_47] : memref<32x32xf32, #tpu.memory_space<vmem>>, vector<2x32xf32>
    %78 = arith.truncf %77 : vector<2x32xf32> to vector<2x32xbf16>
    %c384 = arith.constant 384 : index
    %c0_48 = arith.constant 0 : index
    %79 = vector.load %arg4[%c384, %c0_48] : memref<512x1024xbf16, #tpu.memory_space<vmem>>, vector<32x1024xbf16>
    %cst_49 = arith.constant dense<0.000000e+00> : vector<2x1024xf32>
    %80 = tpu.matmul %78, %79, %cst_49 {dimension_numbers = #tpu.dot_dimension_numbers<[1], [0], [0], [1], [0, 0, 1, 1], [], []>} : vector<2x32xbf16>, vector<32x1024xbf16>, vector<2x1024xf32> -> vector<2x1024xf32>
    %81 = arith.addf %76, %80 : vector<2x1024xf32>
    %c26 = arith.constant 26 : index
    %c0_50 = arith.constant 0 : index
    %82 = vector.load %arg11[%c26, %c0_50] : memref<32x32xf32, #tpu.memory_space<vmem>>, vector<2x32xf32>
    %83 = arith.truncf %82 : vector<2x32xf32> to vector<2x32xbf16>
    %c416 = arith.constant 416 : index
    %c0_51 = arith.constant 0 : index
    %84 = vector.load %arg4[%c416, %c0_51] : memref<512x1024xbf16, #tpu.memory_space<vmem>>, vector<32x1024xbf16>
    %cst_52 = arith.constant dense<0.000000e+00> : vector<2x1024xf32>
    %85 = tpu.matmul %83, %84, %cst_52 {dimension_numbers = #tpu.dot_dimension_numbers<[1], [0], [0], [1], [0, 0, 1, 1], [], []>} : vector<2x32xbf16>, vector<32x1024xbf16>, vector<2x1024xf32> -> vector<2x1024xf32>
    %86 = arith.addf %81, %85 : vector<2x1024xf32>
    %c28 = arith.constant 28 : index
    %c0_53 = arith.constant 0 : index
    %87 = vector.load %arg11[%c28, %c0_53] : memref<32x32xf32, #tpu.memory_space<vmem>>, vector<2x32xf32>
    %88 = arith.truncf %87 : vector<2x32xf32> to vector<2x32xbf16>
    %c448 = arith.constant 448 : index
    %c0_54 = arith.constant 0 : index
    %89 = vector.load %arg4[%c448, %c0_54] : memref<512x1024xbf16, #tpu.memory_space<vmem>>, vector<32x1024xbf16>
    %cst_55 = arith.constant dense<0.000000e+00> : vector<2x1024xf32>
    %90 = tpu.matmul %88, %89, %cst_55 {dimension_numbers = #tpu.dot_dimension_numbers<[1], [0], [0], [1], [0, 0, 1, 1], [], []>} : vector<2x32xbf16>, vector<32x1024xbf16>, vector<2x1024xf32> -> vector<2x1024xf32>
    %91 = arith.addf %86, %90 : vector<2x1024xf32>
    %c30 = arith.constant 30 : index
    %c0_56 = arith.constant 0 : index
    %92 = vector.load %arg11[%c30, %c0_56] : memref<32x32xf32, #tpu.memory_space<vmem>>, vector<2x32xf32>
    %93 = arith.truncf %92 : vector<2x32xf32> to vector<2x32xbf16>
    %c480 = arith.constant 480 : index
    %c0_57 = arith.constant 0 : index
    %94 = vector.load %arg4[%c480, %c0_57] : memref<512x1024xbf16, #tpu.memory_space<vmem>>, vector<32x1024xbf16>
    %cst_58 = arith.constant dense<0.000000e+00> : vector<2x1024xf32>
    %95 = tpu.matmul %93, %94, %cst_58 {dimension_numbers = #tpu.dot_dimension_numbers<[1], [0], [0], [1], [0, 0, 1, 1], [], []>} : vector<2x32xbf16>, vector<32x1024xbf16>, vector<2x1024xf32> -> vector<2x1024xf32>
    %96 = arith.addf %91, %95 : vector<2x1024xf32>
    %c0_59 = arith.constant 0 : index
    %c0_60 = arith.constant 0 : index
    %97 = vector.load %arg5[%c0_59, %c0_60] : memref<1x1024xf32, #tpu.memory_space<vmem>>, vector<1x1024xf32>
    %98 = vector.broadcast %97 : vector<1x1024xf32> to vector<2x1024xf32>
    %99 = arith.addf %96, %98 : vector<2x1024xf32>
    %cst_61 = arith.constant 0.000000e+00 : f32
    %100 = vector.broadcast %cst_61 : f32 to vector<2x1024xf32>
    %101 = arith.maximumf %99, %100 : vector<2x1024xf32>
    %102 = arith.truncf %101 : vector<2x1024xf32> to vector<2x1024xbf16>
    %c0_62 = arith.constant 0 : index
    %c0_63 = arith.constant 0 : index
    %103 = vector.load %arg6[%c0_62, %c0_63] : memref<1024x256xbf16, #tpu.memory_space<vmem>>, vector<1024x256xbf16>
    %cst_64 = arith.constant dense<0.000000e+00> : vector<2x256xf32>
    %104 = tpu.matmul %102, %103, %cst_64 {dimension_numbers = #tpu.dot_dimension_numbers<[1], [0], [0], [1], [0, 0, 1, 1], [], []>} : vector<2x1024xbf16>, vector<1024x256xbf16>, vector<2x256xf32> -> vector<2x256xf32>
    %c0_65 = arith.constant 0 : index
    %c0_66 = arith.constant 0 : index
    %105 = vector.load %arg7[%c0_65, %c0_66] : memref<1x256xf32, #tpu.memory_space<vmem>>, vector<1x256xf32>
    %106 = vector.broadcast %105 : vector<1x256xf32> to vector<2x256xf32>
    %107 = arith.addf %104, %106 : vector<2x256xf32>
    %cst_67 = arith.constant 0.000000e+00 : f32
    %108 = vector.broadcast %cst_67 : f32 to vector<2x256xf32>
    %109 = arith.maximumf %107, %108 : vector<2x256xf32>
    %110 = arith.truncf %109 : vector<2x256xf32> to vector<2x256xbf16>
    %c0_68 = arith.constant 0 : index
    %c0_69 = arith.constant 0 : index
    %111 = vector.load %arg8[%c0_68, %c0_69] : memref<256x7xbf16, #tpu.memory_space<vmem>>, vector<256x7xbf16>
    %cst_70 = arith.constant dense<0.000000e+00> : vector<2x7xf32>
    %112 = tpu.matmul %110, %111, %cst_70 {dimension_numbers = #tpu.dot_dimension_numbers<[1], [0], [0], [1], [0, 0, 1, 1], [], []>} : vector<2x256xbf16>, vector<256x7xbf16>, vector<2x7xf32> -> vector<2x7xf32>
    %c0_71 = arith.constant 0 : index
    %c0_72 = arith.constant 0 : index
    %113 = vector.load %arg9[%c0_71, %c0_72] : memref<1x7xf32, #tpu.memory_space<vmem>>, vector<1x7xf32>
    %114 = vector.broadcast %113 : vector<1x7xf32> to vector<2x7xf32>
    %115 = arith.addf %112, %114 : vector<2x7xf32>
    %c0_73 = arith.constant 0 : index
    %c0_74 = arith.constant 0 : index
    %116 = vector.load %arg10[%c0_73, %c0_74] : memref<2x7xf32, #tpu.memory_space<vmem>>, vector<2x7xf32>
    tpu.vector_store %arg10[%c0_73, %c0_74], %115 {strides = array<i32>} : memref<2x7xf32, #tpu.memory_space<vmem>>, vector<2x7xf32>,
    return
  }
  func.func @transform_0(%arg0: i32) -> (i32, i32) {
    %c0_i32 = arith.constant 0 : i32
    %c0_i32_0 = arith.constant 0 : i32
    return %arg0, %c0_i32 : i32, i32
  }
  func.func @transform_1(%arg0: i32) -> (i32, i32) {
    %c0_i32 = arith.constant 0 : i32
    %c0_i32_0 = arith.constant 0 : i32
    %c0_i32_1 = arith.constant 0 : i32
    return %c0_i32, %c0_i32_0 : i32, i32
  }
  func.func @transform_2(%arg0: i32) -> (i32, i32) {
    %c0_i32 = arith.constant 0 : i32
    %c0_i32_0 = arith.constant 0 : i32
    %c0_i32_1 = arith.constant 0 : i32
    return %c0_i32, %c0_i32_0 : i32, i32
  }
  func.func @transform_3(%arg0: i32) -> (i32, i32) {
    %c0_i32 = arith.constant 0 : i32
    %c0_i32_0 = arith.constant 0 : i32
    %c0_i32_1 = arith.constant 0 : i32
    return %c0_i32, %c0_i32_0 : i32, i32
  }
  func.func @transform_4(%arg0: i32) -> (i32, i32) {
    %c0_i32 = arith.constant 0 : i32
    %c0_i32_0 = arith.constant 0 : i32
    %c0_i32_1 = arith.constant 0 : i32
    return %c0_i32, %c0_i32_0 : i32, i32
  }
  func.func @transform_5(%arg0: i32) -> (i32, i32) {
    %c0_i32 = arith.constant 0 : i32
    %c0_i32_0 = arith.constant 0 : i32
    %c0_i32_1 = arith.constant 0 : i32
    return %c0_i32, %c0_i32_0 : i32, i32
  }
  func.func @transform_6(%arg0: i32) -> (i32, i32) {
    %c0_i32 = arith.constant 0 : i32
    %c0_i32_0 = arith.constant 0 : i32
    %c0_i32_1 = arith.constant 0 : i32
    return %c0_i32, %c0_i32_0 : i32, i32
  }
  func.func @transform_7(%arg0: i32) -> (i32, i32) {
    %c0_i32 = arith.constant 0 : i32
    %c0_i32_0 = arith.constant 0 : i32
    %c0_i32_1 = arith.constant 0 : i32
    return %c0_i32, %c0_i32_0 : i32, i32
  }
  func.func @transform_8(%arg0: i32) -> (i32, i32) {
    %c0_i32 = arith.constant 0 : i32
    %c0_i32_0 = arith.constant 0 : i32
    %c0_i32_1 = arith.constant 0 : i32
    return %c0_i32, %c0_i32_0 : i32, i32
  }
  func.func @transform_9(%arg0: i32) -> (i32, i32) {
    %c0_i32 = arith.constant 0 : i32
    %c0_i32_0 = arith.constant 0 : i32
    return %arg0, %c0_i32 : i32, i32
  }
}

</mosaic_0001>

<bundles_post_ra>
// kernel: custom_model_forward.2
= control target key start
LH: loop header
LB: loop body
LE: loop exit
PB: predicated region body
PF: predicated region fallthrough
CT: control target
= control target key end

     0   :  { %v1259_v0 = vmov 0   ;;  %vm439_vm0 = vcmask 130048   ;;  %vm976_vm1 = vcmask 257024   ;;  %s1712_s1 = inlined_call_operand.vmem [shape: bf16[144,32], index: 1, kind: input, shape index: {}]   ;;  %s1713_s0 = inlined_call_operand.vmem [shape: bf16[512,144], index: 0, kind: input, shape index: {}]   ;;  %s1714_s2 = inlined_call_operand.vmem [shape: f32[1,32], index: 2, kind: input, shape index: {}]   ;;  %s1715_s3 = inlined_call_operand.vmem [shape: bf16[128,32], index: 3, kind: output, shape index: {}]  }
   0x1   :  { %536 = vmatprep.subr.bf16.mxu0 %v1259_v0  ;;  %1135 = vmatprep.subr.bf16.mxu1 %v1259_v0  ;;  %v1154_v1 = vld [vmem:[%s1712_s1 + $0x38] sm:$0xff]   ;;  %v1155_v2 = vld [vmem:[%s1712_s1 + $0x30] sm:$0xff]   ;;  %v1156_v3 = vld [vmem:[%s1712_s1 + $0x28] sm:$0xff]  }
   0x2   :  { %537 = vmatpush1.bf16.msra.mxu0 %v1154_v1  ;;  %1144 = vmatpush1.bf16.msra.mxu1 %v1154_v1  ;;  %v1157_v4 = vld [vmem:[%s1712_s1 + $0x20] sm:$0xff]   ;;  %v1158_v7 = vld [vmem:[%s1712_s1 + $0x18] sm:$0xff]   ;;  %v1159_v8 = vld [vmem:[%s1712_s1 + $0x10] sm:$0xff]  }
   0x3   :  { %538 = vmatprep.subr.bf16.mxu0 %v1259_v0  ;;  %1136 = vmatprep.subr.bf16.mxu1 %v1259_v0  ;;  %v1165_v5 = vld [vmem:[%s1713_s0 + $0x4] ss:$8 sps:$4 sm:$0xff]   ;;  %v1163_v12 = vld [vmem:[%s1713_s0] ss:$8 sps:$4 sm:$0xff]   ;;  %v1169_v14 = vld [vmem:[%s1713_s0 + $0x14] ss:$8 sps:$4 sm:$0xff]  }
   0x4   :  { %v1168_v6 = vld [vmem:[%s1713_s0 + $0x104] ss:$8 sps:$4 sm:$0xff]   ;;  %1070 = vmatprep.mubr.msk.bf16.mxu0 %vm439_vm0, %v1165_v5  ;;  %v1166_v13 = vld [vmem:[%s1713_s0 + $0x100] ss:$8 sps:$4 sm:$0xff]   ;;  %v1171_v15 = vld [vmem:[%s1713_s0 + $0x114] ss:$8 sps:$4 sm:$0xff]  }
   0x5   :  { %1086 = vmatprep.mubr.msk.bf16.mxu1 %vm439_vm0, %v1168_v6  ;;  %v1160_v9 = vld [vmem:[%s1712_s1 + $0x8] sm:$0xff]   ;;  %v1161_v10 = vld [vmem:[%s1712_s1] sm:$0xff]   ;;  %v1173_v16 = vld [vmem:[%s1713_s0 + $0x10] ss:$8 sps:$4 sm:$0xff]  }
   0x6   :  { %539 = vmatpush1.bf16.msra.mxu0 %v1155_v2  ;;  %1145 = vmatpush1.bf16.msra.mxu1 %v1155_v2  ;;  %v1162_v11 = vld [vmem:[%s1712_s1 + $0x40] sm:$0xff]   ;;  %v1174_v17 = vld [vmem:[%s1713_s0 + $0x110] ss:$8 sps:$4 sm:$0xff]   ;;  %v1181_v22 = vld [vmem:[%s1713_s0 + $0x34] ss:$8 sps:$4 sm:$0xff]  }
   0x7   :  { %540 = vmatprep.subr.bf16.mxu0 %v1259_v0  ;;  %1137 = vmatprep.subr.bf16.mxu1 %v1259_v0  ;;  %v1175_v18 = vld [vmem:[%s1713_s0 + $0x24] ss:$8 sps:$4 sm:$0xff]   ;;  %v1179_v20 = vld [vmem:[%s1713_s0 + $0x20] ss:$8 sps:$4 sm:$0xff]   ;;  %v1183_v23 = vld [vmem:[%s1713_s0 + $0x134] ss:$8 sps:$4 sm:$0xff]  }
   0x8   :  { %v1177_v19 = vld [vmem:[%s1713_s0 + $0x124] ss:$8 sps:$4 sm:$0xff]   ;;  %v1180_v21 = vld [vmem:[%s1713_s0 + $0x120] ss:$8 sps:$4 sm:$0xff]   ;;  %v1185_v24 = vld [vmem:[%s1713_s0 + $0x30] ss:$8 sps:$4 sm:$0xff]  }
   0x9   :  { %v1186_v25 = vld [vmem:[%s1713_s0 + $0x130] ss:$8 sps:$4 sm:$0xff]   ;;  %v1187_v26 = vld [vmem:[%s1713_s0 + $0x44] ss:$8 sps:$4 sm:$0xff]   ;;  %v1191_v28 = vld [vmem:[%s1713_s0 + $0x40] ss:$8 sps:$4 sm:$0xff]  }
   0xa   :  { %541 = vmatpush1.bf16.msra.mxu0 %v1156_v3  ;;  %1146 = vmatpush1.bf16.msra.mxu1 %v1156_v3  ;;  %v1189_v27 = vld [vmem:[%s1713_s0 + $0x144] ss:$8 sps:$4 sm:$0xff]   ;;  %v1192_v29 = vld [vmem:[%s1713_s0 + $0x140] ss:$8 sps:$4 sm:$0xff]   ;;  %v1193_v30 = vld [vmem:[%s1713_s0 + $0x54] ss:$8 sps:$4 sm:$0xff]  }
   0xb   :  { %542 = vmatprep.subr.bf16.mxu0 %v1259_v0  ;;  %1138 = vmatprep.subr.bf16.mxu1 %v1259_v0  ;;  %v1195_v31 = vld [vmem:[%s1713_s0 + $0x154] ss:$8 sps:$4 sm:$0xff]   ;;  %v1197_v32 = vld [vmem:[%s1713_s0 + $0x50] ss:$8 sps:$4 sm:$0xff]   ;;  %v1199_v34 = vld [vmem:[%s1713_s0 + $0x64] ss:$8 sps:$4 sm:$0xff]  }
   0xc   :  { %v1198_v33 = vld [vmem:[%s1713_s0 + $0x150] ss:$8 sps:$4 sm:$0xff]   ;;  %v1201_v35 = vld [vmem:[%s1713_s0 + $0x164] ss:$8 sps:$4 sm:$0xff]   ;;  %v1203_v36 = vld [vmem:[%s1713_s0 + $0x60] ss:$8 sps:$4 sm:$0xff]  }
   0xd   :  { %v1204_v37 = vld [vmem:[%s1713_s0 + $0x160] ss:$8 sps:$4 sm:$0xff]   ;;  %v1205_v38 = vld [vmem:[%s1713_s0 + $0x74] ss:$8 sps:$4 sm:$0xff]   ;;  %v1209_v40 = vld [vmem:[%s1713_s0 + $0x70] ss:$8 sps:$4 sm:$0xff]  }
   0xe   :  { %543 = vmatpush1.bf16.msra.mxu0 %v1157_v4  ;;  %1147 = vmatpush1.bf16.msra.mxu1 %v1157_v4  ;;  %v1207_v39 = vld [vmem:[%s1713_s0 + $0x174] ss:$8 sps:$4 sm:$0xff]   ;;  %v1210_v41 = vld [vmem:[%s1713_s0 + $0x170] ss:$8 sps:$4 sm:$0xff]   ;;  %v1211_v42 = vld [vmem:[%s1713_s0 + $0x84] ss:$8 sps:$4 sm:$0xff]  }
   0xf   :  { %544 = vmatprep.subr.bf16.mxu0 %v1259_v0  ;;  %1139 = vmatprep.subr.bf16.mxu1 %v1259_v0  ;;  %v1213_v43 = vld [vmem:[%s1713_s0 + $0x184] ss:$8 sps:$4 sm:$0xff]   ;;  %v1215_v44 = vld [vmem:[%s1713_s0 + $0x80] ss:$8 sps:$4 sm:$0xff]   ;;  %v1217_v46 = vld [vmem:[%s1713_s0 + $0x94] ss:$8 sps:$4 sm:$0xff]  }
  0x10   :  { %v1216_v45 = vld [vmem:[%s1713_s0 + $0x180] ss:$8 sps:$4 sm:$0xff]   ;;  %v1219_v47 = vld [vmem:[%s1713_s0 + $0x194] ss:$8 sps:$4 sm:$0xff]   ;;  %v1221_v48 = vld [vmem:[%s1713_s0 + $0x90] ss:$8 sps:$4 sm:$0xff]  }
  0x11   :  { %v1222_v49 = vld [vmem:[%s1713_s0 + $0x190] ss:$8 sps:$4 sm:$0xff]   ;;  %v1223_v50 = vld [vmem:[%s1713_s0 + $0xa4] ss:$8 sps:$4 sm:$0xff]   ;;  %v1227_v52 = vld [vmem:[%s1713_s0 + $0xa0] ss:$8 sps:$4 sm:$0xff]  }
  0x12   :  { %545 = vmatpush1.bf16.msra.mxu0 %v1158_v7  ;;  %1148 = vmatpush1.bf16.msra.mxu1 %v1158_v7  ;;  %v1225_v51 = vld [vmem:[%s1713_s0 + $0x1a4] ss:$8 sps:$4 sm:$0xff]   ;;  %v1228_v53 = vld [vmem:[%s1713_s0 + $0x1a0] ss:$8 sps:$4 sm:$0xff]   ;;  %v1229_v54 = vld [vmem:[%s1713_s0 + $0xb4] ss:$8 sps:$4 sm:$0xff]  }
  0x13   :  { %546 = vmatprep.subr.bf16.mxu0 %v1259_v0  ;;  %1140 = vmatprep.subr.bf16.mxu1 %v1259_v0  ;;  %v1231_v55 = vld [vmem:[%s1713_s0 + $0x1b4] ss:$8 sps:$4 sm:$0xff]   ;;  %v1233_v56 = vld [vmem:[%s1713_s0 + $0xb0] ss:$8 sps:$4 sm:$0xff]   ;;  %v1235_v58 = vld [vmem:[%s1713_s0 + $0xc4] ss:$8 sps:$4 sm:$0xff]  }
  0x14   :  { %v1234_v57 = vld [vmem:[%s1713_s0 + $0x1b0] ss:$8 sps:$4 sm:$0xff]   ;;  %v1237_v59 = vld [vmem:[%s1713_s0 + $0x1c4] ss:$8 sps:$4 sm:$0xff]   ;;  %v1239_v60 = vld [vmem:[%s1713_s0 + $0xc0] ss:$8 sps:$4 sm:$0xff]  }
  0x15   :  { %v1240_v61 = vld [vmem:[%s1713_s0 + $0x1c0] ss:$8 sps:$4 sm:$0xff]   ;;  %v1241_v62 = vld [vmem:[%s1713_s0 + $0xd4] ss:$8 sps:$4 sm:$0xff]   ;;  %v1246_v1 = vld [vmem:[%s1713_s0 + $0x1d0] ss:$8 sps:$4 sm:$0xff]  }
  0x16   :  { %547 = vmatpush1.bf16.msra.mxu0 %v1159_v8  ;;  %1149 = vmatpush1.bf16.msra.mxu1 %v1159_v8  ;;  %v1243_v63 = vld [vmem:[%s1713_s0 + $0x1d4] ss:$8 sps:$4 sm:$0xff]   ;;  %v1247_v2 = vld [vmem:[%s1713_s0 + $0xe4] ss:$8 sps:$4 sm:$0xff]   ;;  %v1251_v4 = vld [vmem:[%s1713_s0 + $0xe0] ss:$8 sps:$4 sm:$0xff]  }
  0x17   :  { %548 = vmatprep.subr.bf16.mxu0 %v1259_v0  ;;  %1141 = vmatprep.subr.bf16.mxu1 %v1259_v0  ;;  %v1249_v3 = vld [vmem:[%s1713_s0 + $0x1e4] ss:$8 sps:$4 sm:$0xff]   ;;  %v1252_v5 = vld [vmem:[%s1713_s0 + $0x1e0] ss:$8 sps:$4 sm:$0xff]   ;;  %v1253_v6 = vld [vmem:[%s1713_s0 + $0xf4] ss:$8 sps:$4 sm:$0xff]  }
  0x18   :  { %v1255_v7 = vld [vmem:[%s1713_s0 + $0x1f4] ss:$8 sps:$4 sm:$0xff]   ;;  %v1257_v8 = vld [vmem:[%s1713_s0 + $0xf0] ss:$8 sps:$4 sm:$0xff]  }
  0x1a   :  { %549 = vmatpush1.bf16.msra.mxu0 %v1160_v9  ;;  %1150 = vmatpush1.bf16.msra.mxu1 %v1160_v9  ;;  %v1258_v9 = vld [vmem:[%s1713_s0 + $0x1f0] ss:$8 sps:$4 sm:$0xff]  }
  0x1b   :  { %550 = vmatprep.subr.bf16.mxu0 %v1259_v0  ;;  %1142 = vmatprep.subr.bf16.mxu1 %v1259_v0 }
  0x1e   :  { %551 = vmatpush1.bf16.msra.mxu0 %v1161_v10  ;;  %1151 = vmatpush1.bf16.msra.mxu1 %v1161_v10 }
  0x1f   :  { %566 = vmatprep.subr.bf16.mxu0 %v1259_v0  ;;  %1143 = vmatprep.subr.bf16.mxu1 %v1259_v0  ;;  %v1245_v0 = vld [vmem:[%s1713_s0 + $0xd0] ss:$8 sps:$4 sm:$0xff]  }
  0x22   :  { %567 = vmatpush2.bf16.msra.mxu0 %v1162_v11  ;;  %1152 = vmatpush2.bf16.msra.mxu1 %v1162_v11 }
  0x25   :  { %569 = vmatmul.mubr.bf16.vlgmr.msra.gmra.mxu0 %v1163_v12  ;;  %697 = vmatmul.mubr.bf16.vlgmr.msra.gmra.mxu1 %v1166_v13 }
  0x26   :  { %1071 = vmatprep.mubr.msk.bf16.mxu0 %vm439_vm0, %v1169_v14  ;;  %1087 = vmatprep.mubr.msk.bf16.mxu1 %vm439_vm0, %v1171_v15 }
  0x2d   :  { %577 = vmatmul.mubr.bf16.gmra.mxu0 %v1173_v16  ;;  %705 = vmatmul.mubr.bf16.gmra.mxu1 %v1174_v17 }
  0x2e   :  { %1072 = vmatprep.mubr.msk.bf16.mxu0 %vm439_vm0, %v1175_v18  ;;  %1088 = vmatprep.mubr.msk.bf16.mxu1 %vm439_vm0, %v1177_v19 }
  0x35   :  { %585 = vmatmul.mubr.bf16.gmra.mxu0 %v1179_v20  ;;  %713 = vmatmul.mubr.bf16.gmra.mxu1 %v1180_v21 }
  0x36   :  { %1073 = vmatprep.mubr.msk.bf16.mxu0 %vm439_vm0, %v1181_v22  ;;  %1089 = vmatprep.mubr.msk.bf16.mxu1 %vm439_vm0, %v1183_v23 }
  0x3d   :  { %593 = vmatmul.mubr.bf16.gmra.mxu0 %v1185_v24  ;;  %721 = vmatmul.mubr.bf16.gmra.mxu1 %v1186_v25 }
  0x3e   :  { %1074 = vmatprep.mubr.msk.bf16.mxu0 %vm439_vm0, %v1187_v26  ;;  %1090 = vmatprep.mubr.msk.bf16.mxu1 %vm439_vm0, %v1189_v27 }
  0x45   :  { %601 = vmatmul.mubr.bf16.gmra.mxu0 %v1191_v28  ;;  %729 = vmatmul.mubr.bf16.gmra.mxu1 %v1192_v29 }
  0x46   :  { %1075 = vmatprep.mubr.msk.bf16.mxu0 %vm439_vm0, %v1193_v30  ;;  %1091 = vmatprep.mubr.msk.bf16.mxu1 %vm439_vm0, %v1195_v31 }
  0x4d   :  { %609 = vmatmul.mubr.bf16.gmra.mxu0 %v1197_v32  ;;  %737 = vmatmul.mubr.bf16.gmra.mxu1 %v1198_v33 }
  0x4e   :  { %1076 = vmatprep.mubr.msk.bf16.mxu0 %vm439_vm0, %v1199_v34  ;;  %1092 = vmatprep.mubr.msk.bf16.mxu1 %vm439_vm0, %v1201_v35 }
  0x55   :  { %617 = vmatmul.mubr.bf16.gmra.mxu0 %v1203_v36  ;;  %745 = vmatmul.mubr.bf16.gmra.mxu1 %v1204_v37 }
  0x56   :  { %1077 = vmatprep.mubr.msk.bf16.mxu0 %vm439_vm0, %v1205_v38  ;;  %1093 = vmatprep.mubr.msk.bf16.mxu1 %vm439_vm0, %v1207_v39 }
  0x5d   :  { %625 = vmatmul.mubr.bf16.gmra.mxu0 %v1209_v40  ;;  %753 = vmatmul.mubr.bf16.gmra.mxu1 %v1210_v41 }
  0x5e   :  { %1078 = vmatprep.mubr.msk.bf16.mxu0 %vm439_vm0, %v1211_v42  ;;  %1094 = vmatprep.mubr.msk.bf16.mxu1 %vm439_vm0, %v1213_v43 }
  0x65   :  { %633 = vmatmul.mubr.bf16.gmra.mxu0 %v1215_v44  ;;  %761 = vmatmul.mubr.bf16.gmra.mxu1 %v1216_v45 }
  0x66   :  { %1079 = vmatprep.mubr.msk.bf16.mxu0 %vm439_vm0, %v1217_v46  ;;  %1095 = vmatprep.mubr.msk.bf16.mxu1 %vm439_vm0, %v1219_v47 }
  0x6d   :  { %641 = vmatmul.mubr.bf16.gmra.mxu0 %v1221_v48  ;;  %769 = vmatmul.mubr.bf16.gmra.mxu1 %v1222_v49 }
  0x6e   :  { %1080 = vmatprep.mubr.msk.bf16.mxu0 %vm439_vm0, %v1223_v50  ;;  %1096 = vmatprep.mubr.msk.bf16.mxu1 %vm439_vm0, %v1225_v51 }
  0x75   :  { %649 = vmatmul.mubr.bf16.gmra.mxu0 %v1227_v52  ;;  %777 = vmatmul.mubr.bf16.gmra.mxu1 %v1228_v53 }
  0x76   :  { %1081 = vmatprep.mubr.msk.bf16.mxu0 %vm439_vm0, %v1229_v54  ;;  %1097 = vmatprep.mubr.msk.bf16.mxu1 %vm439_vm0, %v1231_v55 }
  0x7d   :  { %657 = vmatmul.mubr.bf16.gmra.mxu0 %v1233_v56  ;;  %785 = vmatmul.mubr.bf16.gmra.mxu1 %v1234_v57 }
  0x7e   :  { %1082 = vmatprep.mubr.msk.bf16.mxu0 %vm439_vm0, %v1235_v58  ;;  %1098 = vmatprep.mubr.msk.bf16.mxu1 %vm439_vm0, %v1237_v59 }
  0x85   :  { %665 = vmatmul.mubr.bf16.gmra.mxu0 %v1239_v60  ;;  %793 = vmatmul.mubr.bf16.gmra.mxu1 %v1240_v61 }
  0x86   :  { %1083 = vmatprep.mubr.msk.bf16.mxu0 %vm439_vm0, %v1241_v62  ;;  %1099 = vmatprep.mubr.msk.bf16.mxu1 %vm439_vm0, %v1243_v63 }
  0x8d   :  { %673 = vmatmul.mubr.bf16.gmra.mxu0 %v1245_v0  ;;  %801 = vmatmul.mubr.bf16.gmra.mxu1 %v1246_v1 }
  0x8e   :  { %1084 = vmatprep.mubr.msk.bf16.mxu0 %vm439_vm0, %v1247_v2  ;;  %1100 = vmatprep.mubr.msk.bf16.mxu1 %vm439_vm0, %v1249_v3 }
  0x95   :  { %681 = vmatmul.mubr.bf16.gmra.mxu0 %v1251_v4  ;;  %809 = vmatmul.mubr.bf16.gmra.mxu1 %v1252_v5 }
  0x96   :  { %1085 = vmatprep.mubr.msk.bf16.mxu0 %vm439_vm0, %v1253_v6  ;;  %1101 = vmatprep.mubr.msk.bf16.mxu1 %vm439_vm0, %v1255_v7 }
  0x9d   :  { %689 = vmatmul.mubr.bf16.gmra.mxu0 %v1257_v8  ;;  %817 = vmatmul.mubr.bf16.gmra.mxu1 %v1258_v9 }
  0xe5   :  { %v1531_v10 = vpop.f32.mrf.mxu0  ;;  %v1533_v11 = vpop.f32.mrf.mxu1 }
  0xe7   :  { %v572_v12 = vpop.f32.mrf.mxu0  ;;  %v700_v13 = vpop.f32.mrf.mxu1 }
  0xe9   :  { %v1535_v14 = vpop.f32.mrf.mxu0  ;;  %v1537_v15 = vpop.f32.mrf.mxu1 }
  0xeb   :  { %v575_v16 = vpop.f32.mrf.mxu0  ;;  %v703_v17 = vpop.f32.mrf.mxu1 }
  0xed   :  { %v1539_v18 = vpop.f32.mrf.mxu0  ;;  %v1541_v19 = vpop.f32.mrf.mxu1 }
  0xef   :  { %v580_v20 = vpop.f32.mrf.mxu0  ;;  %v708_v21 = vpop.f32.mrf.mxu1 }
  0xf0   :  { %v1600_v20 = vld [vmem:[%s1714_s2] ss:$0 sm:$0xff] }
  0xf1   :  { %v1543_v22 = vpop.f32.mrf.mxu0  ;;  %v1545_v23 = vpop.f32.mrf.mxu1 }
  0xf3   :  { %v583_v24 = vpop.f32.mrf.mxu0  ;;  %v711_v25 = vpop.f32.mrf.mxu1 }
  0xf5   :  { %v1547_v26 = vpop.f32.mrf.mxu0  ;;  %v1549_v27 = vpop.f32.mrf.mxu1 }
  0xf7   :  { %v588_v28 = vpop.f32.mrf.mxu0  ;;  %v716_v29 = vpop.f32.mrf.mxu1 }
  0xf9   :  { %v1551_v30 = vpop.f32.mrf.mxu0  ;;  %v1553_v31 = vpop.f32.mrf.mxu1 }
  0xfb   :  { %v591_v32 = vpop.f32.mrf.mxu0  ;;  %v719_v33 = vpop.f32.mrf.mxu1 }
  0xfd   :  { %v1555_v34 = vpop.f32.mrf.mxu0  ;;  %v1557_v35 = vpop.f32.mrf.mxu1 }
  0xff   :  { %v596_v36 = vpop.f32.mrf.mxu0  ;;  %v724_v37 = vpop.f32.mrf.mxu1 }
 0x101   :  { %v1559_v38 = vpop.f32.mrf.mxu0  ;;  %v1561_v39 = vpop.f32.mrf.mxu1 }
 0x103   :  { %v599_v40 = vpop.f32.mrf.mxu0  ;;  %v727_v41 = vpop.f32.mrf.mxu1 }
 0x105   :  { %v1563_v42 = vpop.f32.mrf.mxu0  ;;  %v1565_v43 = vpop.f32.mrf.mxu1 }
 0x107   :  { %v604_v44 = vpop.f32.mrf.mxu0  ;;  %v732_v45 = vpop.f32.mrf.mxu1 }
 0x109   :  { %v1567_v46 = vpop.f32.mrf.mxu0  ;;  %v1569_v47 = vpop.f32.mrf.mxu1 }
 0x10b   :  { %v607_v48 = vpop.f32.mrf.mxu0  ;;  %v735_v49 = vpop.f32.mrf.mxu1 }
 0x10d   :  { %v1571_v50 = vpop.f32.mrf.mxu0  ;;  %v1573_v51 = vpop.f32.mrf.mxu1 }
 0x10f   :  { %v612_v52 = vpop.f32.mrf.mxu0  ;;  %v740_v53 = vpop.f32.mrf.mxu1 }
 0x111   :  { %v1575_v54 = vpop.f32.mrf.mxu0  ;;  %v1577_v55 = vpop.f32.mrf.mxu1 }
 0x113   :  { %v615_v56 = vpop.f32.mrf.mxu0  ;;  %v743_v57 = vpop.f32.mrf.mxu1 }
 0x115   :  { %v1579_v58 = vpop.f32.mrf.mxu0  ;;  %v1581_v59 = vpop.f32.mrf.mxu1 }
 0x117   :  { %v620_v60 = vpop.f32.mrf.mxu0  ;;  %v748_v61 = vpop.f32.mrf.mxu1 }
 0x119   :  { %v1583_v62 = vpop.f32.mrf.mxu0  ;;  %v1585_v63 = vpop.f32.mrf.mxu1 }
 0x11b   :  { %v623_v0 = vpop.f32.mrf.mxu0  ;;  %v751_v1 = vpop.f32.mrf.mxu1 }
 0x11d   :  { %v1587_v2 = vpop.f32.mrf.mxu0  ;;  %v1589_v3 = vpop.f32.mrf.mxu1 }
 0x11f   :  { %v628_v4 = vpop.f32.mrf.mxu0  ;;  %v756_v5 = vpop.f32.mrf.mxu1 }
 0x121   :  { %v1591_v6 = vpop.f32.mrf.mxu0  ;;  %v1593_v7 = vpop.f32.mrf.mxu1 }
 0x123   :  { %v631_v8 = vpop.f32.mrf.mxu0  ;;  %v759_v9 = vpop.f32.mrf.mxu1 }
 0x125   :  { %v634_v12 = vpop.f32.mrf.mxu0  ;;  %v762_v13 = vpop.f32.mrf.mxu1 }
 0x126   :  { %v825_v16 = vmax.f32 %v1531_v10, %v634_v12  ;;  %v841_v17 = vmax.f32 %v1533_v11, %v762_v13 }
 0x127   :  { %v636_v21 = vpop.f32.mrf.mxu0  ;;  %v764_v24 = vpop.f32.mrf.mxu1 }
 0x128   :  { %v857_v25 = vmax.f32 %v825_v16, %v841_v17 }
 0x129   :  { %v637_v28 = vpop.f32.mrf.mxu0  ;;  %v765_v29 = vpop.f32.mrf.mxu1 }
 0x12a   :  { %v880_v32 = vadd.f32 %v1600_v20, %v857_v25  ;;  %v826_v33 = vmax.f32 %v1535_v14, %v637_v28  ;;  %v842_v36 = vmax.f32 %v1537_v15, %v765_v29 }
 0x12b   :  { %v639_v37 = vpop.f32.mrf.mxu0  ;;  %v767_v10 = vpop.f32.mrf.mxu1 }
 0x12c   :  { %v896_v40 = vmax.f32 %v880_v32, 0.0  ;;  %v858_v11 = vmax.f32 %v826_v33, %v842_v36 }
 0x12d   :  { %v642_v41 = vpop.f32.mrf.mxu0  ;;  %v770_v44 = vpop.f32.mrf.mxu1 }
 0x12e   :  { %v1119_v45 = vpack.c.bf16 %v896_v40, %v896_v40  ;;  %v881_v48 = vadd.f32 %v1600_v20, %v858_v11  ;;  %v827_v49 = vmax.f32 %v1539_v18, %v642_v41  ;;  %v843_v52 = vmax.f32 %v1541_v19, %v770_v44 }
 0x12f   :  { %v644_v53 = vpop.f32.mrf.mxu0  ;;  %v772_v56 = vpop.f32.mrf.mxu1 }
 0x130   :  { %977 = vst.msk [vmem:[%s1715_s3] sm:$0xf] %vm976_vm1, %v1119_v45  ;;  %v897_v14 = vmax.f32 %v881_v48, 0.0  ;;  %v859_v15 = vmax.f32 %v827_v49, %v843_v52 }
 0x131   :  { %v645_v57 = vpop.f32.mrf.mxu0  ;;  %v773_v60 = vpop.f32.mrf.mxu1 }
 0x132   :  { %v1120_v61 = vpack.c.bf16 %v897_v14, %v897_v14  ;;  %v882_v0 = vadd.f32 %v1600_v20, %v859_v15  ;;  %v828_v1 = vmax.f32 %v1543_v22, %v645_v57  ;;  %v844_v18 = vmax.f32 %v1545_v23, %v773_v60 }
 0x133   :  { %v647_v4 = vpop.f32.mrf.mxu0  ;;  %v775_v19 = vpop.f32.mrf.mxu1 }
 0x134   :  { %978 = vst.msk [vmem:[%s1715_s3 + $0x4] sm:$0xf] %vm976_vm1, %v1120_v61  ;;  %v898_v5 = vmax.f32 %v882_v0, 0.0  ;;  %v860_v8 = vmax.f32 %v828_v1, %v844_v18 }
 0x135   :  { %v650_v9 = vpop.f32.mrf.mxu0  ;;  %v778_v12 = vpop.f32.mrf.mxu1 }
 0x136   :  { %v1121_v13 = vpack.c.bf16 %v898_v5, %v898_v5  ;;  %v883_v16 = vadd.f32 %v1600_v20, %v860_v8  ;;  %v829_v17 = vmax.f32 %v1547_v26, %v650_v9  ;;  %v845_v22 = vmax.f32 %v1549_v27, %v778_v12 }
 0x137   :  { %v652_v21 = vpop.f32.mrf.mxu0  ;;  %v780_v23 = vpop.f32.mrf.mxu1 }
 0x138   :  { %979 = vst.msk [vmem:[%s1715_s3 + $0x8] sm:$0xf] %vm976_vm1, %v1121_v13  ;;  %v899_v24 = vmax.f32 %v883_v16, 0.0  ;;  %v861_v25 = vmax.f32 %v829_v17, %v845_v22 }
 0x139   :  { %v653_v28 = vpop.f32.mrf.mxu0  ;;  %v781_v29 = vpop.f32.mrf.mxu1 }
 0x13a   :  { %v1122_v32 = vpack.c.bf16 %v899_v24, %v899_v24  ;;  %v884_v33 = vadd.f32 %v1600_v20, %v861_v25  ;;  %v830_v36 = vmax.f32 %v1551_v30, %v653_v28  ;;  %v846_v26 = vmax.f32 %v1553_v31, %v781_v29 }
 0x13b   :  { %v655_v37 = vpop.f32.mrf.mxu0  ;;  %v783_v27 = vpop.f32.mrf.mxu1 }
 0x13c   :  { %980 = vst.msk [vmem:[%s1715_s3 + $0xc] sm:$0xf] %vm976_vm1, %v1122_v32  ;;  %v900_v10 = vmax.f32 %v884_v33, 0.0  ;;  %v862_v40 = vmax.f32 %v830_v36, %v846_v26 }
 0x13d   :  { %v658_v11 = vpop.f32.mrf.mxu0  ;;  %v786_v41 = vpop.f32.mrf.mxu1 }
 0x13e   :  { %v1123_v44 = vpack.c.bf16 %v900_v10, %v900_v10  ;;  %v885_v45 = vadd.f32 %v1600_v20, %v862_v40  ;;  %v831_v48 = vmax.f32 %v1555_v34, %v658_v11  ;;  %v847_v30 = vmax.f32 %v1557_v35, %v786_v41 }
 0x13f   :  { %v660_v49 = vpop.f32.mrf.mxu0  ;;  %v788_v31 = vpop.f32.mrf.mxu1 }
 0x140   :  { %981 = vst.msk [vmem:[%s1715_s3 + $0x10] sm:$0xf] %vm976_vm1, %v1123_v44  ;;  %v901_v52 = vmax.f32 %v885_v45, 0.0  ;;  %v863_v53 = vmax.f32 %v831_v48, %v847_v30 }
 0x141   :  { %v661_v56 = vpop.f32.mrf.mxu0  ;;  %v789_v14 = vpop.f32.mrf.mxu1 }
 0x142   :  { %v1124_v15 = vpack.c.bf16 %v901_v52, %v901_v52  ;;  %v886_v57 = vadd.f32 %v1600_v20, %v863_v53  ;;  %v832_v60 = vmax.f32 %v1559_v38, %v661_v56  ;;  %v848_v34 = vmax.f32 %v1561_v39, %v789_v14 }
 0x143   :  { %v663_v61 = vpop.f32.mrf.mxu0  ;;  %v791_v35 = vpop.f32.mrf.mxu1 }
 0x144   :  { %982 = vst.msk [vmem:[%s1715_s3 + $0x14] sm:$0xf] %vm976_vm1, %v1124_v15  ;;  %v902_v0 = vmax.f32 %v886_v57, 0.0  ;;  %v864_v1 = vmax.f32 %v832_v60, %v848_v34 }
 0x145   :  { %v666_v18 = vpop.f32.mrf.mxu0  ;;  %v794_v4 = vpop.f32.mrf.mxu1 }
 0x146   :  { %v1125_v19 = vpack.c.bf16 %v902_v0, %v902_v0  ;;  %v887_v5 = vadd.f32 %v1600_v20, %v864_v1  ;;  %v833_v8 = vmax.f32 %v1563_v42, %v666_v18  ;;  %v849_v38 = vmax.f32 %v1565_v43, %v794_v4 }
 0x147   :  { %v668_v9 = vpop.f32.mrf.mxu0  ;;  %v796_v39 = vpop.f32.mrf.mxu1 }
 0x148   :  { %983 = vst.msk [vmem:[%s1715_s3 + $0x18] sm:$0xf] %vm976_vm1, %v1125_v19  ;;  %v903_v12 = vmax.f32 %v887_v5, 0.0  ;;  %v865_v13 = vmax.f32 %v833_v8, %v849_v38 }
 0x149   :  { %v669_v16 = vpop.f32.mrf.mxu0  ;;  %v797_v17 = vpop.f32.mrf.mxu1 }
 0x14a   :  { %v1126_v22 = vpack.c.bf16 %v903_v12, %v903_v12  ;;  %v888_v21 = vadd.f32 %v1600_v20, %v865_v13  ;;  %v834_v23 = vmax.f32 %v1567_v46, %v669_v16  ;;  %v850_v42 = vmax.f32 %v1569_v47, %v797_v17 }
 0x14b   :  { %v671_v24 = vpop.f32.mrf.mxu0  ;;  %v799_v43 = vpop.f32.mrf.mxu1 }
 0x14c   :  { %984 = vst.msk [vmem:[%s1715_s3 + $0x1c] sm:$0xf] %vm976_vm1, %v1126_v22  ;;  %v904_v25 = vmax.f32 %v888_v21, 0.0  ;;  %v866_v28 = vmax.f32 %v834_v23, %v850_v42 }
 0x14d   :  { %v674_v29 = vpop.f32.mrf.mxu0  ;;  %v802_v32 = vpop.f32.mrf.mxu1 }
 0x14e   :  { %v1127_v33 = vpack.c.bf16 %v904_v25, %v904_v25  ;;  %v889_v36 = vadd.f32 %v1600_v20, %v866_v28  ;;  %v835_v26 = vmax.f32 %v1571_v50, %v674_v29  ;;  %v851_v46 = vmax.f32 %v1573_v51, %v802_v32 }
 0x14f   :  { %v676_v37 = vpop.f32.mrf.mxu0  ;;  %v804_v47 = vpop.f32.mrf.mxu1 }
 0x150   :  { %985 = vst.msk [vmem:[%s1715_s3 + $0x20] sm:$0xf] %vm976_vm1, %v1127_v33  ;;  %v905_v27 = vmax.f32 %v889_v36, 0.0  ;;  %v867_v10 = vmax.f32 %v835_v26, %v851_v46 }
 0x151   :  { %v677_v40 = vpop.f32.mrf.mxu0  ;;  %v805_v11 = vpop.f32.mrf.mxu1 }
 0x152   :  { %v1128_v41 = vpack.c.bf16 %v905_v27, %v905_v27  ;;  %v890_v44 = vadd.f32 %v1600_v20, %v867_v10  ;;  %v836_v45 = vmax.f32 %v1575_v54, %v677_v40  ;;  %v852_v50 = vmax.f32 %v1577_v55, %v805_v11 }
 0x153   :  { %v679_v48 = vpop.f32.mrf.mxu0  ;;  %v807_v51 = vpop.f32.mrf.mxu1 }
 0x154   :  { %986 = vst.msk [vmem:[%s1715_s3 + $0x24] sm:$0xf] %vm976_vm1, %v1128_v41  ;;  %v906_v30 = vmax.f32 %v890_v44, 0.0  ;;  %v868_v49 = vmax.f32 %v836_v45, %v852_v50 }
 0x155   :  { %v682_v31 = vpop.f32.mrf.mxu0  ;;  %v810_v52 = vpop.f32.mrf.mxu1 }
 0x156   :  { %v1129_v53 = vpack.c.bf16 %v906_v30, %v906_v30  ;;  %v891_v56 = vadd.f32 %v1600_v20, %v868_v49  ;;  %v837_v14 = vmax.f32 %v1579_v58, %v682_v31  ;;  %v853_v54 = vmax.f32 %v1581_v59, %v810_v52 }
 0x157   :  { %v684_v15 = vpop.f32.mrf.mxu0  ;;  %v812_v55 = vpop.f32.mrf.mxu1 }
 0x158   :  { %987 = vst.msk [vmem:[%s1715_s3 + $0x28] sm:$0xf] %vm976_vm1, %v1129_v53  ;;  %v907_v57 = vmax.f32 %v891_v56, 0.0  ;;  %v869_v60 = vmax.f32 %v837_v14, %v853_v54 }
 0x159   :  { %v685_v34 = vpop.f32.mrf.mxu0  ;;  %v813_v61 = vpop.f32.mrf.mxu1 }
 0x15a   :  { %v1130_v35 = vpack.c.bf16 %v907_v57, %v907_v57  ;;  %v892_v0 = vadd.f32 %v1600_v20, %v869_v60  ;;  %v838_v1 = vmax.f32 %v1583_v62, %v685_v34  ;;  %v854_v58 = vmax.f32 %v1585_v63, %v813_v61 }
 0x15b   :  { %v687_v18 = vpop.f32.mrf.mxu0  ;;  %v815_v59 = vpop.f32.mrf.mxu1 }
 0x15c   :  { %988 = vst.msk [vmem:[%s1715_s3 + $0x2c] sm:$0xf] %vm976_vm1, %v1130_v35  ;;  %v908_v4 = vmax.f32 %v892_v0, 0.0  ;;  %v870_v19 = vmax.f32 %v838_v1, %v854_v58 }
 0x15d   :  { %v690_v5 = vpop.f32.mrf.mxu0  ;;  %v818_v8 = vpop.f32.mrf.mxu1 }
 0x15e   :  { %v1131_v38 = vpack.c.bf16 %v908_v4, %v908_v4  ;;  %v893_v9 = vadd.f32 %v1600_v20, %v870_v19  ;;  %v839_v39 = vmax.f32 %v1587_v2, %v690_v5  ;;  %v855_v62 = vmax.f32 %v1589_v3, %v818_v8 }
 0x15f   :  { %v692_v12 = vpop.f32.mrf.mxu0  ;;  %v820_v63 = vpop.f32.mrf.mxu1 }
 0x160   :  { %989 = vst.msk [vmem:[%s1715_s3 + $0x30] sm:$0xf] %vm976_vm1, %v1131_v38  ;;  %v909_v13 = vmax.f32 %v893_v9, 0.0  ;;  %v871_v16 = vmax.f32 %v839_v39, %v855_v62 }
 0x161   :  { %v693_v17 = vpop.f32.mrf.mxu0  ;;  %v821_v22 = vpop.f32.mrf.mxu1 }
 0x162   :  { %v1132_v21 = vpack.c.bf16 %v909_v13, %v909_v13  ;;  %v894_v23 = vadd.f32 %v1600_v20, %v871_v16  ;;  %v840_v42 = vmax.f32 %v1591_v6, %v693_v17  ;;  %v856_v2 = vmax.f32 %v1593_v7, %v821_v22 }
 0x163   :  { %v695_v24 = vpop.f32.mrf.mxu0  ;;  %v823_v3 = vpop.f32.mrf.mxu1 }
 0x164   :  { %990 = vst.msk [vmem:[%s1715_s3 + $0x34] sm:$0xf] %vm976_vm1, %v1132_v21  ;;  %v910_v43 = vmax.f32 %v894_v23, 0.0  ;;  %v872_v25 = vmax.f32 %v840_v42, %v856_v2 }
 0x166   :  { %v1133_v28 = vpack.c.bf16 %v910_v43, %v910_v43  ;;  %v895_v29 = vadd.f32 %v1600_v20, %v872_v25 }
 0x168   :  { %991 = vst.msk [vmem:[%s1715_s3 + $0x38] sm:$0xf] %vm976_vm1, %v1133_v28  ;;  %v911_v6 = vmax.f32 %v895_v29, 0.0 }
 0x16a   :  { %v1134_v32 = vpack.c.bf16 %v911_v6, %v911_v6 }
 0x16c   :  { %992 = vst.msk [vmem:[%s1715_s3 + $0x3c] sm:$0xf] %vm976_vm1, %v1134_v32 }

// kernel: custom_model_forward.3
= control target key start
LH: loop header
LB: loop body
LE: loop exit
PB: predicated region body
PF: predicated region fallthrough
CT: control target
= control target key end

     0   :  { %vm329_vm0 = vcmask 261120   ;;  %v8850_v58 = vmov 0   ;;  %vm6120_vm1 = vcmask 50176   ;;  %s8840_s1 = inlined_call_operand.vmem [shape: bf16[288,32], index: 1, kind: input, shape index: {}]   ;;  %s8841_s0 = inlined_call_operand.vmem [shape: bf16[128,288], index: 0, kind: input, shape index: {}]   ;;  %s8842_s3 = inlined_call_operand.vmem [shape: bf16[512,1024], index: 3, kind: input, shape index: {}]   ;;  %s8843_s2 = inlined_call_operand.vmem [shape: f32[1,32], index: 2, kind: input, shape index: {}]   ;;  %s8844_s5 = inlined_call_operand.vmem [shape: bf16[1024,256], index: 5, kind: input, shape index: {}]   ;;  %s8845_s4 = inlined_call_operand.vmem [shape: f32[1,1024], index: 4, kind: input, shape index: {}]   ;;  %s8846_s7 = inlined_call_operand.vmem [shape: bf16[256,7], index: 7, kind: input, shape index: {}]   ;;  %s8847_s6 = inlined_call_operand.vmem [shape: f32[1,256], index: 6, kind: input, shape index: {}]   ;;  %s8848_s8 = inlined_call_operand.vmem [shape: f32[1,7], index: 8, kind: input, shape index: {}]   ;;  %s8849_s9 = inlined_call_operand.vmem [shape: f32[2,7], index: 9, kind: output, shape index: {}]  }
   0x1   :  { %v6763_v0 = vld [vmem:[%s8840_s1 + $0x78] sm:$0xff]   ;;  %v6765_v2 = vld [vmem:[%s8840_s1 + $0x70] sm:$0xff]   ;;  %v6767_v4 = vld [vmem:[%s8840_s1 + $0x68] sm:$0xff]  }
   0x2   :  { %v6764_v1 = vld [vmem:[%s8840_s1 + $0x38] sm:$0xff]   ;;  %6642 = vmatprep.subr.bf16.mxu0 %v6763_v0  ;;  %v6766_v3 = vld [vmem:[%s8840_s1 + $0x30] sm:$0xff]   ;;  %v6768_v5 = vld [vmem:[%s8840_s1 + $0x28] sm:$0xff]  }
   0x3   :  { %6643 = vmatpush3.bf16.msra.mxu0 %v6764_v1  ;;  %v6769_v6 = vld [vmem:[%s8840_s1 + $0x60] sm:$0xff]   ;;  %v6771_v8 = vld [vmem:[%s8840_s1 + $0x58] sm:$0xff]   ;;  %v6773_v10 = vld [vmem:[%s8840_s1 + $0x50] sm:$0xff]  }
   0x4   :  { %6644 = vmatprep.subr.bf16.mxu0 %v6765_v2  ;;  %v6770_v7 = vld [vmem:[%s8840_s1 + $0x20] sm:$0xff]   ;;  %v6772_v9 = vld [vmem:[%s8840_s1 + $0x18] sm:$0xff]   ;;  %v6782_v12 = vld [vmem:[%s8840_s1 + $0x88] sm:$0xff]  }
   0x5   :  { %v6781_v11 = vld [vmem:[%s8841_s0 + $0x4] ss:$12 sps:$4 sm:$0xff]   ;;  %v6775_v14 = vld [vmem:[%s8840_s1 + $0x48] sm:$0xff]   ;;  %6758 = vmatprep.subr.bf16.mxu1 %v6782_v12  ;;  %v6787_v27 = vld [vmem:[%s8841_s0 + $0x34] ss:$12 sps:$4 sm:$0xff]  }
   0x6   :  { %v6774_v13 = vld [vmem:[%s8840_s1 + $0x10] sm:$0xff]   ;;  %386 = vmatprep.mubr.bf16.mxu0 %v6781_v11  ;;  %v6786_v15 = vld [vmem:[%s8840_s1 + $0x80] sm:$0xff]   ;;  %v6776_v16 = vld [vmem:[%s8840_s1 + $0x8] sm:$0xff]   ;;  %6760 = vmatpush3.bf16.msra.mxu1 %v6782_v12 }
   0x7   :  { %6645 = vmatpush3.bf16.msra.mxu0 %v6766_v3  ;;  %6759 = vmatprep.subr.bf16.mxu1 %v6786_v15  ;;  %v6790_v17 = vld [vmem:[%s8841_s0 + $0x38] ss:$12 sps:$4 sm:$0xff]   ;;  %v6791_v19 = vld [vmem:[%s8841_s0 + $0x50] ss:$12 sps:$4 sm:$0xff]   ;;  %v6798_v21 = vld [vmem:[%s8841_s0 + $0x68] ss:$12 sps:$4 sm:$0xff]  }
   0x8   :  { %6646 = vmatprep.subr.bf16.mxu0 %v6767_v4  ;;  %v6777_v18 = vld [vmem:[%s8840_s1 + $0x40] sm:$0xff]   ;;  %6746 = vmatprep.mubr.msk.bf16.mxu1 %vm329_vm0, %v6790_v17  ;;  %v6783_v23 = vld [vmem:[%s8841_s0 + $0x1c] ss:$12 sps:$4 sm:$0xff]   ;;  %v6792_v30 = vld [vmem:[%s8841_s0 + $0x4c] ss:$12 sps:$4 sm:$0xff]  }
   0x9   :  { %v6778_v20 = vld [vmem:[%s8840_s1] sm:$0xff]   ;;  %v6807_v28 = vld [vmem:[%s8841_s0 + $0xb0] ss:$12 sps:$4 sm:$0xff]   ;;  %v6794_v31 = vld [vmem:[%s8841_s0 + $0x48] ss:$12 sps:$4 sm:$0xff]  }
   0xa   :  { %6761 = vmatpush3.bf16.msra.mxu1 %v6786_v15  ;;  %v6779_v22 = vld [vmem:[%s8841_s0] ss:$12 sps:$4 sm:$0xff]   ;;  %v6806_v25 = vld [vmem:[%s8841_s0 + $0x98] ss:$12 sps:$4 sm:$0xff]   ;;  %v6789_v29 = vld [vmem:[%s8841_s0 + $0x30] ss:$12 sps:$4 sm:$0xff]  }
   0xb   :  { %6647 = vmatpush3.bf16.msra.mxu0 %v6768_v5  ;;  %v6799_v24 = vld [vmem:[%s8841_s0 + $0x80] ss:$12 sps:$4 sm:$0xff]   ;;  %v6785_v26 = vld [vmem:[%s8841_s0 + $0x18] ss:$12 sps:$4 sm:$0xff]   ;;  %v6800_v34 = vld [vmem:[%s8841_s0 + $0x7c] ss:$12 sps:$4 sm:$0xff]  }
   0xc   :  { %6648 = vmatprep.subr.bf16.mxu0 %v6769_v6  ;;  %v6795_v32 = vld [vmem:[%s8841_s0 + $0x64] ss:$12 sps:$4 sm:$0xff]   ;;  %v6797_v33 = vld [vmem:[%s8841_s0 + $0x60] ss:$12 sps:$4 sm:$0xff]   ;;  %v6810_v39 = vld [vmem:[%s8841_s0 + $0xa8] ss:$12 sps:$4 sm:$0xff]  }
   0xd   :  { %6747 = vmatmul.mubr.msk.bf16.vlgmr.msra.gmra.mxu1 %vm329_vm0, %v6791_v19  ;;  %v6802_v35 = vld [vmem:[%s8841_s0 + $0x78] ss:$12 sps:$4 sm:$0xff]   ;;  %v6803_v36 = vld [vmem:[%s8841_s0 + $0x94] ss:$12 sps:$4 sm:$0xff]   ;;  %v6805_v37 = vld [vmem:[%s8841_s0 + $0x90] ss:$12 sps:$4 sm:$0xff]  }
   0xe   :  { %6750 = vmatprep.mubr.msk.bf16.mxu1 %vm329_vm0, %v6798_v21  ;;  %v6808_v38 = vld [vmem:[%s8841_s0 + $0xac] ss:$12 sps:$4 sm:$0xff]   ;;  %v6811_v40 = vld [vmem:[%s8841_s0 + $0x8] ss:$12 sps:$4 sm:$0xff]   ;;  %v607_v42 = vld [vmem:[%s8842_s3 + $0xc0] sm:$0xff] }
   0xf   :  { %6649 = vmatpush3.bf16.msra.mxu0 %v6770_v7  ;;  %v6812_v41 = vld [vmem:[%s8841_s0 + $0x20] ss:$12 sps:$4 sm:$0xff]   ;;  %v592_v46 = vld [vmem:[%s8842_s3 + $0x58] sm:$0xff] }
  0x10   :  { %6650 = vmatprep.subr.bf16.mxu0 %v6771_v8  ;;  %v611_v43 = vld [vmem:[%s8842_s3 + $0xe0] sm:$0xff]  ;;  %v596_v47 = vld [vmem:[%s8842_s3 + $0x78] sm:$0xff]  ;;  %v7235_v59 = vld [vmem:[%s8842_s3 + $0xc8] sm:$0xff] }
  0x11   :  { %v6185_v44 = vcombine.low %v607_v42, %v611_v43  ;;  %v6186_v45 = vcombine.high %v607_v42, %v611_v43  ;;  %v6212_v48 = vcombine.high %v592_v46, %v596_v47  ;;  %v6211_v49 = vcombine.low %v592_v46, %v596_v47  ;;  %v599_v50 = vld [vmem:[%s8842_s3 + $0x80] sm:$0xff]  ;;  %v584_v52 = vld [vmem:[%s8842_s3 + $0x18] sm:$0xff]  ;;  %v7240_v60 = vld [vmem:[%s8842_s3 + $0xe8] sm:$0xff] }
  0x12   :  { %v603_v51 = vld [vmem:[%s8842_s3 + $0xa0] sm:$0xff]  ;;  %v588_v55 = vld [vmem:[%s8842_s3 + $0x38] sm:$0xff]  ;;  %v7245_v61 = vld [vmem:[%s8842_s3 + $0x148] sm:$0xff]  ;;  %v6188_v62 = vcombine.high %v7235_v59, %v7240_v60 }
  0x13   :  { %6651 = vmatpush3.bf16.msra.mxu0 %v6772_v9  ;;  %710 = vmatprep.subr.bf16.mxu1 %v6186_v45  ;;  %v6177_v53 = vcombine.low %v599_v50, %v603_v51  ;;  %v6178_v54 = vcombine.high %v599_v50, %v603_v51  ;;  %v6203_v56 = vcombine.low %v584_v52, %v588_v55  ;;  %v7252_v63 = vld [vmem:[%s8842_s3 + $0x168] sm:$0xff] }
  0x14   :  { %6652 = vmatprep.subr.bf16.mxu0 %v6773_v10  ;;  %711 = vmatpush1.bf16.msra.mxu1 %v6185_v44  ;;  %v6204_v57 = vcombine.high %v584_v52, %v588_v55  ;;  %v6228_v2 = vcombine.high %v7245_v61, %v7252_v63 }
  0x15   :  { %6751 = vmatmul.mubr.msk.bf16.gmra.mxu1 %vm329_vm0, %v6799_v24  ;;  %712 = vmatprep.subr.bf16.mxu1 %v6178_v54 }
  0x16   :  { %6754 = vmatprep.mubr.msk.bf16.mxu1 %vm329_vm0, %v6806_v25 }
  0x17   :  { %6653 = vmatpush3.bf16.msra.mxu0 %v6774_v13 }
  0x18   :  { %6654 = vmatprep.subr.bf16.mxu0 %v6775_v14  ;;  %713 = vmatpush1.bf16.msra.mxu1 %v6177_v53 }
  0x19   :  { %751 = vmatprep.subr.bf16.mxu1 %v6188_v62 }
  0x1b   :  { %6655 = vmatpush3.bf16.msra.mxu0 %v6776_v16 }
  0x1c   :  { %6656 = vmatprep.subr.bf16.mxu0 %v6777_v18 }
  0x1d   :  { %6755 = vmatmul.mubr.msk.bf16.gmra.mxu1 %vm329_vm0, %v6807_v28 }
  0x1e   :  { %730 = vmatprep.mubr.bf16.mxu1 %v8850_v58 }
  0x1f   :  { %6657 = vmatpush3.bf16.msra.mxu0 %v6778_v20 }
  0x20   :  { %6738 = vmatprep.subr.bf16.mxu0 %v6782_v12 }
  0x22   :  { %387 = vmatmul.mubr.bf16.vlgmr.msra.gmra.mxu0 %v6779_v22 }
  0x23   :  { %6739 = vmatpush3.bf16.msra.mxu0 %v6782_v12  ;;  %394 = vmatprep.mubr.bf16.mxu0 %v6783_v23 }
  0x24   :  { %6740 = vmatprep.subr.bf16.mxu0 %v6786_v15 }
  0x27   :  { %6741 = vmatpush3.bf16.msra.mxu0 %v6786_v15 }
  0x28   :  { %1080 = vmatprep.subr.bf16.mxu0 %v6212_v48 }
  0x2a   :  { %395 = vmatmul.mubr.bf16.gmra.mxu0 %v6785_v26 }
  0x2b   :  { %402 = vmatprep.mubr.bf16.mxu0 %v6787_v27 }
  0x32   :  { %403 = vmatmul.mubr.bf16.gmra.mxu0 %v6789_v29 }
  0x33   :  { %410 = vmatprep.mubr.bf16.mxu0 %v6792_v30 }
  0x3a   :  { %411 = vmatmul.mubr.bf16.gmra.mxu0 %v6794_v31 }
  0x3b   :  { %418 = vmatprep.mubr.bf16.mxu0 %v6795_v32 }
  0x42   :  { %419 = vmatmul.mubr.bf16.gmra.mxu0 %v6797_v33 }
  0x43   :  { %426 = vmatprep.mubr.bf16.mxu0 %v6800_v34 }
  0x4a   :  { %427 = vmatmul.mubr.bf16.gmra.mxu0 %v6802_v35 }
  0x4b   :  { %434 = vmatprep.mubr.bf16.mxu0 %v6803_v36 }
  0x52   :  { %435 = vmatmul.mubr.bf16.gmra.mxu0 %v6805_v37 }
  0x53   :  { %442 = vmatprep.mubr.bf16.mxu0 %v6808_v38 }
  0x5a   :  { %443 = vmatmul.mubr.bf16.gmra.mxu0 %v6810_v39 }
  0x5b   :  { %6742 = vmatprep.mubr.msk.bf16.mxu0 %vm329_vm0, %v6811_v40 }
  0x62   :  { %6743 = vmatmul.mubr.msk.bf16.vlgmr.msra.gmra.mxu0 %vm329_vm0, %v6812_v41 }
  0x63   :  { %1081 = vmatpush1.bf16.msra.mxu0 %v6211_v49  ;;  %1100 = vmatprep.mubr.bf16.mxu0 %v8850_v58 }
  0x64   :  { %1082 = vmatprep.subr.bf16.mxu0 %v6204_v57 }
  0x67   :  { %1083 = vmatpush1.bf16.msra.mxu0 %v6203_v56 }
  0x68   :  { %1263 = vmatprep.subr.bf16.mxu0 %v6228_v2 }
  0xcd   :  { %v6748_v16 = vpop.f32.mrf.mxu1 }
  0xcf   :  { %v501_v19 = vpop.f32.mrf.mxu1 }
  0xd1   :  { %v6749_v22 = vpop.f32.mrf.mxu1 }
  0xd3   :  { %v504_v25 = vpop.f32.mrf.mxu1 }
  0xd5   :  { %v6752_v27 = vpop.f32.mrf.mxu1 }
  0xd7   :  { %v517_v30 = vpop.f32.mrf.mxu1 }
  0xd9   :  { %v6753_v33 = vpop.f32.mrf.mxu1 }
  0xdb   :  { %v520_v36 = vpop.f32.mrf.mxu1 }
  0xdd   :  { %v6756_v38 = vpop.f32.mrf.mxu1 }
  0xdf   :  { %v533_v41 = vpop.f32.mrf.mxu1 }
  0xe1   :  { %v6757_v48 = vpop.f32.mrf.mxu1 }
  0xe2   :  { %v6658_v3 = vpop.f32.mrf.mxu0 }
  0xe4   :  { %v6659_v4 = vpop.f32.mrf.mxu0 }
  0xe5   :  { %v6660_v49 = vadd.f32 %v6659_v4, %v6658_v3 }
  0xe6   :  { %v7260_v5 = vpop.f32.mrf.mxu0 }
  0xe8   :  { %v7262_v6 = vpop.f32.mrf.mxu0 }
  0xea   :  { %v6664_v7 = vpop.f32.mrf.mxu0 }
  0xec   :  { %v6665_v8 = vpop.f32.mrf.mxu0 }
  0xed   :  { %v6666_v52 = vadd.f32 %v6665_v8, %v6664_v7 }
  0xee   :  { %v6667_v9 = vpop.f32.mrf.mxu0 }
  0xf0   :  { %v6668_v10 = vpop.f32.mrf.mxu0 }
  0xf1   :  { %v6669_v56 = vadd.f32 %v6668_v10, %v6667_v9  ;;  %v6663_v9 = vadd.f32 %v7262_v6, %v7260_v5 }
  0xf2   :  { %v6670_v11 = vpop.f32.mrf.mxu0 }
  0xf4   :  { %v6671_v12 = vpop.f32.mrf.mxu0 }
  0xf5   :  { %v6672_v50 = vadd.f32 %v6671_v12, %v6670_v11 }
  0xf6   :  { %v6673_v13 = vpop.f32.mrf.mxu0 }
  0xf8   :  { %v6674_v14 = vpop.f32.mrf.mxu0 }
  0xfa   :  { %v6676_v15 = vpop.f32.mrf.mxu0 }
  0xfc   :  { %v6677_v17 = vpop.f32.mrf.mxu0 }
  0xfd   :  { %v6678_v45 = vadd.f32 %v6677_v17, %v6676_v15  ;;  %v502_v17 = vadd.f32 %v6672_v50, %v501_v19 }
  0xfe   :  { %v6679_v18 = vpop.f32.mrf.mxu0 }
  0xff   :  { %v510_v1 = vadd.f32 %v6748_v16, %v6678_v45  ;;  %v6176_v16 = vld [vmem:[%s8843_s2] ss:$0 sm:$0xff] }
 0x100   :  { %v6680_v20 = vpop.f32.mrf.mxu0 }
 0x101   :  { %v6681_v57 = vadd.f32 %v6680_v20, %v6679_v18 }
 0x102   :  { %v6682_v21 = vpop.f32.mrf.mxu0 }
 0x103   :  { %v513_v10 = vadd.f32 %v6749_v22, %v6681_v57 }
 0x104   :  { %v6683_v23 = vpop.f32.mrf.mxu0 }
 0x105   :  { %v6684_v53 = vadd.f32 %v6683_v23, %v6682_v21 }
 0x106   :  { %v6685_v24 = vpop.f32.mrf.mxu0 }
 0x107   :  { %v518_v11 = vadd.f32 %v6684_v53, %v517_v30  ;;  %v1122_v53 = vld [vmem:[%s8842_s3 + $0x158] sm:$0xff] }
 0x108   :  { %v6686_v26 = vpop.f32.mrf.mxu0 }
 0x10a   :  { %v6688_v28 = vpop.f32.mrf.mxu0 }
 0x10c   :  { %v6689_v29 = vpop.f32.mrf.mxu0 }
 0x10d   :  { %v6690_v46 = vadd.f32 %v6689_v29, %v6688_v28  ;;  %v6675_v28 = vadd.f32 %v6674_v14, %v6673_v13  ;;  %v6687_v29 = vadd.f32 %v6686_v26, %v6685_v24 }
 0x10e   :  { %v6691_v31 = vpop.f32.mrf.mxu0 }
 0x10f   :  { %v526_v0 = vadd.f32 %v6752_v27, %v6690_v46  ;;  %v505_v23 = vadd.f32 %v6675_v28, %v504_v25  ;;  %v521_v24 = vadd.f32 %v6687_v29, %v520_v36 }
 0x110   :  { %v6692_v32 = vpop.f32.mrf.mxu0 }
 0x111   :  { %v6693_v62 = vadd.f32 %v6692_v32, %v6691_v31 }
 0x112   :  { %v6694_v34 = vpop.f32.mrf.mxu0 }
 0x113   :  { %v529_v18 = vadd.f32 %v6753_v33, %v6693_v62 }
 0x114   :  { %v6695_v35 = vpop.f32.mrf.mxu0 }
 0x115   :  { %v6696_v47 = vadd.f32 %v6695_v35, %v6694_v34 }
 0x116   :  { %v6697_v37 = vpop.f32.mrf.mxu0 }
 0x118   :  { %v6698_v39 = vpop.f32.mrf.mxu0 }
 0x119   :  { %v6699_v2 = vadd.f32 %v6698_v39, %v6697_v37  ;;  %v600_v39 = vld [vmem:[%s8842_s3 + $0x88] sm:$0xff] }
 0x11a   :  { %v6700_v40 = vpop.f32.mrf.mxu0 }
 0x11c   :  { %v6701_v42 = vpop.f32.mrf.mxu0 }
 0x11d   :  { %v6702_v43 = vadd.f32 %v6701_v42, %v6700_v40  ;;  %v534_v40 = vadd.f32 %v6696_v47, %v533_v41  ;;  %v536_v42 = vpop.f32.mrf.mxu1  ;;  %v604_v41 = vld [vmem:[%s8842_s3 + $0xa8] sm:$0xff] }
 0x11e   :  { %v6703_v44 = vpop.f32.mrf.mxu0  ;;  %v537_v20 = vadd.f32 %v6699_v2, %v536_v42  ;;  %v6179_v57 = vcombine.low %v600_v39, %v604_v41  ;;  %v601_v42 = vld [vmem:[%s8842_s3 + $0x90] sm:$0xff] }
 0x11f   :  { %v542_v54 = vadd.f32 %v6756_v38, %v6702_v43  ;;  %v552_v19 = vmax.f32 %v518_v11, %v534_v40  ;;  %v1112_v43 = vld [vmem:[%s8842_s3 + $0x108] sm:$0xff]  ;;  %v610_v11 = vld [vmem:[%s8842_s3 + $0xd8] sm:$0xff] }
 0x120   :  { %v6704_v51 = vpop.f32.mrf.mxu0  ;;  %v553_v6 = vmax.f32 %v521_v24, %v537_v20 }
 0x121   :  { %v6705_v55 = vadd.f32 %v6704_v51, %v6703_v44  ;;  %v554_v7 = vmax.f32 %v526_v0, %v542_v54  ;;  %v1116_v44 = vld [vmem:[%s8842_s3 + $0x128] sm:$0xff]  ;;  %v609_v51 = vld [vmem:[%s8842_s3 + $0xd0] sm:$0xff]  ;;  %v1126_v54 = vld [vmem:[%s8842_s3 + $0x178] sm:$0xff] }
 0x122   :  { %v6744_v58 = vpop.f32.mrf.mxu0  ;;  %v6220_v50 = vcombine.high %v1112_v43, %v1116_v44  ;;  %v6219_v62 = vcombine.low %v1112_v43, %v1116_v44  ;;  %v6232_v40 = vcombine.high %v1122_v53, %v1126_v54  ;;  %v6231_v28 = vcombine.low %v1122_v53, %v1126_v54  ;;  %v594_v43 = vld [vmem:[%s8842_s3 + $0x68] sm:$0xff] }
 0x123   :  { %v494_v15 = vadd.f32 %v6744_v58, %v6666_v52  ;;  %v545_v3 = vadd.f32 %v6757_v48, %v6705_v55  ;;  %v613_v52 = vld [vmem:[%s8842_s3 + $0xf0] sm:$0xff]  ;;  %v8852_v55 = vcombine.low %v7235_v59, %v7240_v60  ;;  %v8854_v59 = vmov 0   ;;  %v1666_v44 = vld [vmem:[%s8842_s3 + $0x248] sm:$0xff] }
 0x124   :  { %v485_v4 = vpop.f32.mrf.mxu0  ;;  %v6190_v2 = vcombine.high %v609_v51, %v613_v52  ;;  %v1658_v53 = vld [vmem:[%s8842_s3 + $0x208] sm:$0xff] }
 0x125   :  { %v550_v8 = vmax.f32 %v494_v15, %v510_v1  ;;  %v486_v12 = vadd.f32 %v6660_v49, %v485_v4  ;;  %v555_v0 = vmax.f32 %v529_v18, %v545_v3  ;;  %v6180_v49 = vcombine.high %v600_v39, %v604_v41  ;;  %v605_v15 = vld [vmem:[%s8842_s3 + $0xb0] sm:$0xff]  ;;  %v590_v41 = vld [vmem:[%s8842_s3 + $0x48] sm:$0xff] }
 0x126   :  { %v6745_v58 = vpop.f32.mrf.mxu0  ;;  %v6182_v3 = vcombine.high %v601_v42, %v605_v15  ;;  %v1662_v54 = vld [vmem:[%s8842_s3 + $0x228] sm:$0xff] }
 0x127   :  { %v558_v13 = vmax.f32 %v550_v8, %v554_v7  ;;  %v548_v14 = vmax.f32 %v486_v12, %v502_v17  ;;  %v497_v21 = vadd.f32 %v6745_v58, %v6669_v56  ;;  %v8853_v56 = vcombine.low %v7245_v61, %v7252_v63  ;;  %v1114_v61 = vld [vmem:[%s8842_s3 + $0x118] sm:$0xff]  ;;  %v1393_v8 = vld [vmem:[%s8842_s3 + $0x1c8] sm:$0xff] }
 0x128   :  { %v488_v1 = vpop.f32.mrf.mxu0  ;;  %v1118_v63 = vld [vmem:[%s8842_s3 + $0x138] sm:$0xff]  ;;  %v6189_v17 = vcombine.low %v609_v51, %v613_v52  ;;  %v1397_v12 = vld [vmem:[%s8842_s3 + $0x1e8] sm:$0xff] }
 0x129   :  { %v569_v26 = vadd.f32 %v6176_v16, %v558_v13  ;;  %v556_v27 = vmax.f32 %v548_v14, %v552_v19  ;;  %v551_v30 = vmax.f32 %v497_v21, %v513_v10  ;;  %v489_v5 = vadd.f32 %v6663_v9, %v488_v1  ;;  %v614_v7 = vld [vmem:[%s8842_s3 + $0xf8] sm:$0xff]  ;;  %v1385_v19 = vld [vmem:[%s8842_s3 + $0x188] sm:$0xff]  ;;  %v593_v1 = vld [vmem:[%s8842_s3 + $0x60] sm:$0xff] }
 0x12a   :  { %v6224_v4 = vcombine.high %v1114_v61, %v1118_v63  ;;  %v6181_v9 = vcombine.low %v601_v42, %v605_v15  ;;  %v6223_v10 = vcombine.low %v1114_v61, %v1118_v63  ;;  %v6192_v18 = vcombine.high %v610_v11, %v614_v7  ;;  %v606_v58 = vld [vmem:[%s8842_s3 + $0xb8] sm:$0xff]  ;;  %v1389_v13 = vld [vmem:[%s8842_s3 + $0x1a8] sm:$0xff] }
 0x12b   :  { %v573_v22 = vmax.f32 %v569_v26, 0.0  ;;  %v567_v31 = vadd.f32 %v6176_v16, %v556_v27  ;;  %v559_v32 = vmax.f32 %v551_v30, %v555_v0  ;;  %v549_v33 = vmax.f32 %v489_v5, %v505_v23  ;;  %v589_v0 = vld [vmem:[%s8842_s3 + $0x40] sm:$0xff]  ;;  %v1395_v26 = vld [vmem:[%s8842_s3 + $0x1d8] sm:$0xff]  ;;  %v582_v52 = vld [vmem:[%s8842_s3 + $0x8] sm:$0xff] }
 0x12c   :  { %v6248_v20 = vcombine.high %v1393_v8, %v1397_v12  ;;  %v6191_v14 = vcombine.low %v610_v11, %v614_v7  ;;  %v6247_v21 = vcombine.low %v1393_v8, %v1397_v12  ;;  %v6240_v24 = vcombine.high %v1385_v19, %v1389_v13  ;;  %v1399_v27 = vld [vmem:[%s8842_s3 + $0x1f8] sm:$0xff] }
 0x12d   :  { %577 = vst.msk [vmem:[#allocation2 + $0x10] sm:$0xff] %vm329_vm0, %v573_v22  ;;  %v571_v34 = vmax.f32 %v567_v31, 0.0  ;;  %v570_v35 = vadd.f32 %v6176_v16, %v559_v32  ;;  %v557_v37 = vmax.f32 %v549_v33, %v553_v6  ;;  %v6239_v5 = vcombine.low %v1385_v19, %v1389_v13  ;;  %v581_v31 = vld [vmem:[%s8842_s3] sm:$0xff]  ;;  %v1668_v42 = vld [vmem:[%s8842_s3 + $0x258] sm:$0xff]  ;;  %v1943_v19 = vld [vmem:[%s8842_s3 + $0x2e8] sm:$0xff] }
 0x12e   :  { %v6206_v6 = vcombine.high %v589_v0, %v593_v1  ;;  %v6252_v22 = vcombine.high %v1395_v26, %v1399_v27  ;;  %v585_v32 = vld [vmem:[%s8842_s3 + $0x20] sm:$0xff]  ;;  %v1672_v15 = vld [vmem:[%s8842_s3 + $0x278] sm:$0xff]  ;;  %v6259_v61 = vcombine.low %v1658_v53, %v1662_v54 }
 0x12f   :  { %575 = vst.msk [vmem:[#allocation2] sm:$0xff] %vm329_vm0, %v571_v34  ;;  %v574_v25 = vmax.f32 %v570_v35, 0.0  ;;  %v568_v36 = vadd.f32 %v6176_v16, %v557_v37  ;;  %v602_v16 = vld [vmem:[%s8842_s3 + $0x98] sm:$0xff]  ;;  %v6205_v37 = vcombine.low %v589_v0, %v593_v1  ;;  %v6271_v12 = vcombine.low %v1668_v42, %v1672_v15  ;;  %v1115_v0 = vld [vmem:[%s8842_s3 + $0x120] sm:$0xff]  ;;  %v1931_v1 = vld [vmem:[%s8842_s3 + $0x288] sm:$0xff] }
 0x130   :  { %v6184_v23 = vcombine.high %v602_v16, %v606_v58  ;;  %v6183_v30 = vcombine.low %v602_v16, %v606_v58  ;;  %v1387_v34 = vld [vmem:[%s8842_s3 + $0x198] sm:$0xff]  ;;  %v1123_v16 = vld [vmem:[%s8842_s3 + $0x160] sm:$0xff]  ;;  %v1939_v58 = vld [vmem:[%s8842_s3 + $0x2c8] sm:$0xff] }
 0x131   :  { %578 = vst.msk [vmem:[#allocation2 + $0x18] sm:$0xff] %vm329_vm0, %v574_v25  ;;  %v572_v38 = vmax.f32 %v568_v36, 0.0  ;;  %v1391_v35 = vld [vmem:[%s8842_s3 + $0x1b8] sm:$0xff]  ;;  %v6251_v25 = vcombine.low %v1395_v26, %v1399_v27  ;;  %v1935_v26 = vld [vmem:[%s8842_s3 + $0x2a8] sm:$0xff] }
 0x132   :  { %v6244_v39 = vcombine.high %v1387_v34, %v1391_v35  ;;  %v1660_v11 = vld [vmem:[%s8842_s3 + $0x218] sm:$0xff] }
 0x133   :  { %576 = vst.msk [vmem:[#allocation2 + $0x8] sm:$0xff] %vm329_vm0, %v572_v38  ;;  %v6198_v38 = vcombine.high %v581_v31, %v585_v32  ;;  %v1664_v7 = vld [vmem:[%s8842_s3 + $0x238] sm:$0xff] }
 0x136   :  { %v597_v45 = vld [vmem:[#allocation2 + $0x2] sm:$0x3]  ;;  %v579_v46 = vld [vmem:[#allocation2] sm:$0x3]  ;;  %v1109_v60 = vld [vmem:[#allocation2 + $0x4] sm:$0x3] }
 0x137   :  { %v7285_v47 = vpack.c.bf16 %v597_v45, %v597_v45  ;;  %v7287_v48 = vpack.c.bf16 %v579_v46, %v579_v46  ;;  %v7325_v29 = vpack.c.bf16 %v1109_v60, %v1109_v60  ;;  %v1382_v33 = vld [vmem:[#allocation2 + $0x6] sm:$0x3]  ;;  %v1670_v45 = vld [vmem:[%s8842_s3 + $0x268] sm:$0xff]  ;;  %v6197_v46 = vcombine.low %v581_v31, %v585_v32  ;;  %v1125_v31 = vld [vmem:[%s8842_s3 + $0x170] sm:$0xff] }
 0x138   :  { %v7387_v36 = vpack.c.bf16 %v1382_v33, %v1382_v33  ;;  %v6268_v51 = vcombine.high %v1666_v44, %v1670_v45  ;;  %v1941_v32 = vld [vmem:[%s8842_s3 + $0x2d8] sm:$0xff] }
 0x139   :  { %6193 = vmatmul.mubr.msk.bf16.vlgmr.msra.gmra.mxu1 %vm329_vm0, %v7285_v47  ;;  %6216 = vmatmul.mubr.msk.bf16.vlgmr.msra.gmra.mxu0 %vm329_vm0, %v7287_v48  ;;  %v1945_v33 = vld [vmem:[%s8842_s3 + $0x2f8] sm:$0xff] }
 0x13a   :  { %752 = vmatpush1.bf16.msra.mxu1 %v8852_v55  ;;  %1264 = vmatpush1.bf16.msra.mxu0 %v8853_v56  ;;  %v6207_v55 = vcombine.low %v590_v41, %v594_v43  ;;  %v6267_v56 = vcombine.low %v1666_v44, %v1670_v45  ;;  %v6291_v45 = vcombine.low %v1941_v32, %v1945_v33 }
 0x13b   :  { %753 = vmatprep.subr.bf16.mxu1 %v6180_v49  ;;  %1265 = vmatprep.subr.bf16.mxu0 %v6220_v50  ;;  %v6243_v49 = vcombine.low %v1387_v34, %v1391_v35  ;;  %v6208_v50 = vcombine.high %v590_v41, %v594_v43  ;;  %v6279_v35 = vcombine.low %v1931_v1, %v1935_v26  ;;  %v1933_v41 = vld [vmem:[%s8842_s3 + $0x298] sm:$0xff] }
 0x13c   :  { %771 = vmatprep.mubr.bf16.mxu1 %v8854_v59  ;;  %1283 = vmatprep.mubr.bf16.mxu0 %v8854_v59  ;;  %v1937_v43 = vld [vmem:[%s8842_s3 + $0x2b8] sm:$0xff] }
 0x13e   :  { %754 = vmatpush1.bf16.msra.mxu1 %v6179_v57  ;;  %1266 = vmatpush1.bf16.msra.mxu0 %v6219_v62  ;;  %v6260_v62 = vcombine.high %v1658_v53, %v1662_v54  ;;  %v2216_v53 = vld [vmem:[%s8842_s3 + $0x368] sm:$0xff] }
 0x13f   :  { %792 = vmatprep.subr.bf16.mxu1 %v6190_v2  ;;  %1345 = vmatprep.subr.bf16.mxu0 %v6232_v40  ;;  %v591_v2 = vld [vmem:[%s8842_s3 + $0x50] sm:$0xff] }
 0x140   :  { %v595_v40 = vld [vmem:[%s8842_s3 + $0x70] sm:$0xff] }
 0x141   :  { %6194 = vmatmul.mubr.msk.bf16.vlgmr.msra.gmra.mxu1 %vm329_vm0, %v7285_v47  ;;  %6234 = vmatmul.mubr.msk.bf16.vlgmr.msra.gmra.mxu0 %vm329_vm0, %v7325_v29  ;;  %v6210_v63 = vcombine.high %v591_v2, %v595_v40  ;;  %v6209_v8 = vcombine.low %v591_v2, %v595_v40  ;;  %v1388_v2 = vld [vmem:[%s8842_s3 + $0x1a0] sm:$0xff]  ;;  %v2204_v40 = vld [vmem:[%s8842_s3 + $0x308] sm:$0xff] }
 0x142   :  { %793 = vmatpush1.bf16.msra.mxu1 %v6189_v17  ;;  %1346 = vmatpush1.bf16.msra.mxu0 %v6231_v28  ;;  %v6272_v17 = vcombine.high %v1668_v42, %v1672_v15  ;;  %v583_v28 = vld [vmem:[%s8842_s3 + $0x10] sm:$0xff]  ;;  %v2208_v42 = vld [vmem:[%s8842_s3 + $0x328] sm:$0xff] }
 0x143   :  { %794 = vmatprep.subr.bf16.mxu1 %v6182_v3  ;;  %1347 = vmatprep.subr.bf16.mxu0 %v6224_v4  ;;  %v587_v3 = vld [vmem:[%s8842_s3 + $0x30] sm:$0xff]  ;;  %v1655_v4 = vld [vmem:[#allocation2 + $0x8] sm:$0x3] }
 0x144   :  { %812 = vmatprep.mubr.bf16.mxu1 %v8854_v59  ;;  %1365 = vmatprep.mubr.bf16.mxu0 %v8854_v59  ;;  %v6201_v13 = vcombine.low %v583_v28, %v587_v3 }
 0x146   :  { %795 = vmatpush1.bf16.msra.mxu1 %v6181_v9  ;;  %1348 = vmatpush1.bf16.msra.mxu0 %v6223_v10  ;;  %v7449_v9 = vpack.c.bf16 %v1655_v4, %v1655_v4  ;;  %v6202_v10 = vcombine.high %v583_v28, %v587_v3  ;;  %v1398_v28 = vld [vmem:[%s8842_s3 + $0x1f0] sm:$0xff]  ;;  %v2214_v3 = vld [vmem:[%s8842_s3 + $0x358] sm:$0xff] }
 0x147   :  { %833 = vmatprep.subr.bf16.mxu1 %v6192_v18  ;;  %1536 = vmatprep.subr.bf16.mxu0 %v6248_v20  ;;  %v6264_v18 = vcombine.high %v1660_v11, %v1664_v7  ;;  %v1119_v20 = vld [vmem:[%s8842_s3 + $0x140] sm:$0xff]  ;;  %v2218_v4 = vld [vmem:[%s8842_s3 + $0x378] sm:$0xff] }
 0x148   :  { %v6225_v27 = vcombine.low %v1119_v20, %v1123_v16 }
 0x149   :  { %6195 = vmatmul.mubr.msk.bf16.vlgmr.msra.gmra.mxu1 %vm329_vm0, %v7285_v47  ;;  %6236 = vmatmul.mubr.msk.bf16.vlgmr.msra.gmra.mxu0 %vm329_vm0, %v7325_v29 }
 0x14a   :  { %834 = vmatpush1.bf16.msra.mxu1 %v6191_v14  ;;  %1537 = vmatpush1.bf16.msra.mxu0 %v6247_v21  ;;  %v6263_v14 = vcombine.low %v1660_v11, %v1664_v7  ;;  %v6226_v21 = vcombine.high %v1119_v20, %v1123_v16  ;;  %v6299_v7 = vcombine.low %v2204_v40, %v2208_v42  ;;  %v2206_v20 = vld [vmem:[%s8842_s3 + $0x318] sm:$0xff] }
 0x14b   :  { %835 = vmatprep.subr.bf16.mxu1 %v6184_v23  ;;  %1538 = vmatprep.subr.bf16.mxu0 %v6240_v24  ;;  %v6288_v23 = vcombine.high %v1939_v58, %v1943_v19  ;;  %v1111_v24 = vld [vmem:[%s8842_s3 + $0x100] sm:$0xff]  ;;  %v2210_v16 = vld [vmem:[%s8842_s3 + $0x338] sm:$0xff] }
 0x14c   :  { %853 = vmatprep.mubr.bf16.mxu1 %v8854_v59  ;;  %1556 = vmatprep.mubr.bf16.mxu0 %v8854_v59  ;;  %v6217_v34 = vcombine.low %v1111_v24, %v1115_v0 }
 0x14e   :  { %836 = vmatpush1.bf16.msra.mxu1 %v6183_v30  ;;  %1539 = vmatpush1.bf16.msra.mxu0 %v6239_v5  ;;  %v6287_v30 = vcombine.low %v1939_v58, %v1943_v19  ;;  %v6218_v5 = vcombine.high %v1111_v24, %v1115_v0  ;;  %v6311_v19 = vcombine.low %v2214_v3, %v2218_v4  ;;  %v1669_v24 = vld [vmem:[%s8842_s3 + $0x260] sm:$0xff]  ;;  %v2485_v0 = vld [vmem:[%s8842_s3 + $0x3c8] sm:$0xff] }
 0x14f   :  { %957 = vmatprep.subr.bf16.mxu1 %v6206_v6  ;;  %1618 = vmatprep.subr.bf16.mxu0 %v6252_v22  ;;  %v6280_v6 = vcombine.high %v1931_v1, %v1935_v26  ;;  %v1121_v22 = vld [vmem:[%s8842_s3 + $0x150] sm:$0xff]  ;;  %v2489_v1 = vld [vmem:[%s8842_s3 + $0x3e8] sm:$0xff] }
 0x150   :  { %v6229_v44 = vcombine.low %v1121_v22, %v1125_v31 }
 0x151   :  { %6196 = vmatmul.mubr.msk.bf16.vlgmr.msra.gmra.mxu1 %vm329_vm0, %v7285_v47  ;;  %6254 = vmatmul.mubr.msk.bf16.vlgmr.msra.gmra.mxu0 %vm329_vm0, %v7387_v36  ;;  %v586_v47 = vld [vmem:[%s8842_s3 + $0x28] sm:$0xff] }
 0x152   :  { %958 = vmatpush1.bf16.msra.mxu1 %v6205_v37  ;;  %1619 = vmatpush1.bf16.msra.mxu0 %v6251_v25  ;;  %v6200_v57 = vcombine.high %v582_v52, %v586_v47  ;;  %v6199_v60 = vcombine.low %v582_v52, %v586_v47  ;;  %v6230_v37 = vcombine.high %v1121_v22, %v1125_v31  ;;  %v1396_v52 = vld [vmem:[%s8842_s3 + $0x1e0] sm:$0xff]  ;;  %v2212_v47 = vld [vmem:[%s8842_s3 + $0x348] sm:$0xff] }
 0x153   :  { %959 = vmatprep.subr.bf16.mxu1 %v6198_v38  ;;  %1620 = vmatprep.subr.bf16.mxu0 %v6244_v39  ;;  %v6292_v25 = vcombine.high %v1941_v32, %v1945_v33  ;;  %v1113_v38 = vld [vmem:[%s8842_s3 + $0x110] sm:$0xff]  ;;  %v1661_v22 = vld [vmem:[%s8842_s3 + $0x220] sm:$0xff]  ;;  %v2477_v31 = vld [vmem:[%s8842_s3 + $0x388] sm:$0xff] }
 0x154   :  { %977 = vmatprep.mubr.bf16.mxu1 %v8854_v59  ;;  %1638 = vmatprep.mubr.bf16.mxu0 %v8854_v59  ;;  %v1117_v39 = vld [vmem:[%s8842_s3 + $0x130] sm:$0xff]  ;;  %v2481_v32 = vld [vmem:[%s8842_s3 + $0x3a8] sm:$0xff] }
 0x155   :  { %v6221_v54 = vcombine.low %v1113_v38, %v1117_v39 }
 0x156   :  { %960 = vmatpush1.bf16.msra.mxu1 %v6197_v46  ;;  %1621 = vmatpush1.bf16.msra.mxu0 %v6243_v49  ;;  %v6222_v49 = vcombine.high %v1113_v38, %v1117_v39  ;;  %v1671_v38 = vld [vmem:[%s8842_s3 + $0x270] sm:$0xff]  ;;  %v2487_v39 = vld [vmem:[%s8842_s3 + $0x3d8] sm:$0xff] }
 0x157   :  { %998 = vmatprep.subr.bf16.mxu1 %v6208_v50  ;;  %1809 = vmatprep.subr.bf16.mxu0 %v6268_v51  ;;  %v6284_v50 = vcombine.high %v1933_v41, %v1937_v43  ;;  %v1392_v51 = vld [vmem:[%s8842_s3 + $0x1c0] sm:$0xff] }
 0x158   :  { %v6245_v15 = vcombine.low %v1392_v51, %v1396_v52 }
 0x159   :  { %6213 = vmatmul.mubr.msk.bf16.vlgmr.msra.gmra.mxu1 %vm329_vm0, %v7287_v48  ;;  %6256 = vmatmul.mubr.msk.bf16.vlgmr.msra.gmra.mxu0 %vm329_vm0, %v7387_v36 }
 0x15a   :  { %999 = vmatpush1.bf16.msra.mxu1 %v6207_v55  ;;  %1810 = vmatpush1.bf16.msra.mxu0 %v6267_v56  ;;  %v6283_v55 = vcombine.low %v1933_v41, %v1937_v43  ;;  %v6246_v56 = vcombine.high %v1392_v51, %v1396_v52  ;;  %v6319_v43 = vcombine.low %v2477_v31, %v2481_v32  ;;  %v2479_v51 = vld [vmem:[%s8842_s3 + $0x398] sm:$0xff] }
 0x15b   :  { %1000 = vmatprep.subr.bf16.mxu1 %v6200_v57  ;;  %1811 = vmatprep.subr.bf16.mxu0 %v6260_v62  ;;  %v6308_v57 = vcombine.high %v2212_v47, %v2216_v53  ;;  %v1384_v62 = vld [vmem:[%s8842_s3 + $0x180] sm:$0xff]  ;;  %v2483_v52 = vld [vmem:[%s8842_s3 + $0x3b8] sm:$0xff] }
 0x15c   :  { %1018 = vmatprep.mubr.bf16.mxu1 %v8854_v59  ;;  %1829 = vmatprep.mubr.bf16.mxu0 %v8854_v59  ;;  %v6237_v11 = vcombine.low %v1384_v62, %v1388_v2 }
 0x15e   :  { %1001 = vmatpush1.bf16.msra.mxu1 %v6199_v60  ;;  %1812 = vmatpush1.bf16.msra.mxu0 %v6259_v61  ;;  %v6307_v60 = vcombine.low %v2212_v47, %v2216_v53  ;;  %v6238_v61 = vcombine.high %v1384_v62, %v1388_v2  ;;  %v1942_v62 = vld [vmem:[%s8842_s3 + $0x2e0] sm:$0xff]  ;;  %v2758_v2 = vld [vmem:[%s8842_s3 + $0x448] sm:$0xff] }
 0x15f   :  { %1039 = vmatprep.subr.bf16.mxu1 %v6210_v63  ;;  %1891 = vmatprep.subr.bf16.mxu0 %v6272_v17  ;;  %v6300_v63 = vcombine.high %v2204_v40, %v2208_v42  ;;  %v1394_v17 = vld [vmem:[%s8842_s3 + $0x1d0] sm:$0xff]  ;;  %v2762_v40 = vld [vmem:[%s8842_s3 + $0x468] sm:$0xff] }
 0x160   :  { %v6249_v58 = vcombine.low %v1394_v17, %v1398_v28 }
 0x161   :  { %6214 = vmatmul.mubr.msk.bf16.vlgmr.msra.gmra.mxu1 %vm329_vm0, %v7287_v48  ;;  %6274 = vmatmul.mubr.msk.bf16.vlgmr.msra.gmra.mxu0 %vm329_vm0, %v7449_v9 }
 0x162   :  { %1040 = vmatpush1.bf16.msra.mxu1 %v6209_v8  ;;  %1892 = vmatpush1.bf16.msra.mxu0 %v6271_v12  ;;  %v6250_v8 = vcombine.high %v1394_v17, %v1398_v28  ;;  %v6312_v12 = vcombine.high %v2214_v3, %v2218_v4  ;;  %v1934_v17 = vld [vmem:[%s8842_s3 + $0x2a0] sm:$0xff]  ;;  %v2750_v28 = vld [vmem:[%s8842_s3 + $0x408] sm:$0xff] }
 0x163   :  { %1041 = vmatprep.subr.bf16.mxu1 %v6202_v10  ;;  %1893 = vmatprep.subr.bf16.mxu0 %v6264_v18  ;;  %v1386_v10 = vld [vmem:[%s8842_s3 + $0x190] sm:$0xff]  ;;  %v2754_v3 = vld [vmem:[%s8842_s3 + $0x428] sm:$0xff] }
 0x164   :  { %1059 = vmatprep.mubr.bf16.mxu1 %v8854_v59  ;;  %1911 = vmatprep.mubr.bf16.mxu0 %v8854_v59  ;;  %v1390_v18 = vld [vmem:[%s8842_s3 + $0x1b0] sm:$0xff] }
 0x165   :  { %v6241_v26 = vcombine.low %v1386_v10, %v1390_v18 }
 0x166   :  { %1042 = vmatpush1.bf16.msra.mxu1 %v6201_v13  ;;  %1894 = vmatpush1.bf16.msra.mxu0 %v6263_v14  ;;  %v6242_v14 = vcombine.high %v1386_v10, %v1390_v18  ;;  %v1944_v10 = vld [vmem:[%s8842_s3 + $0x2f0] sm:$0xff]  ;;  %v2760_v18 = vld [vmem:[%s8842_s3 + $0x458] sm:$0xff] }
 0x167   :  { %1222 = vmatprep.subr.bf16.mxu1 %v6226_v21  ;;  %2082 = vmatprep.subr.bf16.mxu0 %v6288_v23  ;;  %v6304_v21 = vcombine.high %v2206_v20, %v2210_v16  ;;  %v1665_v23 = vld [vmem:[%s8842_s3 + $0x240] sm:$0xff] }
 0x168   :  { %v6265_v33 = vcombine.low %v1665_v23, %v1669_v24 }
 0x169   :  { %6215 = vmatmul.mubr.msk.bf16.vlgmr.msra.gmra.mxu1 %vm329_vm0, %v7287_v48  ;;  %6276 = vmatmul.mubr.msk.bf16.vlgmr.msra.gmra.mxu0 %vm329_vm0, %v7449_v9  ;;  %v1928_v48 = vld [vmem:[#allocation2 + $0xa] sm:$0x3] }
 0x16a   :  { %1223 = vmatpush1.bf16.msra.mxu1 %v6225_v27  ;;  %2083 = vmatpush1.bf16.msra.mxu0 %v6287_v30  ;;  %v7511_v46 = vpack.c.bf16 %v1928_v48, %v1928_v48  ;;  %v6303_v27 = vcombine.low %v2206_v20, %v2210_v16  ;;  %v6266_v30 = vcombine.high %v1665_v23, %v1669_v24  ;;  %v2491_v48 = vld [vmem:[%s8842_s3 + $0x3f8] sm:$0xff] }
 0x16b   :  { %1224 = vmatprep.subr.bf16.mxu1 %v6218_v5  ;;  %2084 = vmatprep.subr.bf16.mxu0 %v6280_v6  ;;  %v6328_v5 = vcombine.high %v2485_v0, %v2489_v1  ;;  %v1657_v6 = vld [vmem:[%s8842_s3 + $0x200] sm:$0xff]  ;;  %v6331_v53 = vcombine.low %v2487_v39, %v2491_v48  ;;  %v6339_v16 = vcombine.low %v2750_v28, %v2754_v3  ;;  %v2752_v23 = vld [vmem:[%s8842_s3 + $0x418] sm:$0xff] }
 0x16c   :  { %1242 = vmatprep.mubr.bf16.mxu1 %v8854_v59  ;;  %2102 = vmatprep.mubr.bf16.mxu0 %v8854_v59  ;;  %v6257_v41 = vcombine.low %v1657_v6, %v1661_v22  ;;  %v2756_v24 = vld [vmem:[%s8842_s3 + $0x438] sm:$0xff] }
 0x16e   :  { %1225 = vmatpush1.bf16.msra.mxu1 %v6217_v34  ;;  %2085 = vmatpush1.bf16.msra.mxu0 %v6279_v35  ;;  %v6327_v34 = vcombine.low %v2485_v0, %v2489_v1  ;;  %v6258_v35 = vcombine.high %v1657_v6, %v1661_v22  ;;  %v2215_v6 = vld [vmem:[%s8842_s3 + $0x360] sm:$0xff]  ;;  %v3031_v22 = vld [vmem:[%s8842_s3 + $0x4c8] sm:$0xff] }
 0x16f   :  { %1304 = vmatprep.subr.bf16.mxu1 %v6230_v37  ;;  %2164 = vmatprep.subr.bf16.mxu0 %v6292_v25  ;;  %v6320_v37 = vcombine.high %v2477_v31, %v2481_v32  ;;  %v1667_v25 = vld [vmem:[%s8842_s3 + $0x250] sm:$0xff]  ;;  %v3035_v31 = vld [vmem:[%s8842_s3 + $0x4e8] sm:$0xff] }
 0x170   :  { %v6269_v47 = vcombine.low %v1667_v25, %v1671_v38 }
 0x171   :  { %6233 = vmatmul.mubr.msk.bf16.vlgmr.msra.gmra.mxu1 %vm329_vm0, %v7325_v29  ;;  %6294 = vmatmul.mubr.msk.bf16.vlgmr.msra.gmra.mxu0 %vm329_vm0, %v7511_v46 }
 0x172   :  { %1305 = vmatpush1.bf16.msra.mxu1 %v6229_v44  ;;  %2165 = vmatpush1.bf16.msra.mxu0 %v6291_v45  ;;  %v6270_v44 = vcombine.high %v1667_v25, %v1671_v38  ;;  %v6332_v45 = vcombine.high %v2487_v39, %v2491_v48  ;;  %v2207_v25 = vld [vmem:[%s8842_s3 + $0x320] sm:$0xff]  ;;  %v3023_v38 = vld [vmem:[%s8842_s3 + $0x488] sm:$0xff] }
 0x173   :  { %1306 = vmatprep.subr.bf16.mxu1 %v6222_v49  ;;  %2166 = vmatprep.subr.bf16.mxu0 %v6284_v50  ;;  %v1659_v49 = vld [vmem:[%s8842_s3 + $0x210] sm:$0xff]  ;;  %v3027_v39 = vld [vmem:[%s8842_s3 + $0x4a8] sm:$0xff] }
 0x174   :  { %1324 = vmatprep.mubr.bf16.mxu1 %v8854_v59  ;;  %2184 = vmatprep.mubr.bf16.mxu0 %v8854_v59  ;;  %v1663_v50 = vld [vmem:[%s8842_s3 + $0x230] sm:$0xff] }
 0x175   :  { %v6261_v42 = vcombine.low %v1659_v49, %v1663_v50 }
 0x176   :  { %1307 = vmatpush1.bf16.msra.mxu1 %v6221_v54  ;;  %2167 = vmatpush1.bf16.msra.mxu0 %v6283_v55  ;;  %v6262_v55 = vcombine.high %v1659_v49, %v1663_v50  ;;  %v2217_v49 = vld [vmem:[%s8842_s3 + $0x370] sm:$0xff]  ;;  %v3033_v50 = vld [vmem:[%s8842_s3 + $0x4d8] sm:$0xff] }
 0x177   :  { %1495 = vmatprep.subr.bf16.mxu1 %v6246_v56  ;;  %2355 = vmatprep.subr.bf16.mxu0 %v6308_v57  ;;  %v6324_v56 = vcombine.high %v2479_v51, %v2483_v52  ;;  %v1938_v57 = vld [vmem:[%s8842_s3 + $0x2c0] sm:$0xff] }
 0x178   :  { %v6285_v4 = vcombine.low %v1938_v57, %v1942_v62 }
 0x179   :  { %6235 = vmatmul.mubr.msk.bf16.vlgmr.msra.gmra.mxu1 %vm329_vm0, %v7325_v29  ;;  %6296 = vmatmul.mubr.msk.bf16.vlgmr.msra.gmra.mxu0 %vm329_vm0, %v7511_v46  ;;  %v2201_v29 = vld [vmem:[#allocation2 + $0xc] sm:$0x3] }
 0x17a   :  { %1496 = vmatpush1.bf16.msra.mxu1 %v6245_v15  ;;  %2356 = vmatpush1.bf16.msra.mxu0 %v6307_v60  ;;  %v7573_v13 = vpack.c.bf16 %v2201_v29, %v2201_v29  ;;  %v6323_v15 = vcombine.low %v2479_v51, %v2483_v52  ;;  %v6286_v60 = vcombine.high %v1938_v57, %v1942_v62  ;;  %v2764_v29 = vld [vmem:[%s8842_s3 + $0x478] sm:$0xff] }
 0x17b   :  { %1497 = vmatprep.subr.bf16.mxu1 %v6238_v61  ;;  %2357 = vmatprep.subr.bf16.mxu0 %v6300_v63  ;;  %v6348_v61 = vcombine.high %v2758_v2, %v2762_v40  ;;  %v1930_v63 = vld [vmem:[%s8842_s3 + $0x280] sm:$0xff]  ;;  %v6351_v1 = vcombine.low %v2760_v18, %v2764_v29  ;;  %v6359_v52 = vcombine.low %v3023_v38, %v3027_v39  ;;  %v3025_v57 = vld [vmem:[%s8842_s3 + $0x498] sm:$0xff] }
 0x17c   :  { %1515 = vmatprep.mubr.bf16.mxu1 %v8854_v59  ;;  %2375 = vmatprep.mubr.bf16.mxu0 %v8854_v59  ;;  %v6277_v20 = vcombine.low %v1930_v63, %v1934_v17  ;;  %v3029_v62 = vld [vmem:[%s8842_s3 + $0x4b8] sm:$0xff] }
 0x17e   :  { %1498 = vmatpush1.bf16.msra.mxu1 %v6237_v11  ;;  %2358 = vmatpush1.bf16.msra.mxu0 %v6299_v7  ;;  %v6347_v11 = vcombine.low %v2758_v2, %v2762_v40  ;;  %v6278_v7 = vcombine.high %v1930_v63, %v1934_v17  ;;  %v2488_v63 = vld [vmem:[%s8842_s3 + $0x3e0] sm:$0xff]  ;;  %v3304_v17 = vld [vmem:[%s8842_s3 + $0x548] sm:$0xff] }
 0x17f   :  { %1577 = vmatprep.subr.bf16.mxu1 %v6250_v8  ;;  %2437 = vmatprep.subr.bf16.mxu0 %v6312_v12  ;;  %v6340_v8 = vcombine.high %v2750_v28, %v2754_v3  ;;  %v1940_v12 = vld [vmem:[%s8842_s3 + $0x2d0] sm:$0xff]  ;;  %v3308_v28 = vld [vmem:[%s8842_s3 + $0x568] sm:$0xff] }
 0x180   :  { %v6289_v0 = vcombine.low %v1940_v12, %v1944_v10 }
 0x181   :  { %6253 = vmatmul.mubr.msk.bf16.vlgmr.msra.gmra.mxu1 %vm329_vm0, %v7387_v36  ;;  %6314 = vmatmul.mubr.msk.bf16.vlgmr.msra.gmra.mxu0 %vm329_vm0, %v7573_v13 }
 0x182   :  { %1578 = vmatpush1.bf16.msra.mxu1 %v6249_v58  ;;  %2438 = vmatpush1.bf16.msra.mxu0 %v6311_v19  ;;  %v6290_v58 = vcombine.high %v1940_v12, %v1944_v10  ;;  %v6352_v19 = vcombine.high %v2760_v18, %v2764_v29  ;;  %v2480_v12 = vld [vmem:[%s8842_s3 + $0x3a0] sm:$0xff]  ;;  %v3296_v10 = vld [vmem:[%s8842_s3 + $0x508] sm:$0xff] }
 0x183   :  { %1579 = vmatprep.subr.bf16.mxu1 %v6242_v14  ;;  %2439 = vmatprep.subr.bf16.mxu0 %v6304_v21  ;;  %v1932_v14 = vld [vmem:[%s8842_s3 + $0x290] sm:$0xff]  ;;  %v3300_v18 = vld [vmem:[%s8842_s3 + $0x528] sm:$0xff] }
 0x184   :  { %1597 = vmatprep.mubr.bf16.mxu1 %v8854_v59  ;;  %2457 = vmatprep.mubr.bf16.mxu0 %v8854_v59  ;;  %v1936_v21 = vld [vmem:[%s8842_s3 + $0x2b0] sm:$0xff] }
 0x185   :  { %v6281_v32 = vcombine.low %v1932_v14, %v1936_v21 }
 0x186   :  { %1580 = vmatpush1.bf16.msra.mxu1 %v6241_v26  ;;  %2440 = vmatpush1.bf16.msra.mxu0 %v6303_v27  ;;  %v6282_v27 = vcombine.high %v1932_v14, %v1936_v21  ;;  %v2490_v14 = vld [vmem:[%s8842_s3 + $0x3f0] sm:$0xff]  ;;  %v3306_v21 = vld [vmem:[%s8842_s3 + $0x558] sm:$0xff] }
 0x187   :  { %1768 = vmatprep.subr.bf16.mxu1 %v6266_v30  ;;  %2628 = vmatprep.subr.bf16.mxu0 %v6328_v5  ;;  %v6344_v30 = vcombine.high %v2752_v23, %v2756_v24  ;;  %v2211_v5 = vld [vmem:[%s8842_s3 + $0x340] sm:$0xff] }
 0x188   :  { %v6305_v48 = vcombine.low %v2211_v5, %v2215_v6 }
 0x189   :  { %6255 = vmatmul.mubr.msk.bf16.vlgmr.msra.gmra.mxu1 %vm329_vm0, %v7387_v36  ;;  %6316 = vmatmul.mubr.msk.bf16.vlgmr.msra.gmra.mxu0 %vm329_vm0, %v7573_v13  ;;  %v2474_v36 = vld [vmem:[#allocation2 + $0xe] sm:$0x3] }
 0x18a   :  { %1769 = vmatpush1.bf16.msra.mxu1 %v6265_v33  ;;  %2629 = vmatpush1.bf16.msra.mxu0 %v6327_v34  ;;  %v7635_v54 = vpack.c.bf16 %v2474_v36, %v2474_v36  ;;  %v6343_v33 = vcombine.low %v2752_v23, %v2756_v24  ;;  %v6306_v34 = vcombine.high %v2211_v5, %v2215_v6  ;;  %v3037_v36 = vld [vmem:[%s8842_s3 + $0x4f8] sm:$0xff] }
 0x18b   :  { %1770 = vmatprep.subr.bf16.mxu1 %v6258_v35  ;;  %2630 = vmatprep.subr.bf16.mxu0 %v6320_v37  ;;  %v6368_v35 = vcombine.high %v3031_v22, %v3035_v31  ;;  %v2203_v37 = vld [vmem:[%s8842_s3 + $0x300] sm:$0xff]  ;;  %v6371_v40 = vcombine.low %v3033_v50, %v3037_v36  ;;  %v6379_v24 = vcombine.low %v3296_v10, %v3300_v18  ;;  %v3298_v5 = vld [vmem:[%s8842_s3 + $0x518] sm:$0xff] }
 0x18c   :  { %1788 = vmatprep.mubr.bf16.mxu1 %v8854_v59  ;;  %2648 = vmatprep.mubr.bf16.mxu0 %v8854_v59  ;;  %v6297_v51 = vcombine.low %v2203_v37, %v2207_v25  ;;  %v3302_v6 = vld [vmem:[%s8842_s3 + $0x538] sm:$0xff] }
 0x18e   :  { %1771 = vmatpush1.bf16.msra.mxu1 %v6257_v41  ;;  %2631 = vmatpush1.bf16.msra.mxu0 %v6319_v43  ;;  %v6367_v41 = vcombine.low %v3031_v22, %v3035_v31  ;;  %v6298_v43 = vcombine.high %v2203_v37, %v2207_v25  ;;  %v2761_v37 = vld [vmem:[%s8842_s3 + $0x460] sm:$0xff]  ;;  %v3577_v25 = vld [vmem:[%s8842_s3 + $0x5c8] sm:$0xff] }
 0x18f   :  { %1850 = vmatprep.subr.bf16.mxu1 %v6270_v44  ;;  %2710 = vmatprep.subr.bf16.mxu0 %v6332_v45  ;;  %v6360_v44 = vcombine.high %v3023_v38, %v3027_v39  ;;  %v2213_v45 = vld [vmem:[%s8842_s3 + $0x350] sm:$0xff]  ;;  %v3581_v38 = vld [vmem:[%s8842_s3 + $0x5e8] sm:$0xff] }
 0x190   :  { %v6309_v2 = vcombine.low %v2213_v45, %v2217_v49 }
 0x191   :  { %6273 = vmatmul.mubr.msk.bf16.vlgmr.msra.gmra.mxu1 %vm329_vm0, %v7449_v9  ;;  %6334 = vmatmul.mubr.msk.bf16.vlgmr.msra.gmra.mxu0 %vm329_vm0, %v7635_v54 }
 0x192   :  { %1851 = vmatpush1.bf16.msra.mxu1 %v6269_v47  ;;  %2711 = vmatpush1.bf16.msra.mxu0 %v6331_v53  ;;  %v6310_v47 = vcombine.high %v2213_v45, %v2217_v49  ;;  %v6372_v53 = vcombine.high %v3033_v50, %v3037_v36  ;;  %v2753_v45 = vld [vmem:[%s8842_s3 + $0x420] sm:$0xff]  ;;  %v3569_v49 = vld [vmem:[%s8842_s3 + $0x588] sm:$0xff] }
 0x193   :  { %1852 = vmatprep.subr.bf16.mxu1 %v6262_v55  ;;  %2712 = vmatprep.subr.bf16.mxu0 %v6324_v56  ;;  %v2205_v55 = vld [vmem:[%s8842_s3 + $0x310] sm:$0xff]  ;;  %v3573_v50 = vld [vmem:[%s8842_s3 + $0x5a8] sm:$0xff] }
 0x194   :  { %1870 = vmatprep.mubr.bf16.mxu1 %v8854_v59  ;;  %2730 = vmatprep.mubr.bf16.mxu0 %v8854_v59  ;;  %v2209_v56 = vld [vmem:[%s8842_s3 + $0x330] sm:$0xff] }
 0x195   :  { %v6301_v3 = vcombine.low %v2205_v55, %v2209_v56 }
 0x196   :  { %1853 = vmatpush1.bf16.msra.mxu1 %v6261_v42  ;;  %2713 = vmatpush1.bf16.msra.mxu0 %v6323_v15  ;;  %v6302_v15 = vcombine.high %v2205_v55, %v2209_v56  ;;  %v2763_v55 = vld [vmem:[%s8842_s3 + $0x470] sm:$0xff]  ;;  %v3579_v56 = vld [vmem:[%s8842_s3 + $0x5d8] sm:$0xff] }
 0x197   :  { %2041 = vmatprep.subr.bf16.mxu1 %v6286_v60  ;;  %2901 = vmatprep.subr.bf16.mxu0 %v6348_v61  ;;  %v6364_v60 = vcombine.high %v3025_v57, %v3029_v62  ;;  %v2484_v61 = vld [vmem:[%s8842_s3 + $0x3c0] sm:$0xff] }
 0x198   :  { %v6325_v29 = vcombine.low %v2484_v61, %v2488_v63 }
 0x199   :  { %6275 = vmatmul.mubr.msk.bf16.vlgmr.msra.gmra.mxu1 %vm329_vm0, %v7449_v9  ;;  %6336 = vmatmul.mubr.msk.bf16.vlgmr.msra.gmra.mxu0 %vm329_vm0, %v7635_v54  ;;  %v2747_v9 = vld [vmem:[#allocation2 + $0x10] sm:$0x3] }
 0x19a   :  { %2042 = vmatpush1.bf16.msra.mxu1 %v6285_v4  ;;  %2902 = vmatpush1.bf16.msra.mxu0 %v6347_v11  ;;  %v7697_v26 = vpack.c.bf16 %v2747_v9, %v2747_v9  ;;  %v6363_v4 = vcombine.low %v3025_v57, %v3029_v62  ;;  %v6326_v11 = vcombine.high %v2484_v61, %v2488_v63  ;;  %v3310_v9 = vld [vmem:[%s8842_s3 + $0x578] sm:$0xff] }
 0x19b   :  { %2043 = vmatprep.subr.bf16.mxu1 %v6278_v7  ;;  %2903 = vmatprep.subr.bf16.mxu0 %v6340_v8  ;;  %v6388_v7 = vcombine.high %v3304_v17, %v3308_v28  ;;  %v2476_v8 = vld [vmem:[%s8842_s3 + $0x380] sm:$0xff]  ;;  %v6391_v31 = vcombine.low %v3306_v21, %v3310_v9  ;;  %v6399_v62 = vcombine.low %v3569_v49, %v3573_v50  ;;  %v3571_v61 = vld [vmem:[%s8842_s3 + $0x598] sm:$0xff] }
 0x19c   :  { %2061 = vmatprep.mubr.bf16.mxu1 %v8854_v59  ;;  %2921 = vmatprep.mubr.bf16.mxu0 %v8854_v59  ;;  %v6317_v23 = vcombine.low %v2476_v8, %v2480_v12  ;;  %v3575_v63 = vld [vmem:[%s8842_s3 + $0x5b8] sm:$0xff] }
 0x19e   :  { %2044 = vmatpush1.bf16.msra.mxu1 %v6277_v20  ;;  %2904 = vmatpush1.bf16.msra.mxu0 %v6339_v16  ;;  %v6387_v20 = vcombine.low %v3304_v17, %v3308_v28  ;;  %v6318_v16 = vcombine.high %v2476_v8, %v2480_v12  ;;  %v3034_v8 = vld [vmem:[%s8842_s3 + $0x4e0] sm:$0xff]  ;;  %v3850_v12 = vld [vmem:[%s8842_s3 + $0x648] sm:$0xff] }
 0x19f   :  { %2123 = vmatprep.subr.bf16.mxu1 %v6290_v58  ;;  %2983 = vmatprep.subr.bf16.mxu0 %v6352_v19  ;;  %v6380_v58 = vcombine.high %v3296_v10, %v3300_v18  ;;  %v2486_v19 = vld [vmem:[%s8842_s3 + $0x3d0] sm:$0xff]  ;;  %v3854_v10 = vld [vmem:[%s8842_s3 + $0x668] sm:$0xff] }
 0x1a0   :  { %v6329_v22 = vcombine.low %v2486_v19, %v2490_v14 }
 0x1a1   :  { %6293 = vmatmul.mubr.msk.bf16.vlgmr.msra.gmra.mxu1 %vm329_vm0, %v7511_v46  ;;  %6354 = vmatmul.mubr.msk.bf16.vlgmr.msra.gmra.mxu0 %vm329_vm0, %v7697_v26 }
 0x1a2   :  { %2124 = vmatpush1.bf16.msra.mxu1 %v6289_v0  ;;  %2984 = vmatpush1.bf16.msra.mxu0 %v6351_v1  ;;  %v6330_v0 = vcombine.high %v2486_v19, %v2490_v14  ;;  %v3293_v1 = vld [vmem:[#allocation2 + $0x14] sm:$0x3]  ;;  %v3026_v19 = vld [vmem:[%s8842_s3 + $0x4a0] sm:$0xff]  ;;  %v3842_v14 = vld [vmem:[%s8842_s3 + $0x608] sm:$0xff] }
 0x1a3   :  { %2125 = vmatprep.subr.bf16.mxu1 %v6282_v27  ;;  %2985 = vmatprep.subr.bf16.mxu0 %v6344_v30  ;;  %v6392_v27 = vcombine.high %v3306_v21, %v3310_v9  ;;  %v2478_v30 = vld [vmem:[%s8842_s3 + $0x390] sm:$0xff]  ;;  %v3846_v21 = vld [vmem:[%s8842_s3 + $0x628] sm:$0xff] }
 0x1a4   :  { %2143 = vmatprep.mubr.bf16.mxu1 %v8854_v59  ;;  %3003 = vmatprep.mubr.bf16.mxu0 %v8854_v59 }
 0x1a6   :  { %2126 = vmatpush1.bf16.msra.mxu1 %v6281_v32  ;;  %2986 = vmatpush1.bf16.msra.mxu0 %v6343_v33  ;;  %v7821_v32 = vpack.c.bf16 %v3293_v1, %v3293_v1  ;;  %v3032_v1 = vld [vmem:[%s8842_s3 + $0x4d0] sm:$0xff] }
 0x1a7   :  { %2314 = vmatprep.subr.bf16.mxu1 %v6306_v34  ;;  %3174 = vmatprep.subr.bf16.mxu0 %v6368_v35  ;;  %v6384_v34 = vcombine.high %v3298_v5, %v3302_v6  ;;  %v2757_v35 = vld [vmem:[%s8842_s3 + $0x440] sm:$0xff] }
 0x1a8   :  { %v6345_v36 = vcombine.low %v2757_v35, %v2761_v37 }
 0x1a9   :  { %6295 = vmatmul.mubr.msk.bf16.vlgmr.msra.gmra.mxu1 %vm329_vm0, %v7511_v46  ;;  %6356 = vmatmul.mubr.msk.bf16.vlgmr.msra.gmra.mxu0 %vm329_vm0, %v7697_v26  ;;  %v3020_v46 = vld [vmem:[#allocation2 + $0x12] sm:$0x3] }
 0x1aa   :  { %2315 = vmatpush1.bf16.msra.mxu1 %v6305_v48  ;;  %3175 = vmatpush1.bf16.msra.mxu0 %v6367_v41  ;;  %v7759_v42 = vpack.c.bf16 %v3020_v46, %v3020_v46  ;;  %v6383_v48 = vcombine.low %v3298_v5, %v3302_v6  ;;  %v6346_v41 = vcombine.high %v2757_v35, %v2761_v37  ;;  %v3583_v46 = vld [vmem:[%s8842_s3 + $0x5f8] sm:$0xff] }
 0x1ab   :  { %2316 = vmatprep.subr.bf16.mxu1 %v6298_v43  ;;  %3176 = vmatprep.subr.bf16.mxu0 %v6360_v44  ;;  %v6408_v43 = vcombine.high %v3577_v25, %v3581_v38  ;;  %v2749_v44 = vld [vmem:[%s8842_s3 + $0x400] sm:$0xff]  ;;  %v6411_v28 = vcombine.low %v3579_v56, %v3583_v46  ;;  %v6419_v6 = vcombine.low %v3842_v14, %v3846_v21  ;;  %v3844_v35 = vld [vmem:[%s8842_s3 + $0x618] sm:$0xff] }
 0x1ac   :  { %2334 = vmatprep.mubr.bf16.mxu1 %v8854_v59  ;;  %3194 = vmatprep.mubr.bf16.mxu0 %v8854_v59  ;;  %v6337_v57 = vcombine.low %v2749_v44, %v2753_v45  ;;  %v3848_v37 = vld [vmem:[%s8842_s3 + $0x638] sm:$0xff] }
 0x1ae   :  { %2317 = vmatpush1.bf16.msra.mxu1 %v6297_v51  ;;  %3177 = vmatpush1.bf16.msra.mxu0 %v6359_v52  ;;  %v6407_v51 = vcombine.low %v3577_v25, %v3581_v38  ;;  %v6338_v52 = vcombine.high %v2749_v44, %v2753_v45  ;;  %v3307_v44 = vld [vmem:[%s8842_s3 + $0x560] sm:$0xff]  ;;  %v4123_v45 = vld [vmem:[%s8842_s3 + $0x6c8] sm:$0xff] }
 0x1af   :  { %2396 = vmatprep.subr.bf16.mxu1 %v6310_v47  ;;  %3256 = vmatprep.subr.bf16.mxu0 %v6372_v53  ;;  %v6400_v47 = vcombine.high %v3569_v49, %v3573_v50  ;;  %v2759_v53 = vld [vmem:[%s8842_s3 + $0x450] sm:$0xff]  ;;  %v4127_v49 = vld [vmem:[%s8842_s3 + $0x6e8] sm:$0xff] }
 0x1b0   :  { %v6349_v17 = vcombine.low %v2759_v53, %v2763_v55 }
 0x1b1   :  { %6313 = vmatmul.mubr.msk.bf16.vlgmr.msra.gmra.mxu1 %vm329_vm0, %v7573_v13  ;;  %6374 = vmatmul.mubr.msk.bf16.vlgmr.msra.gmra.mxu0 %vm329_vm0, %v7759_v42 }
 0x1b2   :  { %2397 = vmatpush1.bf16.msra.mxu1 %v6309_v2  ;;  %3257 = vmatpush1.bf16.msra.mxu0 %v6371_v40  ;;  %v6350_v2 = vcombine.high %v2759_v53, %v2763_v55  ;;  %v3566_v40 = vld [vmem:[#allocation2 + $0x16] sm:$0x3]  ;;  %v3299_v53 = vld [vmem:[%s8842_s3 + $0x520] sm:$0xff]  ;;  %v4115_v55 = vld [vmem:[%s8842_s3 + $0x688] sm:$0xff] }
 0x1b3   :  { %2398 = vmatprep.subr.bf16.mxu1 %v6302_v15  ;;  %3258 = vmatprep.subr.bf16.mxu0 %v6364_v60  ;;  %v6412_v15 = vcombine.high %v3579_v56, %v3583_v46  ;;  %v2751_v60 = vld [vmem:[%s8842_s3 + $0x410] sm:$0xff]  ;;  %v4119_v56 = vld [vmem:[%s8842_s3 + $0x6a8] sm:$0xff] }
 0x1b4   :  { %2416 = vmatprep.mubr.bf16.mxu1 %v8854_v59  ;;  %3276 = vmatprep.mubr.bf16.mxu0 %v8854_v59 }
 0x1b6   :  { %2399 = vmatpush1.bf16.msra.mxu1 %v6301_v3  ;;  %3259 = vmatpush1.bf16.msra.mxu0 %v6363_v4  ;;  %v7883_v3 = vpack.c.bf16 %v3566_v40, %v3566_v40  ;;  %v3305_v40 = vld [vmem:[%s8842_s3 + $0x550] sm:$0xff] }
 0x1b7   :  { %2587 = vmatprep.subr.bf16.mxu1 %v6326_v11  ;;  %3447 = vmatprep.subr.bf16.mxu0 %v6388_v7  ;;  %v6404_v11 = vcombine.high %v3571_v61, %v3575_v63  ;;  %v3030_v7 = vld [vmem:[%s8842_s3 + $0x4c0] sm:$0xff] }
 0x1b8   :  { %v6365_v9 = vcombine.low %v3030_v7, %v3034_v8 }
 0x1b9   :  { %6315 = vmatmul.mubr.msk.bf16.vlgmr.msra.gmra.mxu1 %vm329_vm0, %v7573_v13  ;;  %6376 = vmatmul.mubr.msk.bf16.vlgmr.msra.gmra.mxu0 %vm329_vm0, %v7759_v42  ;;  %v2482_v13 = vld [vmem:[%s8842_s3 + $0x3b0] sm:$0xff] }
 0x1ba   :  { %2588 = vmatpush1.bf16.msra.mxu1 %v6325_v29  ;;  %3448 = vmatpush1.bf16.msra.mxu0 %v6387_v20  ;;  %v6322_v33 = vcombine.high %v2478_v30, %v2482_v13  ;;  %v6321_v39 = vcombine.low %v2478_v30, %v2482_v13  ;;  %v6403_v29 = vcombine.low %v3571_v61, %v3575_v63  ;;  %v3852_v30 = vld [vmem:[%s8842_s3 + $0x658] sm:$0xff] }
 0x1bb   :  { %2589 = vmatprep.subr.bf16.mxu1 %v6318_v16  ;;  %3449 = vmatprep.subr.bf16.mxu0 %v6380_v58  ;;  %v6366_v20 = vcombine.high %v3030_v7, %v3034_v8  ;;  %v6428_v16 = vcombine.high %v3850_v12, %v3854_v10  ;;  %v3022_v58 = vld [vmem:[%s8842_s3 + $0x480] sm:$0xff]  ;;  %v3856_v13 = vld [vmem:[%s8842_s3 + $0x678] sm:$0xff]  ;;  %v6439_v63 = vcombine.low %v4115_v55, %v4119_v56 }
 0x1bc   :  { %2607 = vmatprep.mubr.bf16.mxu1 %v8854_v59  ;;  %3467 = vmatprep.mubr.bf16.mxu0 %v8854_v59  ;;  %v6357_v5 = vcombine.low %v3022_v58, %v3026_v19  ;;  %v6431_v38 = vcombine.low %v3852_v30, %v3856_v13  ;;  %v4117_v7 = vld [vmem:[%s8842_s3 + $0x698] sm:$0xff] }
 0x1bd   :  { %v4121_v8 = vld [vmem:[%s8842_s3 + $0x6b8] sm:$0xff] }
 0x1be   :  { %2590 = vmatpush1.bf16.msra.mxu1 %v6317_v23  ;;  %3450 = vmatpush1.bf16.msra.mxu0 %v6379_v24  ;;  %v6427_v23 = vcombine.low %v3850_v12, %v3854_v10  ;;  %v6358_v24 = vcombine.high %v3022_v58, %v3026_v19  ;;  %v3580_v58 = vld [vmem:[%s8842_s3 + $0x5e0] sm:$0xff]  ;;  %v4396_v19 = vld [vmem:[%s8842_s3 + $0x748] sm:$0xff] }
 0x1bf   :  { %2669 = vmatprep.subr.bf16.mxu1 %v6330_v0  ;;  %3529 = vmatprep.subr.bf16.mxu0 %v6392_v27  ;;  %v6420_v0 = vcombine.high %v3842_v14, %v3846_v21  ;;  %v3036_v27 = vld [vmem:[%s8842_s3 + $0x4f0] sm:$0xff]  ;;  %v4400_v14 = vld [vmem:[%s8842_s3 + $0x768] sm:$0xff] }
 0x1c0   :  { %v6369_v25 = vcombine.low %v3032_v1, %v3036_v27 }
 0x1c1   :  { %6333 = vmatmul.mubr.msk.bf16.vlgmr.msra.gmra.mxu1 %vm329_vm0, %v7635_v54  ;;  %6394 = vmatmul.mubr.msk.bf16.vlgmr.msra.gmra.mxu0 %vm329_vm0, %v7821_v32 }
 0x1c2   :  { %2670 = vmatpush1.bf16.msra.mxu1 %v6329_v22  ;;  %3530 = vmatpush1.bf16.msra.mxu0 %v6391_v31  ;;  %v6370_v22 = vcombine.high %v3032_v1, %v3036_v27  ;;  %v3839_v31 = vld [vmem:[#allocation2 + $0x18] sm:$0x3]  ;;  %v3572_v1 = vld [vmem:[%s8842_s3 + $0x5a0] sm:$0xff]  ;;  %v4388_v27 = vld [vmem:[%s8842_s3 + $0x708] sm:$0xff] }
 0x1c3   :  { %2671 = vmatprep.subr.bf16.mxu1 %v6322_v33  ;;  %3531 = vmatprep.subr.bf16.mxu0 %v6384_v34  ;;  %v6432_v33 = vcombine.high %v3852_v30, %v3856_v13  ;;  %v3024_v34 = vld [vmem:[%s8842_s3 + $0x490] sm:$0xff]  ;;  %v4392_v30 = vld [vmem:[%s8842_s3 + $0x728] sm:$0xff] }
 0x1c4   :  { %2689 = vmatprep.mubr.bf16.mxu1 %v8854_v59  ;;  %3549 = vmatprep.mubr.bf16.mxu0 %v8854_v59 }
 0x1c6   :  { %2672 = vmatpush1.bf16.msra.mxu1 %v6321_v39  ;;  %3532 = vmatpush1.bf16.msra.mxu0 %v6383_v48  ;;  %v7945_v39 = vpack.c.bf16 %v3839_v31, %v3839_v31  ;;  %v3578_v31 = vld [vmem:[%s8842_s3 + $0x5d0] sm:$0xff] }
 0x1c7   :  { %2860 = vmatprep.subr.bf16.mxu1 %v6346_v41  ;;  %3720 = vmatprep.subr.bf16.mxu0 %v6408_v43  ;;  %v6424_v41 = vcombine.high %v3844_v35, %v3848_v37  ;;  %v3303_v43 = vld [vmem:[%s8842_s3 + $0x540] sm:$0xff] }
 0x1c8   :  { %v6385_v46 = vcombine.low %v3303_v43, %v3307_v44 }
 0x1c9   :  { %6335 = vmatmul.mubr.msk.bf16.vlgmr.msra.gmra.mxu1 %vm329_vm0, %v7635_v54  ;;  %6396 = vmatmul.mubr.msk.bf16.vlgmr.msra.gmra.mxu0 %vm329_vm0, %v7821_v32  ;;  %v2755_v54 = vld [vmem:[%s8842_s3 + $0x430] sm:$0xff] }
 0x1ca   :  { %2861 = vmatpush1.bf16.msra.mxu1 %v6345_v36  ;;  %3721 = vmatpush1.bf16.msra.mxu0 %v6407_v51  ;;  %v6342_v4 = vcombine.high %v2751_v60, %v2755_v54  ;;  %v6341_v18 = vcombine.low %v2751_v60, %v2755_v54  ;;  %v6423_v36 = vcombine.low %v3844_v35, %v3848_v37  ;;  %v4125_v60 = vld [vmem:[%s8842_s3 + $0x6d8] sm:$0xff] }
 0x1cb   :  { %2862 = vmatprep.subr.bf16.mxu1 %v6338_v52  ;;  %3722 = vmatprep.subr.bf16.mxu0 %v6400_v47  ;;  %v6386_v51 = vcombine.high %v3303_v43, %v3307_v44  ;;  %v6448_v52 = vcombine.high %v4123_v45, %v4127_v49  ;;  %v3295_v47 = vld [vmem:[%s8842_s3 + $0x500] sm:$0xff]  ;;  %v4129_v54 = vld [vmem:[%s8842_s3 + $0x6f8] sm:$0xff] }
 0x1cc   :  { %2880 = vmatprep.mubr.bf16.mxu1 %v8854_v59  ;;  %3740 = vmatprep.mubr.bf16.mxu0 %v8854_v59  ;;  %v6377_v61 = vcombine.low %v3295_v47, %v3299_v53  ;;  %v6451_v10 = vcombine.low %v4125_v60, %v4129_v54  ;;  %v4385_v44 = vld [vmem:[#allocation2 + $0x1c] sm:$0x3] }
 0x1ce   :  { %2863 = vmatpush1.bf16.msra.mxu1 %v6337_v57  ;;  %3723 = vmatpush1.bf16.msra.mxu0 %v6399_v62  ;;  %v6447_v57 = vcombine.low %v4123_v45, %v4127_v49  ;;  %v6378_v62 = vcombine.high %v3295_v47, %v3299_v53  ;;  %v3574_v49 = vld [vmem:[%s8842_s3 + $0x5b0] sm:$0xff] }
 0x1cf   :  { %2942 = vmatprep.subr.bf16.mxu1 %v6350_v2  ;;  %3802 = vmatprep.subr.bf16.mxu0 %v6412_v15  ;;  %v6440_v2 = vcombine.high %v4115_v55, %v4119_v56  ;;  %v3309_v15 = vld [vmem:[%s8842_s3 + $0x570] sm:$0xff] }
 0x1d0   :  { %v6389_v12 = vcombine.low %v3305_v40, %v3309_v15 }
 0x1d1   :  { %6353 = vmatmul.mubr.msk.bf16.vlgmr.msra.gmra.mxu1 %vm329_vm0, %v7697_v26  ;;  %6414 = vmatmul.mubr.msk.bf16.vlgmr.msra.gmra.mxu0 %vm329_vm0, %v7883_v3 }
 0x1d2   :  { %2943 = vmatpush1.bf16.msra.mxu1 %v6349_v17  ;;  %3803 = vmatpush1.bf16.msra.mxu0 %v6411_v28  ;;  %v6390_v17 = vcombine.high %v3305_v40, %v3309_v15  ;;  %v4112_v28 = vld [vmem:[#allocation2 + $0x1a] sm:$0x3]  ;;  %v3853_v40 = vld [vmem:[%s8842_s3 + $0x660] sm:$0xff]  ;;  %v4669_v15 = vld [vmem:[%s8842_s3 + $0x7c8] sm:$0xff] }
 0x1d3   :  { %2944 = vmatprep.subr.bf16.mxu1 %v6342_v4  ;;  %3804 = vmatprep.subr.bf16.mxu0 %v6404_v11  ;;  %v6452_v4 = vcombine.high %v4125_v60, %v4129_v54  ;;  %v3297_v11 = vld [vmem:[%s8842_s3 + $0x510] sm:$0xff]  ;;  %v4673_v60 = vld [vmem:[%s8842_s3 + $0x7e8] sm:$0xff] }
 0x1d4   :  { %2962 = vmatprep.mubr.bf16.mxu1 %v8854_v59  ;;  %3822 = vmatprep.mubr.bf16.mxu0 %v8854_v59 }
 0x1d6   :  { %2945 = vmatpush1.bf16.msra.mxu1 %v6341_v18  ;;  %3805 = vmatpush1.bf16.msra.mxu0 %v6403_v29  ;;  %v8007_v18 = vpack.c.bf16 %v4112_v28, %v4112_v28 }
 0x1d7   :  { %3133 = vmatprep.subr.bf16.mxu1 %v6366_v20  ;;  %3993 = vmatprep.subr.bf16.mxu0 %v6428_v16  ;;  %v6444_v20 = vcombine.high %v4117_v7, %v4121_v8  ;;  %v3576_v16 = vld [vmem:[%s8842_s3 + $0x5c0] sm:$0xff] }
 0x1d8   :  { %v6405_v13 = vcombine.low %v3576_v16, %v3580_v58 }
 0x1d9   :  { %6355 = vmatmul.mubr.msk.bf16.vlgmr.msra.gmra.mxu1 %vm329_vm0, %v7697_v26  ;;  %6416 = vmatmul.mubr.msk.bf16.vlgmr.msra.gmra.mxu0 %vm329_vm0, %v7883_v3  ;;  %v3028_v26 = vld [vmem:[%s8842_s3 + $0x4b0] sm:$0xff] }
 0x1da   :  { %3134 = vmatpush1.bf16.msra.mxu1 %v6365_v9  ;;  %3994 = vmatpush1.bf16.msra.mxu0 %v6427_v23  ;;  %v6362_v48 = vcombine.high %v3024_v34, %v3028_v26  ;;  %v6361_v50 = vcombine.low %v3024_v34, %v3028_v26  ;;  %v6443_v9 = vcombine.low %v4117_v7, %v4121_v8  ;;  %v4398_v34 = vld [vmem:[%s8842_s3 + $0x758] sm:$0xff]  ;;  %v3841_v7 = vld [vmem:[%s8842_s3 + $0x600] sm:$0xff] }
 0x1db   :  { %3135 = vmatprep.subr.bf16.mxu1 %v6358_v24  ;;  %3995 = vmatprep.subr.bf16.mxu0 %v6420_v0  ;;  %v6406_v23 = vcombine.high %v3576_v16, %v3580_v58  ;;  %v6468_v24 = vcombine.high %v4396_v19, %v4400_v14  ;;  %v3568_v0 = vld [vmem:[%s8842_s3 + $0x580] sm:$0xff]  ;;  %v4402_v26 = vld [vmem:[%s8842_s3 + $0x778] sm:$0xff]  ;;  %v6487_v58 = vcombine.low %v4669_v15, %v4673_v60 }
 0x1dc   :  { %3153 = vmatprep.mubr.bf16.mxu1 %v8854_v59  ;;  %4013 = vmatprep.mubr.bf16.mxu0 %v8854_v59  ;;  %v6472_v45 = vcombine.high %v4398_v34, %v4402_v26  ;;  %v6471_v53 = vcombine.low %v4398_v34, %v4402_v26  ;;  %v3845_v8 = vld [vmem:[%s8842_s3 + $0x620] sm:$0xff]  ;;  %v3843_v26 = vld [vmem:[%s8842_s3 + $0x610] sm:$0xff] }
 0x1de   :  { %3136 = vmatpush1.bf16.msra.mxu1 %v6357_v5  ;;  %3996 = vmatpush1.bf16.msra.mxu0 %v6419_v6  ;;  %v6467_v5 = vcombine.low %v4396_v19, %v4400_v14  ;;  %v6398_v6 = vcombine.high %v3568_v0, %v3572_v1 }
 0x1df   :  { %3215 = vmatprep.subr.bf16.mxu1 %v6370_v22  ;;  %4075 = vmatprep.subr.bf16.mxu0 %v6432_v33  ;;  %v6460_v22 = vcombine.high %v4388_v27, %v4392_v30  ;;  %v3582_v33 = vld [vmem:[%s8842_s3 + $0x5f0] sm:$0xff] }
 0x1e0   :  { %v6410_v43 = vcombine.high %v3578_v31, %v3582_v33  ;;  %v6409_v47 = vcombine.low %v3578_v31, %v3582_v33  ;;  %v4658_v33 = vld [vmem:[#allocation2 + $0x1e] sm:$0x3] }
 0x1e1   :  { %6373 = vmatmul.mubr.msk.bf16.vlgmr.msra.gmra.mxu1 %vm329_vm0, %v7759_v42  ;;  %6434 = vmatmul.mubr.msk.bf16.vlgmr.msra.gmra.mxu0 %vm329_vm0, %v7945_v39 }
 0x1e2   :  { %3216 = vmatpush1.bf16.msra.mxu1 %v6369_v25  ;;  %4076 = vmatpush1.bf16.msra.mxu0 %v6431_v38  ;;  %v6397_v25 = vcombine.low %v3568_v0, %v3572_v1  ;;  %v6459_v38 = vcombine.low %v4388_v27, %v4392_v30  ;;  %v4671_v0 = vld [vmem:[%s8842_s3 + $0x7d8] sm:$0xff] }
 0x1e3   :  { %3217 = vmatprep.subr.bf16.mxu1 %v6362_v48  ;;  %4077 = vmatprep.subr.bf16.mxu0 %v6424_v41  ;;  %v4675_v1 = vld [vmem:[%s8842_s3 + $0x7f8] sm:$0xff] }
 0x1e4   :  { %3235 = vmatprep.mubr.bf16.mxu1 %v8854_v59  ;;  %4095 = vmatprep.mubr.bf16.mxu0 %v8854_v59  ;;  %v6492_v34 = vcombine.high %v4671_v0, %v4675_v1 }
 0x1e6   :  { %3218 = vmatpush1.bf16.msra.mxu1 %v6361_v50  ;;  %4078 = vmatpush1.bf16.msra.mxu0 %v6423_v36  ;;  %v4390_v50 = vld [vmem:[%s8842_s3 + $0x718] sm:$0xff] }
 0x1e7   :  { %3406 = vmatprep.subr.bf16.mxu1 %v6386_v51  ;;  %4266 = vmatprep.subr.bf16.mxu0 %v6448_v52  ;;  %v4394_v36 = vld [vmem:[%s8842_s3 + $0x738] sm:$0xff] }
 0x1e9   :  { %6375 = vmatmul.mubr.msk.bf16.vlgmr.msra.gmra.mxu1 %vm329_vm0, %v7759_v42  ;;  %6436 = vmatmul.mubr.msk.bf16.vlgmr.msra.gmra.mxu0 %vm329_vm0, %v7945_v39  ;;  %v3301_v42 = vld [vmem:[%s8842_s3 + $0x530] sm:$0xff] }
 0x1ea   :  { %3407 = vmatpush1.bf16.msra.mxu1 %v6385_v46  ;;  %4267 = vmatpush1.bf16.msra.mxu0 %v6447_v57  ;;  %v6382_v29 = vcombine.high %v3297_v11, %v3301_v42  ;;  %v6381_v21 = vcombine.low %v3297_v11, %v3301_v42  ;;  %v8077_v46 = vpack.c.bf16 %v4385_v44, %v4385_v44 }
 0x1eb   :  { %3408 = vmatprep.subr.bf16.mxu1 %v6378_v62  ;;  %4268 = vmatprep.subr.bf16.mxu0 %v6440_v2  ;;  %v6464_v62 = vcombine.high %v4390_v50, %v4394_v36  ;;  %v3849_v2 = vld [vmem:[%s8842_s3 + $0x640] sm:$0xff]  ;;  %v6488_v42 = vcombine.high %v4669_v15, %v4673_v60 }
 0x1ec   :  { %3426 = vmatprep.mubr.bf16.mxu1 %v8854_v59  ;;  %4286 = vmatprep.mubr.bf16.mxu0 %v8854_v59  ;;  %v6426_v11 = vcombine.high %v3849_v2, %v3853_v40  ;;  %v6425_v16 = vcombine.low %v3849_v2, %v3853_v40 }
 0x1ee   :  { %3409 = vmatpush1.bf16.msra.mxu1 %v6377_v61  ;;  %4269 = vmatpush1.bf16.msra.mxu0 %v6439_v63 }
 0x1ef   :  { %3488 = vmatprep.subr.bf16.mxu1 %v6390_v17  ;;  %4348 = vmatprep.subr.bf16.mxu0 %v6452_v4  ;;  %v6463_v17 = vcombine.low %v4390_v50, %v4394_v36  ;;  %v8151_v36 = vpack.c.bf16 %v4658_v33, %v4658_v33  ;;  %v4399_v33 = vld [vmem:[%s8842_s3 + $0x760] sm:$0xff] }
 0x1f1   :  { %6393 = vmatmul.mubr.msk.bf16.vlgmr.msra.gmra.mxu1 %vm329_vm0, %v7821_v32  ;;  %6454 = vmatmul.mubr.msk.bf16.vlgmr.msra.gmra.mxu0 %vm329_vm0, %v8007_v18 }
 0x1f2   :  { %3489 = vmatpush1.bf16.msra.mxu1 %v6389_v12  ;;  %4349 = vmatpush1.bf16.msra.mxu0 %v6451_v10  ;;  %v4661_v12 = vld [vmem:[%s8842_s3 + $0x788] sm:$0xff] }
 0x1f3   :  { %3490 = vmatprep.subr.bf16.mxu1 %v6382_v29  ;;  %4350 = vmatprep.subr.bf16.mxu0 %v6444_v20  ;;  %v4665_v10 = vld [vmem:[%s8842_s3 + $0x7a8] sm:$0xff] }
 0x1f4   :  { %3508 = vmatprep.mubr.bf16.mxu1 %v8854_v59  ;;  %4368 = vmatprep.mubr.bf16.mxu0 %v8854_v59 }
 0x1f6   :  { %3491 = vmatpush1.bf16.msra.mxu1 %v6381_v21  ;;  %4351 = vmatpush1.bf16.msra.mxu0 %v6443_v9  ;;  %v6418_v21 = vcombine.high %v3841_v7, %v3845_v8  ;;  %v6480_v9 = vcombine.high %v4661_v12, %v4665_v10 }
 0x1f7   :  { %3679 = vmatprep.subr.bf16.mxu1 %v6406_v23  ;;  %4539 = vmatprep.subr.bf16.mxu0 %v6468_v24  ;;  %v3851_v23 = vld [vmem:[%s8842_s3 + $0x650] sm:$0xff] }
 0x1f8   :  { %v3855_v24 = vld [vmem:[%s8842_s3 + $0x670] sm:$0xff] }
 0x1f9   :  { %v8051_v35 = vpop.f32.mrf.mxu1  ;;  %v8053_v37 = vpop.f32.mrf.mxu0  ;;  %6395 = vmatmul.mubr.msk.bf16.vlgmr.msra.gmra.mxu1 %vm329_vm0, %v7821_v32  ;;  %6456 = vmatmul.mubr.msk.bf16.vlgmr.msra.gmra.mxu0 %vm329_vm0, %v8007_v18  ;;  %v3570_v32 = vld [vmem:[%s8842_s3 + $0x590] sm:$0xff]  ;;  %v6430_v31 = vcombine.high %v3851_v23, %v3855_v24 }
 0x1fa   :  { %3680 = vmatpush1.bf16.msra.mxu1 %v6405_v13  ;;  %4540 = vmatpush1.bf16.msra.mxu0 %v6467_v5  ;;  %v6402_v57 = vcombine.high %v3570_v32, %v3574_v49  ;;  %v6401_v63 = vcombine.low %v3570_v32, %v3574_v49  ;;  %v6417_v13 = vcombine.low %v3841_v7, %v3845_v8 }
 0x1fb   :  { %v8059_v48 = vpop.f32.mrf.mxu1  ;;  %v8061_v41 = vpop.f32.mrf.mxu0  ;;  %3681 = vmatprep.subr.bf16.mxu1 %v6398_v6  ;;  %4541 = vmatprep.subr.bf16.mxu0 %v6460_v22  ;;  %v6479_v5 = vcombine.low %v4661_v12, %v4665_v10  ;;  %v6491_v32 = vcombine.low %v4671_v0, %v4675_v1 }
 0x1fc   :  { %3699 = vmatprep.mubr.bf16.mxu1 %v8854_v59  ;;  %4559 = vmatprep.mubr.bf16.mxu0 %v8854_v59 }
 0x1fd   :  { %v736_v51 = vpop.f32.mrf.mxu1  ;;  %v1106_v52 = vpop.f32.mrf.mxu0 }
 0x1fe   :  { %3682 = vmatpush1.bf16.msra.mxu1 %v6397_v25  ;;  %4542 = vmatpush1.bf16.msra.mxu0 %v6459_v38  ;;  %v4663_v25 = vld [vmem:[%s8842_s3 + $0x798] sm:$0xff] }
 0x1ff   :  { %v737_v55 = vpop.f32.mrf.mxu1  ;;  %v1107_v56 = vpop.f32.mrf.mxu0  ;;  %3761 = vmatprep.subr.bf16.mxu1 %v6410_v43  ;;  %4621 = vmatprep.subr.bf16.mxu0 %v6472_v45  ;;  %v4667_v38 = vld [vmem:[%s8842_s3 + $0x7b8] sm:$0xff]  ;;  %v6429_v45 = vcombine.low %v3851_v23, %v3855_v24 }
 0x200   :  { %v6484_v52 = vcombine.high %v4663_v25, %v4667_v38  ;;  %v6483_v2 = vcombine.low %v4663_v25, %v4667_v38  ;;  %v6816_v38 = vld [vmem:[%s8844_s5 + $0x160] ss:$8 sps:$4 sm:$0xff]  }
 0x201   :  { %v8091_v54 = vpop.f32.mrf.mxu1  ;;  %v8093_v61 = vpop.f32.mrf.mxu0  ;;  %6413 = vmatmul.mubr.msk.bf16.vlgmr.msra.gmra.mxu1 %vm329_vm0, %v7883_v3  ;;  %6474 = vmatmul.mubr.msk.bf16.vlgmr.msra.gmra.mxu0 %vm329_vm0, %v8077_v46 }
 0x202   :  { %3762 = vmatpush1.bf16.msra.mxu1 %v6409_v47  ;;  %4622 = vmatpush1.bf16.msra.mxu0 %v6471_v53  ;;  %v4122_v47 = vld [vmem:[%s8842_s3 + $0x6c0] sm:$0xff] }
 0x203   :  { %v8099_v28 = vpop.f32.mrf.mxu1  ;;  %v8101_v4 = vpop.f32.mrf.mxu0  ;;  %3763 = vmatprep.subr.bf16.mxu1 %v6402_v57  ;;  %4623 = vmatprep.subr.bf16.mxu0 %v6464_v62  ;;  %v4126_v53 = vld [vmem:[%s8842_s3 + $0x6e0] sm:$0xff] }
 0x204   :  { %3781 = vmatprep.mubr.bf16.mxu1 %v8854_v59  ;;  %4641 = vmatprep.mubr.bf16.mxu0 %v8854_v59  ;;  %v6446_v60 = vcombine.high %v4122_v47, %v4126_v53  ;;  %v6445_v8 = vcombine.low %v4122_v47, %v4126_v53 }
 0x205   :  { %v777_v29 = vpop.f32.mrf.mxu1  ;;  %v1289_v20 = vpop.f32.mrf.mxu0 }
 0x206   :  { %3764 = vmatpush1.bf16.msra.mxu1 %v6401_v63  ;;  %4624 = vmatpush1.bf16.msra.mxu0 %v6463_v17  ;;  %v4124_v20 = vld [vmem:[%s8842_s3 + $0x6d0] sm:$0xff] }
 0x207   :  { %v778_v19 = vpop.f32.mrf.mxu1  ;;  %v1290_v14 = vpop.f32.mrf.mxu0  ;;  %3952 = vmatprep.subr.bf16.mxu1 %v6426_v11  ;;  %4812 = vmatprep.subr.bf16.mxu0 %v6488_v42  ;;  %v4118_v11 = vld [vmem:[%s8842_s3 + $0x6a0] sm:$0xff] }
 0x209   :  { %v8129_v27 = vpop.f32.mrf.mxu1  ;;  %v1367_v30 = vpop.f32.mrf.mxu0  ;;  %6415 = vmatmul.mubr.msk.bf16.vlgmr.msra.gmra.mxu1 %vm329_vm0, %v7883_v3  ;;  %6476 = vmatmul.mubr.msk.bf16.vlgmr.msra.gmra.mxu0 %vm329_vm0, %v8077_v46  ;;  %v3847_v3 = vld [vmem:[%s8842_s3 + $0x630] sm:$0xff] }
 0x20a   :  { %3953 = vmatpush1.bf16.msra.mxu1 %v6425_v16  ;;  %4813 = vmatpush1.bf16.msra.mxu0 %v6487_v58  ;;  %v6422_v51 = vcombine.high %v3843_v26, %v3847_v3  ;;  %v6421_v62 = vcombine.low %v3843_v26, %v3847_v3  ;;  %v4128_v16 = vld [vmem:[%s8842_s3 + $0x6f0] sm:$0xff] }
 0x20b   :  { %v8135_v6 = vpop.f32.mrf.mxu1  ;;  %v1369_v22 = vpop.f32.mrf.mxu0  ;;  %3954 = vmatprep.subr.bf16.mxu1 %v6418_v21  ;;  %4814 = vmatprep.subr.bf16.mxu0 %v6480_v9  ;;  %v6450_v0 = vcombine.high %v4124_v20, %v4128_v16 }
 0x20c   :  { %3972 = vmatprep.mubr.bf16.mxu1 %v8854_v59  ;;  %4832 = vmatprep.mubr.bf16.mxu0 %v8854_v59 }
 0x20d   :  { %v818_v43 = vpop.f32.mrf.mxu1  ;;  %v1371_v44 = vpop.f32.mrf.mxu0 }
 0x20e   :  { %3955 = vmatpush1.bf16.msra.mxu1 %v6417_v13  ;;  %4815 = vmatpush1.bf16.msra.mxu0 %v6479_v5  ;;  %v6818_v43 = vld [vmem:[%s8844_s5 + $0x164] ss:$8 sps:$4 sm:$0xff]  }
 0x20f   :  { %v819_v49 = vpop.f32.mrf.mxu1  ;;  %v1372_v50 = vpop.f32.mrf.mxu0  ;;  %4034 = vmatprep.subr.bf16.mxu1 %v6430_v31  ;;  %4894 = vmatprep.subr.bf16.mxu0 %v6492_v34  ;;  %v6449_v31 = vcombine.low %v4124_v20, %v4128_v16  ;;  %v6815_v34 = vld [vmem:[%s8844_s5 + $0x174] ss:$8 sps:$4 sm:$0xff]  }
 0x210   :  { %v4387_v50 = vld [vmem:[%s8842_s3 + $0x700] sm:$0xff] }
 0x211   :  { %v855_v55 = vpop.f32.mrf.mxu1  ;;  %v8159_v56 = vpop.f32.mrf.mxu0  ;;  %6433 = vmatmul.mubr.msk.bf16.vlgmr.msra.gmra.mxu1 %vm329_vm0, %v7945_v39  ;;  %6494 = vmatmul.mubr.msk.bf16.vlgmr.msra.gmra.mxu0 %vm329_vm0, %v8151_v36 }
 0x212   :  { %v1103_v57 = vadd.f32 %v8053_v37, %v855_v55  ;;  %4035 = vmatpush1.bf16.msra.mxu1 %v6429_v45  ;;  %4895 = vmatpush1.bf16.msra.mxu0 %v6491_v32  ;;  %v4114_v37 = vld [vmem:[%s8842_s3 + $0x680] sm:$0xff] }
 0x213   :  { %v857_v40 = vpop.f32.mrf.mxu1  ;;  %v8166_v15 = vpop.f32.mrf.mxu0  ;;  %4036 = vmatprep.subr.bf16.mxu1 %v6422_v51  ;;  %4896 = vmatprep.subr.bf16.mxu0 %v6484_v52  ;;  %v6438_v29 = vcombine.high %v4114_v37, %v4118_v11  ;;  %v6437_v9 = vcombine.low %v4114_v37, %v4118_v11  ;;  %v4391_v51 = vld [vmem:[%s8842_s3 + $0x720] sm:$0xff] }
 0x214   :  { %v1105_v63 = vadd.f32 %v8061_v41, %v857_v40  ;;  %4054 = vmatprep.mubr.bf16.mxu1 %v8854_v59  ;;  %4914 = vmatprep.mubr.bf16.mxu0 %v8854_v59  ;;  %v1380_v17 = vadd.f32 %v1367_v30, %v1103_v57  ;;  %v4120_v30 = vld [vmem:[%s8842_s3 + $0x6b0] sm:$0xff] }
 0x215   :  { %v859_v42 = vpop.f32.mrf.mxu1  ;;  %v1562_v7 = vpop.f32.mrf.mxu0  ;;  %v6819_v57 = vld [vmem:[%s8844_s5 + $0x150] ss:$8 sps:$4 sm:$0xff]  }
 0x216   :  { %4037 = vmatpush1.bf16.msra.mxu1 %v6421_v62  ;;  %4897 = vmatpush1.bf16.msra.mxu0 %v6483_v2  ;;  %v1381_v12 = vadd.f32 %v1369_v22, %v1105_v63  ;;  %v6813_v22 = vld [vmem:[%s8844_s5 + $0x170] ss:$8 sps:$4 sm:$0xff]   ;;  %v6821_v62 = vld [vmem:[%s8844_s5 + $0x154] ss:$8 sps:$4 sm:$0xff]   ;;  %v6458_v42 = vcombine.high %v4387_v50, %v4391_v51 }
 0x217   :  { %v860_v41 = vpop.f32.mrf.mxu1  ;;  %v1563_v10 = vpop.f32.mrf.mxu0  ;;  %4225 = vmatprep.subr.bf16.mxu1 %v6446_v60  ;;  %5818 = vmatprep.subr.bf16.mxu0 %v6815_v34 }
 0x218   :  { %v6457_v10 = vcombine.low %v4387_v50, %v4391_v51  ;;  %v6831_v50 = vld [vmem:[%s8844_s5 + $0x110] ss:$8 sps:$4 sm:$0xff]   ;;  %v6833_v51 = vld [vmem:[%s8844_s5 + $0x114] ss:$8 sps:$4 sm:$0xff]  }
 0x219   :  { %v979_v58 = vpop.f32.mrf.mxu1  ;;  %v1640_v19 = vpop.f32.mrf.mxu0  ;;  %6435 = vmatmul.mubr.msk.bf16.vlgmr.msra.gmra.mxu1 %vm329_vm0, %v7945_v39  ;;  %6496 = vmatmul.mubr.msk.bf16.vlgmr.msra.gmra.mxu0 %vm329_vm0, %v8151_v36 }
 0x21a   :  { %v8188_v14 = vadd.f32 %v979_v58, %v8051_v35  ;;  %v8190_v21 = vadd.f32 %v1640_v19, %v1380_v17  ;;  %4226 = vmatpush1.bf16.msra.mxu1 %v6445_v8  ;;  %4245 = vmatprep.mubr.bf16.mxu1 %v8854_v59  ;;  %v4116_v35 = vld [vmem:[%s8842_s3 + $0x690] sm:$0xff] }
 0x21b   :  { %v981_v23 = vpop.f32.mrf.mxu1  ;;  %v1642_v24 = vpop.f32.mrf.mxu0  ;;  %4227 = vmatprep.subr.bf16.mxu1 %v6438_v29  ;;  %v6442_v25 = vcombine.high %v4116_v35, %v4120_v30  ;;  %5819 = vmatpush1.bf16.msra.mxu0 %v6813_v22  ;;  %v6441_v49 = vcombine.low %v4116_v35, %v4120_v30 }
 0x21c   :  { %v8194_v1 = vadd.f32 %v981_v23, %v8059_v48  ;;  %v8196_v39 = vadd.f32 %v1642_v24, %v1381_v12  ;;  %v4395_v48 = vld [vmem:[%s8842_s3 + $0x740] sm:$0xff]  ;;  %5820 = vmatprep.subr.bf16.mxu0 %v6818_v43  ;;  %v6825_v23 = vld [vmem:[%s8844_s5 + $0x130] ss:$8 sps:$4 sm:$0xff]   ;;  %v6827_v24 = vld [vmem:[%s8844_s5 + $0x134] ss:$8 sps:$4 sm:$0xff]  }
 0x21d   :  { %v983_v13 = vpop.f32.mrf.mxu1  ;;  %v1644_v5 = vpop.f32.mrf.mxu0  ;;  %v6466_v53 = vcombine.high %v4395_v48, %v4399_v33  ;;  %v6465_v17 = vcombine.low %v4395_v48, %v4399_v33  ;;  %v6830_v48 = vld [vmem:[%s8844_s5 + $0x124] ss:$8 sps:$4 sm:$0xff]  }
 0x21e   :  { %4228 = vmatpush1.bf16.msra.mxu1 %v6437_v9  ;;  %v4664_v43 = vld [vmem:[%s8842_s3 + $0x7a0] sm:$0xff] }
 0x21f   :  { %v984_v26 = vpop.f32.mrf.mxu1  ;;  %v1645_v3 = vpop.f32.mrf.mxu0  ;;  %4307 = vmatprep.subr.bf16.mxu1 %v6450_v0  ;;  %5821 = vmatpush1.bf16.msra.mxu0 %v6816_v38  ;;  %v4660_v38 = vld [vmem:[%s8842_s3 + $0x780] sm:$0xff] }
 0x220   :  { %5822 = vmatprep.subr.bf16.mxu0 %v6821_v62  ;;  %v6478_v62 = vcombine.high %v4660_v38, %v4664_v43 }
 0x221   :  { %v1020_v44 = vpop.f32.mrf.mxu1  ;;  %v1831_v45 = vpop.f32.mrf.mxu0  ;;  %6453 = vmatmul.mubr.msk.bf16.vlgmr.msra.gmra.mxu1 %vm329_vm0, %v8007_v18 }
 0x222   :  { %v1021_v32 = vadd.f32 %v1020_v44, %v8091_v54  ;;  %4308 = vmatpush1.bf16.msra.mxu1 %v6449_v31  ;;  %4327 = vmatprep.mubr.bf16.mxu1 %v8854_v59  ;;  %v6828_v31 = vld [vmem:[%s8844_s5 + $0x120] ss:$8 sps:$4 sm:$0xff]  }
 0x223   :  { %v1022_v52 = vpop.f32.mrf.mxu1  ;;  %v1833_v47 = vpop.f32.mrf.mxu0  ;;  %4309 = vmatprep.subr.bf16.mxu1 %v6442_v25  ;;  %5823 = vmatpush1.bf16.msra.mxu0 %v6819_v57 }
 0x224   :  { %v1376_v55 = vadd.f32 %v8093_v61, %v1021_v32  ;;  %v1023_v54 = vadd.f32 %v1022_v52, %v8099_v28  ;;  %v4397_v61 = vld [vmem:[%s8842_s3 + $0x750] sm:$0xff] }
 0x225   :  { %v1024_v2 = vpop.f32.mrf.mxu1  ;;  %v1835_v40 = vpop.f32.mrf.mxu0  ;;  %v4401_v28 = vld [vmem:[%s8842_s3 + $0x770] sm:$0xff] }
 0x226   :  { %v1649_v60 = vadd.f32 %v8159_v56, %v1376_v55  ;;  %v1377_v63 = vadd.f32 %v8101_v4, %v1023_v54  ;;  %4310 = vmatpush1.bf16.msra.mxu1 %v6441_v49  ;;  %v6822_v56 = vld [vmem:[%s8844_s5 + $0x140] ss:$8 sps:$4 sm:$0xff]   ;;  %v6824_v4 = vld [vmem:[%s8844_s5 + $0x144] ss:$8 sps:$4 sm:$0xff]   ;;  %v6470_v9 = vcombine.high %v4397_v61, %v4401_v28  ;;  %v6469_v30 = vcombine.low %v4397_v61, %v4401_v28  ;;  %v4674_v55 = vld [vmem:[%s8842_s3 + $0x7f0] sm:$0xff] }
 0x227   :  { %v1025_v37 = vpop.f32.mrf.mxu1  ;;  %v1836_v11 = vpop.f32.mrf.mxu0  ;;  %4498 = vmatprep.subr.bf16.mxu1 %v6466_v53  ;;  %5824 = vmatprep.subr.bf16.mxu0 %v6824_v4  ;;  %v6834_v2 = vld [vmem:[%s8844_s5 + $0x100] ss:$8 sps:$4 sm:$0xff]   ;;  %v6836_v40 = vld [vmem:[%s8844_s5 + $0x104] ss:$8 sps:$4 sm:$0xff]   ;;  %v6477_v28 = vcombine.low %v4660_v38, %v4664_v43 }
 0x228   :  { %v1922_v7 = vadd.f32 %v1831_v45, %v1649_v60  ;;  %v1650_v8 = vadd.f32 %v8166_v15, %v1377_v63  ;;  %v4389_v15 = vld [vmem:[%s8842_s3 + $0x710] sm:$0xff]  ;;  %5825 = vmatpush1.bf16.msra.mxu0 %v6822_v56 }
 0x229   :  { %v1061_v12 = vpop.f32.mrf.mxu1  ;;  %v1913_v41 = vpop.f32.mrf.mxu0  ;;  %6455 = vmatmul.mubr.msk.bf16.vlgmr.msra.gmra.mxu1 %vm329_vm0, %v8007_v18  ;;  %v4393_v18 = vld [vmem:[%s8842_s3 + $0x730] sm:$0xff]  ;;  %5826 = vmatprep.subr.bf16.mxu0 %v6827_v24 }
 0x22a   :  { %v1923_v29 = vadd.f32 %v1833_v47, %v1650_v8  ;;  %v8258_v20 = vadd.f32 %v1061_v12, %v8129_v27  ;;  %v8261_v16 = vadd.f32 %v1913_v41, %v8190_v21  ;;  %4499 = vmatpush1.bf16.msra.mxu1 %v6465_v17  ;;  %4518 = vmatprep.mubr.bf16.mxu1 %v8854_v59  ;;  %v4662_v37 = vld [vmem:[%s8842_s3 + $0x790] sm:$0xff] }
 0x22b   :  { %v1063_v58 = vpop.f32.mrf.mxu1  ;;  %v1915_v19 = vpop.f32.mrf.mxu0  ;;  %4500 = vmatprep.subr.bf16.mxu1 %v6458_v42  ;;  %v6462_v22 = vcombine.high %v4389_v15, %v4393_v18  ;;  %v6461_v25 = vcombine.low %v4389_v15, %v4393_v18  ;;  %v4666_v11 = vld [vmem:[%s8842_s3 + $0x7b0] sm:$0xff]  ;;  %v6840_v18 = vld [vmem:[%s8844_s5 + $0x1e0] ss:$8 sps:$4 sm:$0xff]  }
 0x22c   :  { %v8271_v27 = vadd.f32 %v1063_v58, %v8135_v6  ;;  %v8274_v21 = vadd.f32 %v1915_v19, %v8196_v39  ;;  %v4668_v6 = vld [vmem:[%s8842_s3 + $0x7c0] sm:$0xff]  ;;  %5827 = vmatpush1.bf16.msra.mxu0 %v6825_v23  ;;  %v6837_v8 = vld [vmem:[%s8844_s5 + $0x1f0] ss:$8 sps:$4 sm:$0xff]   ;;  %v6839_v12 = vld [vmem:[%s8844_s5 + $0x1f4] ss:$8 sps:$4 sm:$0xff]   ;;  %v6482_v15 = vcombine.high %v4662_v37, %v4666_v11  ;;  %v6481_v23 = vcombine.low %v4662_v37, %v4666_v11 }
 0x22d   :  { %v1065_v0 = vpop.f32.mrf.mxu1  ;;  %v1917_v35 = vpop.f32.mrf.mxu0  ;;  %v4672_v39 = vld [vmem:[%s8842_s3 + $0x7e0] sm:$0xff]  ;;  %5828 = vmatprep.subr.bf16.mxu0 %v6830_v48  ;;  %v4933_v37 = vlaneseq  ;;  %v6863_v11 = vld [vmem:[%s8844_s5 + $0x54] ss:$8 sps:$4 sm:$0xff]  }
 0x22e   :  { %4501 = vmatpush1.bf16.msra.mxu1 %v6457_v10  ;;  %v6486_v32 = vcombine.high %v4668_v6, %v4672_v39  ;;  %v6485_v53 = vcombine.low %v4668_v6, %v4672_v39  ;;  %v6842_v58 = vld [vmem:[%s8844_s5 + $0x1e4] ss:$8 sps:$4 sm:$0xff]   ;;  %v6843_v6 = vld [vmem:[%s8844_s5 + $0x1d0] ss:$8 sps:$4 sm:$0xff]   ;;  %v6845_v39 = vld [vmem:[%s8844_s5 + $0x1d4] ss:$8 sps:$4 sm:$0xff]  }
 0x22f   :  { %v1066_v13 = vpop.f32.mrf.mxu1  ;;  %v1918_v5 = vpop.f32.mrf.mxu0  ;;  %4580 = vmatprep.subr.bf16.mxu1 %v6470_v9  ;;  %v6848_v48 = vld [vmem:[%s8844_s5 + $0x1c4] ss:$8 sps:$4 sm:$0xff]  }
 0x230   :  { %5829 = vmatpush1.bf16.msra.mxu0 %v6828_v31  ;;  %v6846_v31 = vld [vmem:[%s8844_s5 + $0x1c0] ss:$8 sps:$4 sm:$0xff]  }
 0x231   :  { %v1244_v33 = vpop.f32.mrf.mxu1  ;;  %v2104_v34 = vpop.f32.mrf.mxu0  ;;  %6473 = vmatmul.mubr.msk.bf16.vlgmr.msra.gmra.mxu1 %vm329_vm0, %v8077_v46  ;;  %5830 = vmatprep.subr.bf16.mxu0 %v6833_v51 }
 0x232   :  { %v8297_v26 = vadd.f32 %v1244_v33, %v8188_v14  ;;  %v8299_v3 = vadd.f32 %v2104_v34, %v1922_v7  ;;  %4581 = vmatpush1.bf16.msra.mxu1 %v6469_v30  ;;  %4600 = vmatprep.mubr.bf16.mxu1 %v8854_v59 }
 0x233   :  { %v1246_v44 = vpop.f32.mrf.mxu1  ;;  %v2106_v45 = vpop.f32.mrf.mxu0  ;;  %4582 = vmatprep.subr.bf16.mxu1 %v6462_v22 }
 0x234   :  { %v8309_v14 = vadd.f32 %v1246_v44, %v8194_v1  ;;  %v8311_v49 = vadd.f32 %v2106_v45, %v1923_v29  ;;  %v4670_v1 = vld [vmem:[%s8842_s3 + $0x7d0] sm:$0xff]  ;;  %5831 = vmatpush1.bf16.msra.mxu0 %v6831_v50 }
 0x235   :  { %v1248_v52 = vpop.f32.mrf.mxu1  ;;  %v2108_v47 = vpop.f32.mrf.mxu0  ;;  %5832 = vmatprep.subr.bf16.mxu0 %v6836_v40  ;;  %v6489_v29 = vcombine.low %v4670_v1, %v4674_v55  ;;  %v6849_v45 = vld [vmem:[%s8844_s5 + $0x70] ss:$8 sps:$4 sm:$0xff]   ;;  %v6854_v50 = vld [vmem:[%s8844_s5 + $0x1b4] ss:$8 sps:$4 sm:$0xff]  }
 0x236   :  { %4583 = vmatpush1.bf16.msra.mxu1 %v6461_v25  ;;  %v6855_v47 = vld [vmem:[%s8844_s5 + $0x60] ss:$8 sps:$4 sm:$0xff]  }
 0x237   :  { %v1249_v54 = vpop.f32.mrf.mxu1  ;;  %v2109_v57 = vpop.f32.mrf.mxu0  ;;  %4771 = vmatprep.subr.bf16.mxu1 %v6486_v32  ;;  %v6851_v32 = vld [vmem:[%s8844_s5 + $0x74] ss:$8 sps:$4 sm:$0xff]  }
 0x238   :  { %5833 = vmatpush1.bf16.msra.mxu0 %v6834_v2 }
 0x239   :  { %v1326_v60 = vpop.f32.mrf.mxu1  ;;  %v2186_v63 = vpop.f32.mrf.mxu0  ;;  %6475 = vmatmul.mubr.msk.bf16.vlgmr.msra.gmra.mxu1 %vm329_vm0, %v8077_v46  ;;  %v6490_v46 = vcombine.high %v4670_v1, %v4674_v55  ;;  %5834 = vmatprep.subr.bf16.mxu0 %v6839_v12  ;;  %v6858_v1 = vld [vmem:[%s8844_s5 + $0x1a0] ss:$8 sps:$4 sm:$0xff]   ;;  %v6860_v55 = vld [vmem:[%s8844_s5 + $0x1a4] ss:$8 sps:$4 sm:$0xff]  }
 0x23a   :  { %v1378_v17 = vadd.f32 %v1326_v60, %v8258_v20  ;;  %v2199_v61 = vadd.f32 %v2186_v63, %v8261_v16  ;;  %4772 = vmatpush1.bf16.msra.mxu1 %v6485_v53  ;;  %4791 = vmatprep.mubr.bf16.mxu1 %v8854_v59  ;;  %v6857_v53 = vld [vmem:[%s8844_s5 + $0x64] ss:$8 sps:$4 sm:$0xff]  }
 0x23b   :  { %v1328_v42 = vpop.f32.mrf.mxu1  ;;  %v2188_v56 = vpop.f32.mrf.mxu0  ;;  %4773 = vmatprep.subr.bf16.mxu1 %v6478_v62 }
 0x23c   :  { %v1379_v4 = vadd.f32 %v1328_v42, %v8271_v27  ;;  %v2200_v7 = vadd.f32 %v2188_v56, %v8274_v21  ;;  %5835 = vmatpush2.bf16.msra.mxu0 %v6837_v8  ;;  %v6866_v42 = vld [vmem:[%s8844_s5 + $0x194] ss:$8 sps:$4 sm:$0xff]  }
 0x23d   :  { %v1330_v41 = vpop.f32.mrf.mxu1  ;;  %v2190_v10 = vpop.f32.mrf.mxu0  ;;  %5836 = vmatprep.subr.bf16.mxu0 %v6842_v58 }
 0x23e   :  { %4774 = vmatpush1.bf16.msra.mxu1 %v6477_v28  ;;  %v8413_v41 = vshrl.u32 %v4933_v37, 7 }
 0x23f   :  { %v1331_v20 = vpop.f32.mrf.mxu1  ;;  %v2191_v16 = vpop.f32.mrf.mxu0  ;;  %4853 = vmatprep.subr.bf16.mxu1 %v6490_v46 }
 0x240   :  { %5837 = vmatpush2.bf16.msra.mxu0 %v6840_v18  ;;  %v6867_v20 = vld [vmem:[%s8844_s5 + $0x40] ss:$8 sps:$4 sm:$0xff]   ;;  %v6869_v16 = vld [vmem:[%s8844_s5 + $0x44] ss:$8 sps:$4 sm:$0xff]  }
 0x241   :  { %v1517_v19 = vpop.f32.mrf.mxu1  ;;  %v2377_v9 = vpop.f32.mrf.mxu0  ;;  %6493 = vmatmul.mubr.msk.bf16.vlgmr.msra.gmra.mxu1 %vm329_vm0, %v8151_v36  ;;  %5838 = vmatprep.subr.bf16.mxu0 %v6845_v39 }
 0x242   :  { %v1647_v27 = vadd.f32 %v1517_v19, %v8297_v26  ;;  %v2468_v21 = vadd.f32 %v2377_v9, %v8299_v3  ;;  %4854 = vmatpush1.bf16.msra.mxu1 %v6489_v29  ;;  %4873 = vmatprep.mubr.bf16.mxu1 %v8854_v59  ;;  %v6872_v19 = vld [vmem:[%s8844_s5 + $0x184] ss:$8 sps:$4 sm:$0xff]   ;;  %v4959_v9 = vsub.s32 6, %v8413_v41 }
 0x243   :  { %v1519_v24 = vpop.f32.mrf.mxu1  ;;  %v2379_v0 = vpop.f32.mrf.mxu0  ;;  %4855 = vmatprep.subr.bf16.mxu1 %v6482_v15  ;;  %v6870_v15 = vld [vmem:[%s8844_s5 + $0x180] ss:$8 sps:$4 sm:$0xff]  }
 0x244   :  { %v1648_v35 = vadd.f32 %v1519_v24, %v8309_v14  ;;  %v2469_v30 = vadd.f32 %v2379_v0, %v8311_v49  ;;  %5839 = vmatpush2.bf16.msra.mxu0 %v6843_v6  ;;  %v6878_v6 = vld [vmem:[%s8844_s5 + $0x374] ss:$8 sps:$4 sm:$0xff]  }
 0x245   :  { %v1521_v13 = vpop.f32.mrf.mxu1  ;;  %v2381_v5 = vpop.f32.mrf.mxu0  ;;  %5840 = vmatprep.subr.bf16.mxu0 %v6848_v48 }
 0x246   :  { %4856 = vmatpush1.bf16.msra.mxu1 %v6481_v23  ;;  %v8431_v23 = vld [vmem:[%s8845_s4] sm:$0xff]  ;;  %v6873_v5 = vld [vmem:[%s8844_s5 + $0x30] ss:$8 sps:$4 sm:$0xff]  }
 0x247   :  { %v1522_v59 = vpop.f32.mrf.mxu1  ;;  %v2382_v22 = vpop.f32.mrf.mxu0  ;;  %5777 = vmatprep.subr.bf16.mxu1 %v6851_v32  ;;  %v6885_v32 = vld [vmem:[%s8844_s5 + $0x10] ss:$8 sps:$4 sm:$0xff]  }
 0x248   :  { %5841 = vmatpush2.bf16.msra.mxu0 %v6846_v31 }
 0x249   :  { %v1599_v33 = vpop.f32.mrf.mxu1  ;;  %v2459_v34 = vpop.f32.mrf.mxu0  ;;  %6495 = vmatmul.mubr.msk.bf16.vlgmr.msra.gmra.mxu1 %vm329_vm0, %v8151_v36  ;;  %v6852_v36 = vld [vmem:[%s8844_s5 + $0x1b0] ss:$8 sps:$4 sm:$0xff]   ;;  %5842 = vmatprep.subr.bf16.mxu0 %v6854_v50 }
 0x24a   :  { %v1651_v26 = vadd.f32 %v1599_v33, %v1378_v17  ;;  %v2472_v3 = vadd.f32 %v2459_v34, %v2199_v61  ;;  %5778 = vmatpush1.bf16.msra.mxu1 %v6849_v45  ;;  %v6879_v33 = vld [vmem:[%s8844_s5 + $0x20] ss:$8 sps:$4 sm:$0xff]   ;;  %v6881_v34 = vld [vmem:[%s8844_s5 + $0x24] ss:$8 sps:$4 sm:$0xff]  }
 0x24b   :  { %v1601_v25 = vpop.f32.mrf.mxu1  ;;  %v2461_v38 = vpop.f32.mrf.mxu0  ;;  %5779 = vmatprep.subr.bf16.mxu1 %v6857_v53 }
 0x24c   :  { %v1652_v43 = vadd.f32 %v1601_v25, %v1379_v4  ;;  %v2473_v44 = vadd.f32 %v2461_v38, %v2200_v7  ;;  %5843 = vmatpush2.bf16.msra.mxu0 %v6852_v36  ;;  %v6861_v4 = vld [vmem:[%s8844_s5 + $0x50] ss:$8 sps:$4 sm:$0xff]  }
 0x24d   :  { %v1603_v14 = vpop.f32.mrf.mxu1  ;;  %v2463_v49 = vpop.f32.mrf.mxu0  ;;  %5844 = vmatprep.subr.bf16.mxu0 %v6860_v55  ;;  %v6864_v7 = vld [vmem:[%s8844_s5 + $0x190] ss:$8 sps:$4 sm:$0xff]  }
 0x24e   :  { %5780 = vmatpush1.bf16.msra.mxu1 %v6855_v47  ;;  %v6893_v49 = vld [vmem:[%s8844_s5 + $0x4] ss:$8 sps:$4 sm:$0xff]  }
 0x24f   :  { %v1604_v51 = vpop.f32.mrf.mxu1  ;;  %v2464_v52 = vpop.f32.mrf.mxu0  ;;  %5781 = vmatprep.subr.bf16.mxu1 %v6863_v11  ;;  %v6903_v11 = vld [vmem:[%s8844_s5 + $0xe0] ss:$8 sps:$4 sm:$0xff]  }
 0x250   :  { %5845 = vmatpush2.bf16.msra.mxu0 %v6858_v1  ;;  %v6891_v52 = vld [vmem:[%s8844_s5] ss:$8 sps:$4 sm:$0xff]  }
 0x251   :  { %v1790_v54 = vpop.f32.mrf.mxu1  ;;  %v2650_v57 = vpop.f32.mrf.mxu0  ;;  %5846 = vmatprep.subr.bf16.mxu0 %v6866_v42 }
 0x252   :  { %v1920_v62 = vadd.f32 %v1790_v54, %v1647_v27  ;;  %v2741_v2 = vadd.f32 %v2650_v57, %v2468_v21  ;;  %5782 = vmatpush1.bf16.msra.mxu1 %v6861_v4 }
 0x253   :  { %v1792_v40 = vpop.f32.mrf.mxu1  ;;  %v2652_v60 = vpop.f32.mrf.mxu0  ;;  %5783 = vmatprep.subr.bf16.mxu1 %v6869_v16 }
 0x254   :  { %v1921_v63 = vadd.f32 %v1792_v40, %v1648_v35  ;;  %v2742_v17 = vadd.f32 %v2652_v60, %v2469_v30  ;;  %5847 = vmatpush2.bf16.msra.mxu0 %v6864_v7  ;;  %v8434_v35 = vrot.slane %v8431_v23, %v4959_v9  ;;  %v6875_v30 = vld [vmem:[%s8844_s5 + $0x34] ss:$8 sps:$4 sm:$0xff]   ;;  %v6897_v60 = vld [vmem:[%s8844_s5 + $0xf0] ss:$8 sps:$4 sm:$0xff]   ;;  %v6915_v9 = vld [vmem:[%s8844_s5 + $0xc0] ss:$8 sps:$4 sm:$0xff]  }
 0x255   :  { %v1794_v61 = vpop.f32.mrf.mxu1  ;;  %v2654_v28 = vpop.f32.mrf.mxu0  ;;  %5848 = vmatprep.subr.bf16.mxu0 %v6872_v19 }
 0x256   :  { %5784 = vmatpush1.bf16.msra.mxu1 %v6867_v20  ;;  %v6905_v61 = vld [vmem:[%s8844_s5 + $0xe4] ss:$8 sps:$4 sm:$0xff]   ;;  %v6909_v20 = vld [vmem:[%s8844_s5 + $0xd0] ss:$8 sps:$4 sm:$0xff]  }
 0x257   :  { %v1795_v56 = vpop.f32.mrf.mxu1  ;;  %v2655_v46 = vpop.f32.mrf.mxu0  ;;  %5785 = vmatprep.subr.bf16.mxu1 %v6875_v30 }
 0x258   :  { %5849 = vmatpush2.bf16.msra.mxu0 %v6870_v15 }
 0x259   :  { %v1872_v8 = vpop.f32.mrf.mxu1  ;;  %v2732_v12 = vpop.f32.mrf.mxu0  ;;  %5900 = vmatprep.subr.bf16.mxu0 %v6878_v6 }
 0x25a   :  { %v1924_v10 = vadd.f32 %v1872_v8, %v1651_v26  ;;  %v2745_v29 = vadd.f32 %v2732_v12, %v2472_v3  ;;  %5786 = vmatpush1.bf16.msra.mxu1 %v6873_v5  ;;  %v6911_v12 = vld [vmem:[%s8844_s5 + $0xd4] ss:$8 sps:$4 sm:$0xff]  }
 0x25b   :  { %v1874_v18 = vpop.f32.mrf.mxu1  ;;  %v2734_v58 = vpop.f32.mrf.mxu0  ;;  %5787 = vmatprep.subr.bf16.mxu1 %v6881_v34 }
 0x25c   :  { %v1925_v27 = vadd.f32 %v1874_v18, %v1652_v43  ;;  %v2746_v21 = vadd.f32 %v2734_v58, %v2473_v44  ;;  %v6887_v43 = vld [vmem:[%s8844_s5 + $0x14] ss:$8 sps:$4 sm:$0xff]   ;;  %v6917_v18 = vld [vmem:[%s8844_s5 + $0xc4] ss:$8 sps:$4 sm:$0xff]  }
 0x25d   :  { %v1876_v24 = vpop.f32.mrf.mxu1  ;;  %v2736_v0 = vpop.f32.mrf.mxu0 }
 0x25e   :  { %5788 = vmatpush1.bf16.msra.mxu1 %v6879_v33 }
 0x25f   :  { %v1877_v39 = vpop.f32.mrf.mxu1  ;;  %v2737_v13 = vpop.f32.mrf.mxu0  ;;  %5789 = vmatprep.subr.bf16.mxu1 %v6887_v43 }
 0x260   :  { %v6923_v39 = vld [vmem:[%s8844_s5 + $0xb4] ss:$8 sps:$4 sm:$0xff]  }
 0x261   :  { %v2063_v59 = vpop.f32.mrf.mxu1  ;;  %v2923_v22 = vpop.f32.mrf.mxu0 }
 0x262   :  { %v2193_v31 = vadd.f32 %v2063_v59, %v1920_v62  ;;  %v3014_v48 = vadd.f32 %v2923_v22, %v2741_v2  ;;  %5790 = vmatpush1.bf16.msra.mxu1 %v6885_v32  ;;  %v6899_v62 = vld [vmem:[%s8844_s5 + $0xf4] ss:$8 sps:$4 sm:$0xff]   ;;  %v6921_v59 = vld [vmem:[%s8844_s5 + $0xb0] ss:$8 sps:$4 sm:$0xff]  }
 0x263   :  { %v2065_v26 = vpop.f32.mrf.mxu1  ;;  %v2925_v3 = vpop.f32.mrf.mxu0  ;;  %5791 = vmatprep.subr.bf16.mxu1 %v6893_v49 }
 0x264   :  { %v2194_v25 = vadd.f32 %v2065_v26, %v1921_v63  ;;  %v3015_v38 = vadd.f32 %v2925_v3, %v2742_v17  ;;  %v6927_v26 = vld [vmem:[%s8844_s5 + $0xa0] ss:$8 sps:$4 sm:$0xff]  }
 0x265   :  { %v2067_v44 = vpop.f32.mrf.mxu1  ;;  %v2927_v45 = vpop.f32.mrf.mxu0 }
 0x266   :  { %5792 = vmatpush1.bf16.msra.mxu1 %v6891_v52 }
 0x267   :  { %v2068_v36 = vpop.f32.mrf.mxu1  ;;  %v2928_v14 = vpop.f32.mrf.mxu0  ;;  %5793 = vmatprep.subr.bf16.mxu1 %v6899_v62 }
 0x268   :  { %v6935_v14 = vld [vmem:[%s8844_s5 + $0x94] ss:$8 sps:$4 sm:$0xff]  }
 0x269   :  { %v2145_v50 = vpop.f32.mrf.mxu1  ;;  %v3005_v51 = vpop.f32.mrf.mxu0 }
 0x26a   :  { %v2197_v47 = vadd.f32 %v2145_v50, %v1924_v10  ;;  %v3018_v53 = vadd.f32 %v3005_v51, %v2745_v29  ;;  %5794 = vmatpush2.bf16.msra.mxu1 %v6897_v60  ;;  %v6933_v51 = vld [vmem:[%s8844_s5 + $0x90] ss:$8 sps:$4 sm:$0xff]  }
 0x26b   :  { %v2147_v1 = vpop.f32.mrf.mxu1  ;;  %v3007_v55 = vpop.f32.mrf.mxu0  ;;  %5795 = vmatprep.subr.bf16.mxu1 %v6905_v61 }
 0x26c   :  { %v2198_v54 = vadd.f32 %v2147_v1, %v1925_v27  ;;  %v3019_v57 = vadd.f32 %v3007_v55, %v2746_v21  ;;  %v6939_v55 = vld [vmem:[%s8844_s5 + $0x80] ss:$8 sps:$4 sm:$0xff]  }
 0x26d   :  { %v2149_v2 = vpop.f32.mrf.mxu1  ;;  %v3009_v40 = vpop.f32.mrf.mxu0 }
 0x26e   :  { %5796 = vmatpush2.bf16.msra.mxu1 %v6903_v11  ;;  %v4951_v2 = vsub.s32 4, %v8413_v41 }
 0x26f   :  { %v2150_v63 = vpop.f32.mrf.mxu1  ;;  %v3010_v17 = vpop.f32.mrf.mxu0  ;;  %5797 = vmatprep.subr.bf16.mxu1 %v6911_v12 }
 0x270   :  { %v8519_v61 = vrot.slane %v8431_v23, %v4951_v2 }
 0x271   :  { %v2336_v28 = vpop.f32.mrf.mxu1  ;;  %v3196_v37 = vpop.f32.mrf.mxu0 }
 0x272   :  { %v2466_v42 = vadd.f32 %v2336_v28, %v2193_v31  ;;  %v3287_v56 = vadd.f32 %v3196_v37, %v3014_v48  ;;  %5798 = vmatpush2.bf16.msra.mxu1 %v6909_v20  ;;  %v6929_v48 = vld [vmem:[%s8844_s5 + $0xa4] ss:$8 sps:$4 sm:$0xff]   ;;  %v6947_v28 = vld [vmem:[%s8844_s5 + $0x274] ss:$8 sps:$4 sm:$0xff]  }
 0x273   :  { %v2338_v46 = vpop.f32.mrf.mxu1  ;;  %v3198_v4 = vpop.f32.mrf.mxu0  ;;  %5799 = vmatprep.subr.bf16.mxu1 %v6917_v18 }
 0x274   :  { %v2467_v7 = vadd.f32 %v2338_v46, %v2194_v25  ;;  %v3288_v8 = vadd.f32 %v3198_v4, %v3015_v38 }
 0x275   :  { %v2340_v10 = vpop.f32.mrf.mxu1  ;;  %v3200_v29 = vpop.f32.mrf.mxu0 }
 0x276   :  { %5800 = vmatpush2.bf16.msra.mxu1 %v6915_v9 }
 0x277   :  { %v2341_v16 = vpop.f32.mrf.mxu1  ;;  %v3201_v15 = vpop.f32.mrf.mxu0  ;;  %5801 = vmatprep.subr.bf16.mxu1 %v6923_v39 }
 0x279   :  { %v2418_v58 = vpop.f32.mrf.mxu1  ;;  %v3278_v19 = vpop.f32.mrf.mxu0 }
 0x27a   :  { %v2470_v27 = vadd.f32 %v2418_v58, %v2197_v47  ;;  %v3291_v21 = vadd.f32 %v3278_v19, %v3018_v53  ;;  %5802 = vmatpush2.bf16.msra.mxu1 %v6921_v59 }
 0x27b   :  { %v2420_v24 = vpop.f32.mrf.mxu1  ;;  %v3280_v0 = vpop.f32.mrf.mxu0  ;;  %5803 = vmatprep.subr.bf16.mxu1 %v6929_v48 }
 0x27c   :  { %v2471_v30 = vadd.f32 %v2420_v24, %v2198_v54  ;;  %v3292_v6 = vadd.f32 %v3280_v0, %v3019_v57  ;;  %v6941_v54 = vld [vmem:[%s8844_s5 + $0x84] ss:$8 sps:$4 sm:$0xff]  }
 0x27d   :  { %v2422_v13 = vpop.f32.mrf.mxu1  ;;  %v3282_v5 = vpop.f32.mrf.mxu0 }
 0x27e   :  { %5804 = vmatpush2.bf16.msra.mxu1 %v6927_v26 }
 0x27f   :  { %v2423_v22 = vpop.f32.mrf.mxu1  ;;  %v3283_v31 = vpop.f32.mrf.mxu0  ;;  %5805 = vmatprep.subr.bf16.mxu1 %v6935_v14 }
 0x281   :  { %v2609_v33 = vpop.f32.mrf.mxu1  ;;  %v3469_v34 = vpop.f32.mrf.mxu0 }
 0x282   :  { %v2739_v3 = vadd.f32 %v2609_v33, %v2466_v42  ;;  %v8499_v25 = vadd.f32 %v3469_v34, %v3287_v56  ;;  %5806 = vmatpush2.bf16.msra.mxu1 %v6933_v51 }
 0x283   :  { %v2611_v38 = vpop.f32.mrf.mxu1  ;;  %v3471_v43 = vpop.f32.mrf.mxu0  ;;  %5807 = vmatprep.subr.bf16.mxu1 %v6941_v54 }
 0x284   :  { %v2740_v44 = vadd.f32 %v2611_v38, %v2467_v7  ;;  %v8501_v45 = vadd.f32 %v3471_v43, %v3288_v8 }
 0x285   :  { %v2613_v32 = vpop.f32.mrf.mxu1  ;;  %v3473_v36 = vpop.f32.mrf.mxu0 }
 0x286   :  { %5808 = vmatpush2.bf16.msra.mxu1 %v6939_v55 }
 0x287   :  { %v2614_v49 = vpop.f32.mrf.mxu1  ;;  %v3474_v50 = vpop.f32.mrf.mxu0  ;;  %5859 = vmatprep.subr.bf16.mxu1 %v6947_v28 }
 0x289   :  { %v2691_v52 = vpop.f32.mrf.mxu1  ;;  %v3551_v47 = vpop.f32.mrf.mxu0 }
 0x28a   :  { %v2743_v53 = vadd.f32 %v2691_v52, %v2470_v27  ;;  %v3564_v1 = vadd.f32 %v3551_v47, %v3291_v21 }
 0x28b   :  { %v2693_v57 = vpop.f32.mrf.mxu1  ;;  %v3553_v62 = vpop.f32.mrf.mxu0 }
 0x28c   :  { %v2744_v40 = vadd.f32 %v2693_v57, %v2471_v30  ;;  %v8516_v60 = vadd.f32 %v3553_v62, %v3292_v6 }
 0x28d   :  { %v2695_v63 = vpop.f32.mrf.mxu1  ;;  %v3555_v17 = vpop.f32.mrf.mxu0 }
 0x28f   :  { %v2696_v37 = vpop.f32.mrf.mxu1  ;;  %v3556_v11 = vpop.f32.mrf.mxu0 }
 0x291   :  { %v2882_v42 = vpop.f32.mrf.mxu1  ;;  %v8524_v56 = vpop.f32.mrf.mxu0 }
 0x292   :  { %v3012_v46 = vadd.f32 %v2882_v42, %v2739_v3 }
 0x293   :  { %v2884_v4 = vpop.f32.mrf.mxu1  ;;  %v8526_v7 = vpop.f32.mrf.mxu0 }
 0x294   :  { %v3013_v8 = vadd.f32 %v2884_v4, %v2740_v44 }
 0x295   :  { %v2886_v12 = vpop.f32.mrf.mxu1  ;;  %v3746_v10 = vpop.f32.mrf.mxu0 }
 0x297   :  { %v2887_v29 = vpop.f32.mrf.mxu1  ;;  %v3747_v20 = vpop.f32.mrf.mxu0 }
 0x299   :  { %v2964_v16 = vpop.f32.mrf.mxu1  ;;  %v3824_v15 = vpop.f32.mrf.mxu0 }
 0x29a   :  { %v3016_v18 = vadd.f32 %v2964_v16, %v2743_v53  ;;  %v3837_v58 = vadd.f32 %v3824_v15, %v3564_v1 }
 0x29b   :  { %v2966_v19 = vpop.f32.mrf.mxu1  ;;  %v8528_v9 = vpop.f32.mrf.mxu0 }
 0x29c   :  { %v3017_v27 = vadd.f32 %v2966_v19, %v2744_v40 }
 0x29d   :  { %v2968_v21 = vpop.f32.mrf.mxu1  ;;  %v3828_v24 = vpop.f32.mrf.mxu0 }
 0x29f   :  { %v2969_v0 = vpop.f32.mrf.mxu1  ;;  %v3829_v30 = vpop.f32.mrf.mxu0 }
 0x2a0   :  { %v3833_v0 = vadd.f32 %v8524_v56, %v8499_v25 }
 0x2a1   :  { %v3155_v6 = vpop.f32.mrf.mxu1  ;;  %v4015_v39 = vpop.f32.mrf.mxu0 }
 0x2a2   :  { %v3285_v13 = vadd.f32 %v3155_v6, %v3012_v46 }
 0x2a3   :  { %v3157_v5 = vpop.f32.mrf.mxu1  ;;  %v4017_v59 = vpop.f32.mrf.mxu0 }
 0x2a4   :  { %v3286_v22 = vadd.f32 %v3157_v5, %v3013_v8 }
 0x2a5   :  { %v3159_v31 = vpop.f32.mrf.mxu1  ;;  %v4019_v48 = vpop.f32.mrf.mxu0 }
 0x2a6   :  { %v4106_v31 = vadd.f32 %v4015_v39, %v3833_v0  ;;  %v4943_v48 = vsub.s32 2, %v8413_v41  ;;  %v6882_v0 = vld [vmem:[%s8844_s5 + $0x360] ss:$8 sps:$4 sm:$0xff]  }
 0x2a7   :  { %v3160_v33 = vpop.f32.mrf.mxu1  ;;  %v4020_v34 = vpop.f32.mrf.mxu0 }
 0x2a9   :  { %v3237_v26 = vpop.f32.mrf.mxu1  ;;  %v4097_v3 = vpop.f32.mrf.mxu0 }
 0x2aa   :  { %v3289_v38 = vadd.f32 %v3237_v26, %v3016_v18  ;;  %v4110_v43 = vadd.f32 %v4097_v3, %v3837_v58 }
 0x2ab   :  { %v3239_v44 = vpop.f32.mrf.mxu1  ;;  %v8530_v32 = vpop.f32.mrf.mxu0 }
 0x2ac   :  { %v3290_v36 = vadd.f32 %v3239_v44, %v3017_v27 }
 0x2ad   :  { %v3241_v14 = vpop.f32.mrf.mxu1  ;;  %v4101_v49 = vpop.f32.mrf.mxu0 }
 0x2af   :  { %v3242_v50 = vpop.f32.mrf.mxu1  ;;  %v4102_v51 = vpop.f32.mrf.mxu0 }
 0x2b1   :  { %v3428_v52 = vpop.f32.mrf.mxu1  ;;  %v4288_v47 = vpop.f32.mrf.mxu0 }
 0x2b2   :  { %v8532_v53 = vadd.f32 %v3428_v52, %v3285_v13  ;;  %v4379_v3 = vadd.f32 %v4288_v47, %v4106_v31 }
 0x2b3   :  { %v3430_v1 = vpop.f32.mrf.mxu1  ;;  %v4290_v55 = vpop.f32.mrf.mxu0 }
 0x2b4   :  { %v8534_v54 = vadd.f32 %v3430_v1, %v3286_v22  ;;  %v3834_v22 = vadd.f32 %v8526_v7, %v8501_v45 }
 0x2b5   :  { %v3432_v57 = vpop.f32.mrf.mxu1  ;;  %v4292_v62 = vpop.f32.mrf.mxu0 }
 0x2b6   :  { %v4107_v26 = vadd.f32 %v4017_v59, %v3834_v22  ;;  %v3838_v59 = vadd.f32 %v8528_v9, %v8516_v60  ;;  %v4963_v57 = vsub.s32 7, %v8413_v41 }
 0x2b7   :  { %v3433_v2 = vpop.f32.mrf.mxu1  ;;  %v4293_v40 = vpop.f32.mrf.mxu0 }
 0x2b8   :  { %v4380_v25 = vadd.f32 %v4290_v55, %v4107_v26  ;;  %v4111_v62 = vadd.f32 %v8530_v32, %v3838_v59 }
 0x2b9   :  { %v3510_v63 = vpop.f32.mrf.mxu1  ;;  %v4370_v17 = vpop.f32.mrf.mxu0 }
 0x2ba   :  { %v3562_v28 = vadd.f32 %v3510_v63, %v3289_v38  ;;  %v4383_v37 = vadd.f32 %v4370_v17, %v4110_v43  ;;  %v4947_v38 = vsub.s32 3, %v8413_v41 }
 0x2bb   :  { %v3512_v11 = vpop.f32.mrf.mxu1  ;;  %v4372_v42 = vpop.f32.mrf.mxu0 }
 0x2bc   :  { %v8536_v46 = vadd.f32 %v3512_v11, %v3290_v36  ;;  %v4944_v36 = vrot.slane %v8431_v23, %v4943_v48  ;;  %v4948_v7 = vrot.slane %v8431_v23, %v4947_v38  ;;  %v6888_v48 = vld [vmem:[%s8844_s5 + $0x350] ss:$8 sps:$4 sm:$0xff]  }
 0x2bd   :  { %v3514_v4 = vpop.f32.mrf.mxu1  ;;  %v4374_v8 = vpop.f32.mrf.mxu0 }
 0x2be   :  { %v4964_v8 = vrot.slane %v8431_v23, %v4963_v57  ;;  %v6918_v57 = vld [vmem:[%s8844_s5 + $0x300] ss:$8 sps:$4 sm:$0xff]  }
 0x2bf   :  { %v3515_v12 = vpop.f32.mrf.mxu1  ;;  %v4375_v10 = vpop.f32.mrf.mxu0 }
 0x2c1   :  { %v8538_v29 = vpop.f32.mrf.mxu1  ;;  %v4561_v20 = vpop.f32.mrf.mxu0 }
 0x2c2   :  { %v4652_v56 = vadd.f32 %v4561_v20, %v4379_v3  ;;  %v6876_v20 = vld [vmem:[%s8844_s5 + $0x370] ss:$8 sps:$4 sm:$0xff]   ;;  %v6894_v3 = vld [vmem:[%s8844_s5 + $0x340] ss:$8 sps:$4 sm:$0xff]  }
 0x2c3   :  { %v8540_v16 = vpop.f32.mrf.mxu1  ;;  %v4563_v15 = vpop.f32.mrf.mxu0 }
 0x2c4   :  { %v4653_v50 = vadd.f32 %v4563_v15, %v4380_v25 }
 0x2c5   :  { %v3705_v18 = vpop.f32.mrf.mxu1  ;;  %v4565_v58 = vpop.f32.mrf.mxu0 }
 0x2c7   :  { %v3706_v19 = vpop.f32.mrf.mxu1  ;;  %v4566_v27 = vpop.f32.mrf.mxu0 }
 0x2c9   :  { %v3783_v21 = vpop.f32.mrf.mxu1  ;;  %v4643_v24 = vpop.f32.mrf.mxu0 }
 0x2ca   :  { %v3835_v30 = vadd.f32 %v3783_v21, %v3562_v28  ;;  %v4656_v6 = vadd.f32 %v4643_v24, %v4383_v37  ;;  %v4384_v28 = vadd.f32 %v4372_v42, %v4111_v62  ;;  %v6884_v42 = vld [vmem:[%s8844_s5 + $0x364] ss:$8 sps:$4 sm:$0xff]  }
 0x2cb   :  { %v8544_v13 = vpop.f32.mrf.mxu1  ;;  %v4645_v5 = vpop.f32.mrf.mxu0 }
 0x2cc   :  { %v4657_v12 = vadd.f32 %v4645_v5, %v4384_v28  ;;  %v6890_v5 = vld [vmem:[%s8844_s5 + $0x354] ss:$8 sps:$4 sm:$0xff]   ;;  %v6924_v28 = vld [vmem:[%s8844_s5 + $0x3f0] ss:$8 sps:$4 sm:$0xff]  }
 0x2cd   :  { %v3787_v33 = vpop.f32.mrf.mxu1  ;;  %v4647_v34 = vpop.f32.mrf.mxu0 }
 0x2ce   :  { %v6896_v34 = vld [vmem:[%s8844_s5 + $0x344] ss:$8 sps:$4 sm:$0xff]  }
 0x2cf   :  { %v3788_v43 = vpop.f32.mrf.mxu1  ;;  %v4648_v44 = vpop.f32.mrf.mxu0 }
 0x2d0   :  { %v6902_v43 = vld [vmem:[%s8844_s5 + $0x334] ss:$8 sps:$4 sm:$0xff]  }
 0x2d1   :  { %v8551_v14 = vpop.f32.mrf.mxu1  ;;  %v4834_v49 = vpop.f32.mrf.mxu0 }
 0x2d2   :  { %v4925_v45 = vadd.f32 %v4834_v49, %v4652_v56  ;;  %v6900_v56 = vld [vmem:[%s8844_s5 + $0x330] ss:$8 sps:$4 sm:$0xff]   ;;  %v6908_v49 = vld [vmem:[%s8844_s5 + $0x324] ss:$8 sps:$4 sm:$0xff]  }
 0x2d3   :  { %v8554_v39 = vpop.f32.mrf.mxu1  ;;  %v4836_v51 = vpop.f32.mrf.mxu0 }
 0x2d4   :  { %v4975_v52 = vadd.f32 %v4944_v36, %v4925_v45  ;;  %v4926_v47 = vadd.f32 %v4836_v51, %v4653_v50  ;;  %v6906_v45 = vld [vmem:[%s8844_s5 + $0x320] ss:$8 sps:$4 sm:$0xff]   ;;  %v6914_v51 = vld [vmem:[%s8844_s5 + $0x314] ss:$8 sps:$4 sm:$0xff]  }
 0x2d5   :  { %v3978_v1 = vpop.f32.mrf.mxu1  ;;  %v4838_v55 = vpop.f32.mrf.mxu0 }
 0x2d6   :  { %v4976_v2 = vadd.f32 %v4948_v7, %v4926_v47  ;;  %v4983_v40 = vmax.f32 %v4975_v52, 0.0  ;;  %v6912_v52 = vld [vmem:[%s8844_s5 + $0x310] ss:$8 sps:$4 sm:$0xff]   ;;  %v6920_v1 = vld [vmem:[%s8844_s5 + $0x304] ss:$8 sps:$4 sm:$0xff]  }
 0x2d7   :  { %v3979_v63 = vpop.f32.mrf.mxu1  ;;  %v4839_v17 = vpop.f32.mrf.mxu0 }
 0x2d8   :  { %v4984_v37 = vmax.f32 %v4976_v2, 0.0  ;;  %v4991_v15 = vpack.c.bf16 %v4983_v40, %v4983_v40  ;;  %v6926_v2 = vld [vmem:[%s8844_s5 + $0x3f4] ss:$8 sps:$4 sm:$0xff]   ;;  %v3831_v63 = vadd.f32 %v8538_v29, %v8532_v53 }
 0x2d9   :  { %v4056_v11 = vpop.f32.mrf.mxu1  ;;  %v4916_v4 = vpop.f32.mrf.mxu0 }
 0x2da   :  { %v4992_v60 = vpack.c.bf16 %v4984_v37, %v4984_v37  ;;  %v4108_v9 = vadd.f32 %v4056_v11, %v3835_v30  ;;  %v4929_v10 = vadd.f32 %v4916_v4, %v4656_v6  ;;  %v6932_v11 = vld [vmem:[%s8844_s5 + $0x3e4] ss:$8 sps:$4 sm:$0xff]   ;;  %v3832_v4 = vadd.f32 %v8540_v16, %v8534_v54  ;;  %v6938_v54 = vld [vmem:[%s8844_s5 + $0x3d4] ss:$8 sps:$4 sm:$0xff]  }
 0x2db   :  { %v8564_v32 = vpop.f32.mrf.mxu1  ;;  %v4918_v18 = vpop.f32.mrf.mxu0 }
 0x2dc   :  { %v8570_v58 = vadd.f32 %v8434_v35, %v4929_v10  ;;  %v4930_v19 = vadd.f32 %v4918_v18, %v4657_v12  ;;  %5850 = vmatprep.mubr.bf16.mxu0 %v4992_v60  ;;  %v4935_v12 = vsub.s32 0, %v8413_v41  ;;  %v4105_v29 = vadd.f32 %v8554_v39, %v3832_v4  ;;  %v6971_v4 = vld [vmem:[%s8844_s5 + $0x234] ss:$8 sps:$4 sm:$0xff]  }
 0x2dd   :  { %v4060_v27 = vpop.f32.mrf.mxu1  ;;  %v4920_v21 = vpop.f32.mrf.mxu0  ;;  %5851 = vmatmul.mubr.bf16.vlgmr.msra.gmra.mxu0 %v4991_v15  ;;  %v4939_v10 = vsub.s32 1, %v8413_v41 }
 0x2de   :  { %v4980_v24 = vadd.f32 %v4964_v8, %v4930_v19  ;;  %5901 = vmatpush1.bf16.msra.mxu0 %v6876_v20  ;;  %v4104_v8 = vadd.f32 %v8551_v14, %v3831_v63  ;;  %v4936_v39 = vrot.slane %v8431_v23, %v4935_v12  ;;  %v6936_v27 = vld [vmem:[%s8844_s5 + $0x3d0] ss:$8 sps:$4 sm:$0xff]   ;;  %v6965_v63 = vld [vmem:[%s8844_s5 + $0x244] ss:$8 sps:$4 sm:$0xff]  }
 0x2df   :  { %v4061_v30 = vpop.f32.mrf.mxu1  ;;  %v4921_v6 = vpop.f32.mrf.mxu0  ;;  %5902 = vmatprep.subr.bf16.mxu0 %v6884_v42  ;;  %v4940_v19 = vrot.slane %v8431_v23, %v4939_v10 }
 0x2e0   :  { %v4988_v35 = vmax.f32 %v4980_v24, 0.0  ;;  %v6944_v24 = vld [vmem:[%s8844_s5 + $0x3c4] ss:$8 sps:$4 sm:$0xff]  }
 0x2e1   :  { %v4247_v22 = vpop.f32.mrf.mxu1 }
 0x2e2   :  { %v4996_v31 = vpack.c.bf16 %v4988_v35, %v4988_v35  ;;  %5903 = vmatpush1.bf16.msra.mxu0 %v6882_v0  ;;  %v4377_v60 = vadd.f32 %v4247_v22, %v4104_v8  ;;  %v3836_v0 = vadd.f32 %v8544_v13, %v8536_v46  ;;  %v6950_v46 = vld [vmem:[%s8844_s5 + $0x3b4] ss:$8 sps:$4 sm:$0xff]   ;;  %v6969_v8 = vld [vmem:[%s8844_s5 + $0x230] ss:$8 sps:$4 sm:$0xff]  }
 0x2e3   :  { %v4249_v33 = vpop.f32.mrf.mxu1  ;;  %5904 = vmatprep.subr.bf16.mxu0 %v6890_v5 }
 0x2e4   :  { %5932 = vmatprep.mubr.bf16.mxu0 %v4996_v31  ;;  %v4378_v16 = vadd.f32 %v4249_v33, %v4105_v29  ;;  %v4109_v35 = vadd.f32 %v8564_v32, %v3836_v0  ;;  %v6942_v31 = vld [vmem:[%s8844_s5 + $0x3c0] ss:$8 sps:$4 sm:$0xff]   ;;  %v6974_v29 = vld [vmem:[%s8844_s5 + $0x224] ss:$8 sps:$4 sm:$0xff]  }
 0x2e5   :  { %v4251_v26 = vpop.f32.mrf.mxu1  ;;  %v6998_v0 = vld [vmem:[%s8844_s5 + $0x2a4] ss:$8 sps:$4 sm:$0xff]  }
 0x2e6   :  { %5905 = vmatpush1.bf16.msra.mxu0 %v6888_v48  ;;  %v4955_v48 = vsub.s32 5, %v8413_v41 }
 0x2e7   :  { %v4252_v38 = vpop.f32.mrf.mxu1  ;;  %5906 = vmatprep.subr.bf16.mxu0 %v6896_v34 }
 0x2e9   :  { %v4329_v44 = vpop.f32.mrf.mxu1 }
 0x2ea   :  { %v4381_v25 = vadd.f32 %v4329_v44, %v4108_v9  ;;  %5907 = vmatpush1.bf16.msra.mxu0 %v6894_v3  ;;  %v6930_v9 = vld [vmem:[%s8844_s5 + $0x3e0] ss:$8 sps:$4 sm:$0xff]   ;;  %v4956_v44 = vrot.slane %v8431_v23, %v4955_v48 }
 0x2eb   :  { %v8593_v36 = vpop.f32.mrf.mxu1  ;;  %5908 = vmatprep.subr.bf16.mxu0 %v6902_v43 }
 0x2ec   :  { %v4382_v13 = vadd.f32 %v8593_v36, %v4109_v35  ;;  %v6953_v36 = vld [vmem:[%s8844_s5 + $0x264] ss:$8 sps:$4 sm:$0xff]  }
 0x2ed   :  { %v4333_v50 = vpop.f32.mrf.mxu1  ;;  %v7004_v35 = vld [vmem:[%s8844_s5 + $0x284] ss:$8 sps:$4 sm:$0xff]  }
 0x2ee   :  { %5909 = vmatpush1.bf16.msra.mxu0 %v6900_v56  ;;  %v6948_v56 = vld [vmem:[%s8844_s5 + $0x3b0] ss:$8 sps:$4 sm:$0xff]  }
 0x2ef   :  { %v4334_v7 = vpop.f32.mrf.mxu1  ;;  %5910 = vmatprep.subr.bf16.mxu0 %v6908_v49 }
 0x2f1   :  { %v4520_v59 = vpop.f32.mrf.mxu1 }
 0x2f2   :  { %5911 = vmatpush1.bf16.msra.mxu0 %v6906_v45  ;;  %v4650_v14 = vadd.f32 %v4520_v59, %v4377_v60  ;;  %v6956_v45 = vld [vmem:[%s8844_s5 + $0x3a4] ss:$8 sps:$4 sm:$0xff]   ;;  %v6977_v60 = vld [vmem:[%s8844_s5 + $0x214] ss:$8 sps:$4 sm:$0xff]  }
 0x2f3   :  { %v4522_v47 = vpop.f32.mrf.mxu1  ;;  %5912 = vmatprep.subr.bf16.mxu0 %v6914_v51 }
 0x2f4   :  { %v4651_v18 = vadd.f32 %v4522_v47, %v4378_v16  ;;  %v6954_v47 = vld [vmem:[%s8844_s5 + $0x3a0] ss:$8 sps:$4 sm:$0xff]   ;;  %v6983_v16 = vld [vmem:[%s8844_s5 + $0x2f4] ss:$8 sps:$4 sm:$0xff]  }
 0x2f5   :  { %v4524_v55 = vpop.f32.mrf.mxu1 }
 0x2f6   :  { %5913 = vmatpush1.bf16.msra.mxu0 %v6912_v52  ;;  %v6951_v52 = vld [vmem:[%s8844_s5 + $0x260] ss:$8 sps:$4 sm:$0xff]   ;;  %v6962_v55 = vld [vmem:[%s8844_s5 + $0x394] ss:$8 sps:$4 sm:$0xff]  }
 0x2f7   :  { %v4525_v62 = vpop.f32.mrf.mxu1  ;;  %5914 = vmatprep.subr.bf16.mxu0 %v6920_v1 }
 0x2f9   :  { %v4602_v40 = vpop.f32.mrf.mxu1 }
 0x2fa   :  { %v4654_v17 = vadd.f32 %v4602_v40, %v4381_v25  ;;  %5915 = vmatpush1.bf16.msra.mxu0 %v6918_v57  ;;  %v6945_v25 = vld [vmem:[%s8844_s5 + $0x270] ss:$8 sps:$4 sm:$0xff]  }
 0x2fb   :  { %v4604_v37 = vpop.f32.mrf.mxu1  ;;  %5916 = vmatprep.subr.bf16.mxu0 %v6926_v2  ;;  %v6957_v2 = vld [vmem:[%s8844_s5 + $0x250] ss:$8 sps:$4 sm:$0xff]  }
 0x2fc   :  { %v4655_v32 = vadd.f32 %v4604_v37, %v4382_v13  ;;  %v6960_v40 = vld [vmem:[%s8844_s5 + $0x390] ss:$8 sps:$4 sm:$0xff]   ;;  %v6966_v37 = vld [vmem:[%s8844_s5 + $0x380] ss:$8 sps:$4 sm:$0xff]  }
 0x2fd   :  { %v4606_v53 = vpop.f32.mrf.mxu1  ;;  %v7008_v13 = vld [vmem:[%s8846_s7 + $0x30] sm:$0xff]  }
 0x2fe   :  { %5917 = vmatpush2.bf16.msra.mxu0 %v6924_v28  ;;  %v6963_v28 = vld [vmem:[%s8844_s5 + $0x240] ss:$8 sps:$4 sm:$0xff]  }
 0x2ff   :  { %v4607_v20 = vpop.f32.mrf.mxu1  ;;  %5918 = vmatprep.subr.bf16.mxu0 %v6932_v11  ;;  %v4987_v11 = vmax.f32 %v8570_v58, 0.0  ;;  %v6972_v58 = vld [vmem:[%s8844_s5 + $0x220] ss:$8 sps:$4 sm:$0xff]  }
 0x300   :  { %v6980_v20 = vld [vmem:[%s8844_s5 + $0x204] ss:$8 sps:$4 sm:$0xff]  }
 0x301   :  { %v4793_v15 = vpop.f32.mrf.mxu1  ;;  %v4995_v53 = vpack.c.bf16 %v4987_v11, %v4987_v11 }
 0x302   :  { %v4923_v42 = vadd.f32 %v4793_v15, %v4650_v14  ;;  %5919 = vmatpush2.bf16.msra.mxu0 %v6930_v9  ;;  %v6975_v9 = vld [vmem:[%s8844_s5 + $0x210] ss:$8 sps:$4 sm:$0xff]   ;;  %v6984_v15 = vld [vmem:[%s8844_s5 + $0x2e0] ss:$8 sps:$4 sm:$0xff]  }
 0x303   :  { %v4795_v21 = vpop.f32.mrf.mxu1  ;;  %5920 = vmatprep.subr.bf16.mxu0 %v6938_v54  ;;  %v6978_v54 = vld [vmem:[%s8844_s5 + $0x200] ss:$8 sps:$4 sm:$0xff]   ;;  %v6981_v14 = vld [vmem:[%s8844_s5 + $0x2f0] ss:$8 sps:$4 sm:$0xff]  }
 0x304   :  { %v4973_v30 = vadd.f32 %v4936_v39, %v4923_v42  ;;  %v4924_v6 = vadd.f32 %v4795_v21, %v4651_v18  ;;  %v6986_v39 = vld [vmem:[%s8844_s5 + $0x2e4] ss:$8 sps:$4 sm:$0xff]   ;;  %v6989_v18 = vld [vmem:[%s8844_s5 + $0x2d4] ss:$8 sps:$4 sm:$0xff]   ;;  %v6987_v42 = vld [vmem:[%s8844_s5 + $0x2d0] ss:$8 sps:$4 sm:$0xff]  }
 0x305   :  { %v4797_v5 = vpop.f32.mrf.mxu1  ;;  %v6995_v21 = vld [vmem:[%s8844_s5 + $0x2b4] ss:$8 sps:$4 sm:$0xff]  }
 0x306   :  { %v4974_v22 = vadd.f32 %v4940_v19, %v4924_v6  ;;  %5921 = vmatpush2.bf16.msra.mxu0 %v6936_v27  ;;  %v4981_v33 = vmax.f32 %v4973_v30, 0.0  ;;  %v6992_v19 = vld [vmem:[%s8844_s5 + $0x2c4] ss:$8 sps:$4 sm:$0xff]   ;;  %v6990_v27 = vld [vmem:[%s8844_s5 + $0x2c0] ss:$8 sps:$4 sm:$0xff]  }
 0x307   :  { %v4798_v34 = vpop.f32.mrf.mxu1  ;;  %5922 = vmatprep.subr.bf16.mxu0 %v6944_v24  ;;  %v6993_v24 = vld [vmem:[%s8844_s5 + $0x2b0] ss:$8 sps:$4 sm:$0xff]   ;;  %v6996_v30 = vld [vmem:[%s8844_s5 + $0x2a0] ss:$8 sps:$4 sm:$0xff]   ;;  %v7001_v6 = vld [vmem:[%s8844_s5 + $0x294] ss:$8 sps:$4 sm:$0xff]  }
 0x308   :  { %v4982_v26 = vmax.f32 %v4974_v22, 0.0  ;;  %v4989_v49 = vpack.c.bf16 %v4981_v33, %v4981_v33  ;;  %v6999_v5 = vld [vmem:[%s8844_s5 + $0x290] ss:$8 sps:$4 sm:$0xff]   ;;  %v7002_v22 = vld [vmem:[%s8844_s5 + $0x280] ss:$8 sps:$4 sm:$0xff]  }
 0x309   :  { %v4875_v3 = vpop.f32.mrf.mxu1  ;;  %v7005_v33 = vld [vmem:[%s8846_s7 + $0x78] sm:$0xff]  }
 0x30a   :  { %v4990_v38 = vpack.c.bf16 %v4982_v26, %v4982_v26  ;;  %v4927_v43 = vadd.f32 %v4875_v3, %v4654_v17  ;;  %5923 = vmatpush2.bf16.msra.mxu0 %v6942_v31  ;;  %v6968_v17 = vld [vmem:[%s8844_s5 + $0x384] ss:$8 sps:$4 sm:$0xff]   ;;  %v7006_v34 = vld [vmem:[%s8846_s7 + $0x38] sm:$0xff]  }
 0x30b   :  { %v4877_v50 = vpop.f32.mrf.mxu1  ;;  %5924 = vmatprep.subr.bf16.mxu0 %v6950_v46  ;;  %v7007_v46 = vld [vmem:[%s8846_s7 + $0x70] sm:$0xff]   ;;  %v7009_v26 = vld [vmem:[%s8846_s7 + $0x68] sm:$0xff]  }
 0x30c   :  { %v8673_v23 = vadd.f32 %v8519_v61, %v4927_v43  ;;  %v4928_v7 = vadd.f32 %v4877_v50, %v4655_v32  ;;  %5809 = vmatprep.mubr.bf16.mxu1 %v4990_v38  ;;  %v6959_v61 = vld [vmem:[%s8844_s5 + $0x254] ss:$8 sps:$4 sm:$0xff]   ;;  %v7010_v3 = vld [vmem:[%s8846_s7 + $0x28] sm:$0xff]   ;;  %v7011_v32 = vld [vmem:[%s8846_s7 + $0x60] sm:$0xff]  }
 0x30d   :  { %v4879_v51 = vpop.f32.mrf.mxu1  ;;  %5810 = vmatmul.mubr.bf16.vlgmr.msra.gmra.mxu1 %v4989_v49  ;;  %v7012_v38 = vld [vmem:[%s8846_s7 + $0x20] sm:$0xff]   ;;  %v7013_v43 = vld [vmem:[%s8846_s7 + $0x58] sm:$0xff]   ;;  %v7017_v49 = vld [vmem:[%s8846_s7 + $0x48] sm:$0xff]  }
 0x30e   :  { %v4978_v59 = vadd.f32 %v4956_v44, %v4928_v7  ;;  %5860 = vmatpush1.bf16.msra.mxu1 %v6945_v25  ;;  %5925 = vmatpush2.bf16.msra.mxu0 %v6948_v56  ;;  %v4985_v31 = vmax.f32 %v8673_v23, 0.0  ;;  %v7014_v44 = vld [vmem:[%s8846_s7 + $0x18] sm:$0xff]   ;;  %v7015_v25 = vld [vmem:[%s8846_s7 + $0x50] sm:$0xff]   ;;  %v7018_v50 = vld [vmem:[%s8846_s7 + $0x8] sm:$0xff]  }
 0x30f   :  { %v4880_v1 = vpop.f32.mrf.mxu1  ;;  %5861 = vmatprep.subr.bf16.mxu1 %v6953_v36  ;;  %5926 = vmatprep.subr.bf16.mxu0 %v6956_v45  ;;  %v7016_v56 = vld [vmem:[%s8846_s7 + $0x10] sm:$0xff]   ;;  %v7019_v36 = vld [vmem:[%s8846_s7 + $0x40] sm:$0xff]  }
 0x310   :  { %v4986_v57 = vmax.f32 %v4978_v59, 0.0  ;;  %v4993_v48 = vpack.c.bf16 %v4985_v31, %v4985_v31  ;;  %v7020_v45 = vld [vmem:[%s8846_s7] sm:$0xff]  }
 0x312   :  { %v4994_v62 = vpack.c.bf16 %v4986_v57, %v4986_v57  ;;  %5862 = vmatpush1.bf16.msra.mxu1 %v6951_v52  ;;  %5927 = vmatpush2.bf16.msra.mxu0 %v6954_v47 }
 0x313   :  { %5863 = vmatprep.subr.bf16.mxu1 %v6959_v61  ;;  %5928 = vmatprep.subr.bf16.mxu0 %v6962_v55 }
 0x314   :  { %5891 = vmatprep.mubr.bf16.mxu1 %v4994_v62 }
 0x316   :  { %5864 = vmatpush1.bf16.msra.mxu1 %v6957_v2  ;;  %5929 = vmatpush2.bf16.msra.mxu0 %v6960_v40  ;;  %v5125_v40 = vld [vmem:[%s8847_s6] sm:$0x3] }
 0x317   :  { %5865 = vmatprep.subr.bf16.mxu1 %v6965_v63  ;;  %5930 = vmatprep.subr.bf16.mxu0 %v6968_v17  ;;  %v5130_v63 = vrot.slane %v5125_v40, %v4935_v12  ;;  %v5134_v17 = vrot.slane %v5125_v40, %v4939_v10  ;;  %v6625_v12 = vld [vmem:[%s8848_s8] ss:$0 sm:$0xff] }
 0x31a   :  { %5866 = vmatpush1.bf16.msra.mxu1 %v6963_v28  ;;  %5931 = vmatpush2.bf16.msra.mxu0 %v6966_v37 }
 0x31b   :  { %5867 = vmatprep.subr.bf16.mxu1 %v6971_v4 }
 0x31d   :  { %5933 = vmatmul.mubr.bf16.vlgmr.msra.gmra.mxu0 %v4995_v53 }
 0x31e   :  { %5868 = vmatpush1.bf16.msra.mxu1 %v6969_v8 }
 0x31f   :  { %5869 = vmatprep.subr.bf16.mxu1 %v6974_v29 }
 0x322   :  { %5870 = vmatpush1.bf16.msra.mxu1 %v6972_v58 }
 0x323   :  { %5871 = vmatprep.subr.bf16.mxu1 %v6977_v60 }
 0x326   :  { %5872 = vmatpush1.bf16.msra.mxu1 %v6975_v9 }
 0x327   :  { %5873 = vmatprep.subr.bf16.mxu1 %v6980_v20 }
 0x32a   :  { %5874 = vmatpush1.bf16.msra.mxu1 %v6978_v54 }
 0x32b   :  { %5875 = vmatprep.subr.bf16.mxu1 %v6983_v16 }
 0x32e   :  { %5876 = vmatpush2.bf16.msra.mxu1 %v6981_v14 }
 0x32f   :  { %5877 = vmatprep.subr.bf16.mxu1 %v6986_v39 }
 0x332   :  { %5878 = vmatpush2.bf16.msra.mxu1 %v6984_v15 }
 0x333   :  { %5879 = vmatprep.subr.bf16.mxu1 %v6989_v18 }
 0x336   :  { %5880 = vmatpush2.bf16.msra.mxu1 %v6987_v42 }
 0x337   :  { %5881 = vmatprep.subr.bf16.mxu1 %v6992_v19 }
 0x33a   :  { %5882 = vmatpush2.bf16.msra.mxu1 %v6990_v27 }
 0x33b   :  { %5883 = vmatprep.subr.bf16.mxu1 %v6995_v21 }
 0x33e   :  { %5884 = vmatpush2.bf16.msra.mxu1 %v6993_v24 }
 0x33f   :  { %5885 = vmatprep.subr.bf16.mxu1 %v6998_v0 }
 0x342   :  { %5886 = vmatpush2.bf16.msra.mxu1 %v6996_v30 }
 0x343   :  { %5887 = vmatprep.subr.bf16.mxu1 %v7001_v6 }
 0x346   :  { %5888 = vmatpush2.bf16.msra.mxu1 %v6999_v5 }
 0x347   :  { %5889 = vmatprep.subr.bf16.mxu1 %v7004_v35 }
 0x34a   :  { %5890 = vmatpush2.bf16.msra.mxu1 %v7002_v22 }
 0x34b   :  { %6716 = vmatprep.subr.bf16.mxu1 %v7005_v33 }
 0x34d   :  { %5892 = vmatmul.mubr.bf16.vlgmr.msra.gmra.mxu1 %v4993_v48 }
 0x34e   :  { %6717 = vmatpush3.bf16.msra.mxu1 %v7006_v34 }
 0x34f   :  { %6718 = vmatprep.subr.bf16.mxu1 %v7007_v46 }
 0x352   :  { %6719 = vmatpush3.bf16.msra.mxu1 %v7008_v13 }
 0x353   :  { %6720 = vmatprep.subr.bf16.mxu1 %v7009_v26 }
 0x356   :  { %6721 = vmatpush3.bf16.msra.mxu1 %v7010_v3 }
 0x357   :  { %6722 = vmatprep.subr.bf16.mxu1 %v7011_v32 }
 0x35a   :  { %6723 = vmatpush3.bf16.msra.mxu1 %v7012_v38 }
 0x35b   :  { %6724 = vmatprep.subr.bf16.mxu1 %v7013_v43 }
 0x35e   :  { %6725 = vmatpush3.bf16.msra.mxu1 %v7014_v44 }
 0x35f   :  { %6726 = vmatprep.subr.bf16.mxu1 %v7015_v25 }
 0x362   :  { %6727 = vmatpush3.bf16.msra.mxu1 %v7016_v56 }
 0x363   :  { %6728 = vmatprep.subr.bf16.mxu1 %v7017_v49 }
 0x366   :  { %6729 = vmatpush3.bf16.msra.mxu1 %v7018_v50 }
 0x367   :  { %6730 = vmatprep.subr.bf16.mxu1 %v7019_v36 }
 0x36a   :  { %6731 = vmatpush3.bf16.msra.mxu1 %v7020_v45 }
 0x39d   :  { %v5852_v23 = vpop.f32.mrf.mxu0 }
 0x39f   :  { %v5854_v7 = vpop.f32.mrf.mxu0 }
 0x3a1   :  { %v5856_v51 = vpop.f32.mrf.mxu0 }
 0x3a3   :  { %v5857_v59 = vpop.f32.mrf.mxu0 }
 0x3cd   :  { %v5811_v52 = vpop.f32.mrf.mxu1 }
 0x3ce   :  { %v5812_v28 = vadd.f32 %v5811_v52, %v5130_v63 }
 0x3cf   :  { %v5813_v47 = vpop.f32.mrf.mxu1 }
 0x3d0   :  { %v5814_v37 = vadd.f32 %v5813_v47, %v5134_v17  ;;  %v5853_v11 = vadd.f32 %v5852_v23, %v5812_v28 }
 0x3d1   :  { %v5815_v1 = vpop.f32.mrf.mxu1 }
 0x3d2   :  { %v5855_v53 = vadd.f32 %v5854_v7, %v5814_v37 }
 0x3d3   :  { %v5816_v61 = vpop.f32.mrf.mxu1 }
 0x3dd   :  { %v5934_v55 = vpop.f32.mrf.mxu0 }
 0x3df   :  { %v5936_v57 = vpop.f32.mrf.mxu0 }
 0x3e1   :  { %v5938_v62 = vpop.f32.mrf.mxu0 }
 0x3e3   :  { %v5939_v2 = vpop.f32.mrf.mxu0 }
 0x40d   :  { %v5893_v4 = vpop.f32.mrf.mxu1 }
 0x40e   :  { %v5894_v8 = vadd.f32 %v5893_v4, %v5853_v11 }
 0x40f   :  { %v5895_v29 = vpop.f32.mrf.mxu1 }
 0x410   :  { %v5935_v58 = vadd.f32 %v5934_v55, %v5894_v8  ;;  %v5896_v60 = vadd.f32 %v5895_v29, %v5855_v53 }
 0x411   :  { %v5897_v9 = vpop.f32.mrf.mxu1 }
 0x412   :  { %v5937_v20 = vadd.f32 %v5936_v57, %v5896_v60  ;;  %v5941_v54 = vmax.f32 %v5935_v58, 0.0 }
 0x413   :  { %v5898_v16 = vpop.f32.mrf.mxu1 }
 0x414   :  { %v5942_v14 = vmax.f32 %v5937_v20, 0.0  ;;  %v5943_v15 = vpack.c.bf16 %v5941_v54, %v5941_v54 }
 0x416   :  { %v5944_v39 = vpack.c.bf16 %v5942_v14, %v5942_v14 }
 0x418   :  { %6112 = vmatprep.mubr.bf16.mxu1 %v5944_v39 }
 0x419   :  { %6113 = vmatmul.mubr.bf16.vlgmr.msra.gmra.mxu1 %v5943_v15 }
 0x4d9   :  { %v6732_v41 = vpop.f32.mrf.mxu1 }
 0x4db   :  { %v6733_v10 = vpop.f32.mrf.mxu1 }
 0x4dc   :  { %v6734_v18 = vadd.f32 %v6733_v10, %v6732_v41 }
 0x4dd   :  { %v6735_v42 = vpop.f32.mrf.mxu1 }
 0x4de   :  { %v6115_v19 = vadd.f32 %v6734_v18, %v6625_v12 }
 0x4df   :  { %v6736_v27 = vpop.f32.mrf.mxu1 }
 0x4e0   :  { %6121 = vst.msk [vmem:[%s8849_s9] sm:$0x3] %vm6120_vm1, %v6115_v19 }

</bundles_post_ra>
